<compile_context>
chip_gen: v7x
topology: tpu7x:2x2x1
jax: 0.10.0
libtpu: 0.0.40
codegen_flags: <defaults>
</compile_context>

<pallas_src>
import jax
import jax.numpy as jnp
from jax import lax
from jax.experimental import pallas as pl
from jax.experimental.pallas import tpu as pltpu

KH = KW = 3
OC = 6
POOL = 2


def _round_up(a, b):
    return ((a + b - 1) // b) * b


def _fused_kernel(wc_ref, bc_ref, x_ref, selr_ref, selc_ref,
                  w1_ref, b1_ref, w2_ref, b2_ref, out_ref, m_buf_ref, act_ref):
    # wc_ref:    SMEM (OC, KH*KW)                conv taps (scalars)
    # bc_ref:    SMEM (OC,)                      conv bias
    # x_ref:     VMEM (1, NG, H, LW)             NG lane-groups of NBL lane-packed images
    # selr_ref:  VMEM (Hp, Ho-1)        bf16     even-row selector
    # selc_ref:  VMEM (OC*LW, NBL*OCP)  bf16     even-col select + (image, channel) placement
    # w1_ref:    VMEM (Hp*OCP, DHP)     bf16     fc1 weights, rows permuted to (hp, oc, wp), padded
    # b1_ref:    VMEM (1, DHP)          f32
    # w2_ref:    VMEM (DHP, DO)         f32
    # b2_ref:    VMEM (1, DO)           f32
    # out_ref:   VMEM (1, NB, DO)                logits
    # m_buf_ref: VMEM scratch (Ho-1, OC*LW) f32  pooled maps, one 128-lane slot per channel
    # act_ref:   VMEM scratch (NB, Hp*OCP)  f32  lane-dense flattened pooled activations
    _, NG, H, LW = x_ref.shape
    Ho = H - (KH - 1)
    CW = LW - (KW - 1)          # conv output width on the packed slab
    PW = CW - 1                 # pooled-max width on the packed slab
    Hp = selr_ref.shape[0]
    NB, FPAD = act_ref.shape
    NBL = NB // NG
    OCP = FPAD // Hp            # per-(image, hp) feature slot, padded to a lane tile (128)

    # hoist all scalar taps / biases / selectors out of the per-group loops
    taps = [[wc_ref[oc, t] for t in range(KH * KW)] for oc in range(OC)]
    biases = [bc_ref[oc] for oc in range(OC)]
    selr = selr_ref[...]                                   # (Hp, Ho-1) bf16
    selc = selc_ref[...]                                   # (OC*LW, NBL*OCP) bf16

    # zero the channel-slot padding lanes once per step (they are never rewritten)
    m_buf_ref[...] = jnp.zeros(m_buf_ref.shape, m_buf_ref.dtype)

    for n in range(NG):
        slab = x_ref[0, n, :, :]                           # (H, LW): NBL images side by side
        # 9 shifted views, shared by all 6 output channels
        views = [slab[dy:dy + Ho, dx:dx + CW] for dy in range(KH) for dx in range(KW)]
        for oc in range(OC):
            # valid 3x3 conv: bias-initialized accumulator + 9 scalar*view MACs (VPU)
            acc = taps[oc][0] * views[0] + biases[oc]
            for t in range(1, KH * KW):
                acc = acc + taps[oc][t] * views[t]
            # 2x2 / stride-2 max pool, step 1: pairwise max of the 4 shifted views (VPU)
            m = jnp.maximum(
                jnp.maximum(acc[0:Ho - 1, 0:PW], acc[1:Ho, 0:PW]),
                jnp.maximum(acc[0:Ho - 1, 1:CW], acc[1:Ho, 1:CW]))
            # stage channel oc at its lane-tile-aligned slot (aligned-start masked store)
            m_buf_ref[:, pl.ds(oc * LW, PW)] = m
        # pool step 2 + flatten routing as TWO fused bf16 MXU dots (f32 accumulation):
        m_cat = m_buf_ref[...].astype(jnp.bfloat16)        # (Ho-1, OC*LW)
        t_rows = jnp.dot(selr, m_cat,
                         preferred_element_type=jnp.float32)                  # (Hp, OC*LW)
        q = jnp.dot(t_rows.astype(jnp.bfloat16), selc,
                    preferred_element_type=jnp.float32)                       # (Hp, NBL*OCP)
        # flatten: aligned, unmasked, full-lane-tile (1, OCP) row stores per (image, hp)
        for j in range(NBL):
            b = n * NBL + j
            for hp in range(Hp):
                act_ref[pl.ds(b, 1), pl.ds(hp * OCP, OCP)] = \
                    q[hp:hp + 1, j * OCP:(j + 1) * OCP]

    # fc1 (bf16 MXU operands, f32 accumulation) + ReLU + fc2 for all NB images
    act = act_ref[...].astype(w1_ref.dtype)
    h = jnp.dot(act, w1_ref[...], preferred_element_type=jnp.float32) + b1_ref[...]
    h = jnp.maximum(h, 0.0)
    out = jnp.dot(h, w2_ref[...], preferred_element_type=jnp.float32) + b2_ref[...]
    out_ref[0, :, :] = out.astype(out_ref.dtype)


def mynet1_forward(x, params, images_per_step=None):
    N, C, H, W = x.shape
    assert C == 1
    Ho, Wo = H - (KH - 1), W - (KW - 1)
    Hp, Wp = Ho // POOL, Wo // POOL
    fc1_in = OC * Hp * Wp
    DH = params["w1"].shape[1]
    DO = params["w2"].shape[1]
    assert params["w1"].shape[0] == fc1_in

    NBL = max(1, 128 // W)            # images lane-packed into one conv slab
    LW = NBL * W
    CW = LW - (KW - 1)
    PW = CW - 1
    OCW = OC * Wp
    OCP = _round_up(OCW, 128)         # per-(image, hp) lane-tile-aligned feature slot
    FPAD = Hp * OCP
    DHP = _round_up(DH, 128)

    # ---- images per grid step -------------------------------------------------
    if images_per_step is None:
        cap = max(NBL, (128 // NBL) * NBL)          # up to ~128 images per step
        NB = min(_round_up(N, NBL), cap)
        # v7x megacore: if one step would hold the whole (large) batch, split into
        # two steps so the "parallel" axis shards across both TensorCores.
        # Harmless on single-TC v5e/v6e (each step still has >= 64 images of work).
        if N <= NB and NB >= 32 * NBL:
            NB = _round_up((N + 1) // 2, NBL)
    else:
        NB = _round_up(images_per_step, NBL)
    G = (N + NB - 1) // NB
    N_pad = G * NB
    NG = NB // NBL

    # ---- host-side packing / selector & weight prep ---------------------------
    xs = x.reshape(N, H, W)
    if N_pad != N:
        xs = jnp.concatenate([xs, jnp.zeros((N_pad - N, H, W), xs.dtype)], axis=0)
    # lane-pack NBL images per slab: packed[g, n, h, j*W + w] = image (g*NB + n*NBL + j)
    x_packed = xs.reshape(G, NG, NBL, H, W).transpose(0, 1, 3, 2, 4).reshape(G, NG, H, LW)

    # even-row selector (Hp, Ho-1): picks conv rows 0, 2, 4, ...
    selr = jnp.zeros((Hp, Ho - 1), jnp.float32).at[
        jnp.arange(Hp), 2 * jnp.arange(Hp)].set(1.0).astype(jnp.bfloat16)
    # fused even-column selector + (image, channel) placement:
    #   selc[oc*LW + j*W + 2*wp, j*OCP + oc*Wp + wp] = 1
    oc_i = jnp.repeat(jnp.arange(OC), NBL * Wp)
    j_i = jnp.tile(jnp.repeat(jnp.arange(NBL), Wp), OC)
    wp_i = jnp.tile(jnp.arange(Wp), OC * NBL)
    selc = jnp.zeros((OC * LW, NBL * OCP), jnp.float32).at[
        oc_i * LW + j_i * W + 2 * wp_i, j_i * OCP + oc_i * Wp + wp_i].set(1.0)
    selc = selc.astype(jnp.bfloat16)

    # fc1 weights: torch flatten order (oc, hp, wp) -> kernel layout (hp, oc, wp),
    # zero-padded to (Hp*OCP, DHP); bf16 MXU operands (f32 accumulation in-kernel).
    w1r = params["w1"].reshape(OC, Hp, Wp, DH).transpose(1, 0, 2, 3).reshape(Hp, OCW, DH)
    w1p = jnp.zeros((Hp, OCP, DHP), jnp.float32).at[:, :OCW, :DH].set(w1r)
    w1p = w1p.reshape(FPAD, DHP).astype(jnp.bfloat16)
    b1p = jnp.zeros((1, DHP), jnp.float32).at[0, :DH].set(params["b1"])
    w2p = jnp.zeros((DHP, DO), jnp.float32).at[:DH, :].set(params["w2"])
    b2p = params["b2"].reshape(1, DO)

    w_flat = params["w_conv"].reshape(OC, KH * KW)   # (6, 9), row-major (dy, dx)

    out = pl.pallas_call(
        _fused_kernel,
        out_shape=jax.ShapeDtypeStruct((G, NB, DO), jnp.float32),
        grid=(G,),
        in_specs=[
            pl.BlockSpec(memory_space=pltpu.MemorySpace.SMEM),             # conv taps
            pl.BlockSpec(memory_space=pltpu.MemorySpace.SMEM),             # conv bias
            pl.BlockSpec((1, NG, H, LW), lambda g: (g, 0, 0, 0)),          # packed images
            pl.BlockSpec((Hp, Ho - 1), lambda g: (0, 0)),                  # row selector
            pl.BlockSpec((OC * LW, NBL * OCP), lambda g: (0, 0)),          # fused col selector
            pl.BlockSpec((FPAD, DHP), lambda g: (0, 0)),                   # w1 (VMEM resident)
            pl.BlockSpec((1, DHP), lambda g: (0, 0)),                      # b1
            pl.BlockSpec((DHP, DO), lambda g: (0, 0)),                     # w2
            pl.BlockSpec((1, DO), lambda g: (0, 0)),                       # b2
        ],
        out_specs=pl.BlockSpec((1, NB, DO), lambda g: (g, 0, 0)),
        scratch_shapes=[
            pltpu.VMEM((Ho - 1, OC * LW), jnp.float32),                    # pooled-map staging
            pltpu.VMEM((NB, FPAD), jnp.float32),                           # flattened activations
        ],
        compiler_params=pltpu.CompilerParams(dimension_semantics=("parallel",)),
    )(w_flat, params["b_conv"], x_packed, selr, selc, w1p, b1p, w2p, b2p)
    return out.reshape(N_pad, DO)[:N]


def init_params(key, H):
    fc1_in = ((H - (KH - 1)) // POOL) ** 2 * OC   # same formula as the PyTorch module
    ks = jax.random.split(key, 6)

    def u(k, shape, fan_in):
        bound = 1.0 / jnp.sqrt(float(fan_in))
        return jax.random.uniform(k, shape, jnp.float32, -bound, bound)

    return {
        "w_conv": u(ks[0], (OC, 1, KH, KW), KH * KW),
        "b_conv": u(ks[1], (OC,), KH * KW),
        "w1": u(ks[2], (fc1_in, 120), fc1_in),     # stored transposed vs torch (out,in)
        "b1": u(ks[3], (120,), fc1_in),
        "w2": u(ks[4], (120, 2), 120),
        "b2": u(ks[5], (2,), 120),
    }


def reference_forward(x, p):
    conv = lax.conv_general_dilated(
        x, p["w_conv"], window_strides=(1, 1), padding="VALID",
        dimension_numbers=("NCHW", "OIHW", "NCHW"),
        precision=lax.Precision.HIGHEST,
    ) + p["b_conv"].reshape(1, OC, 1, 1)
    pooled = lax.reduce_window(conv, -jnp.inf, lax.max,
                               (1, 1, POOL, POOL), (1, 1, POOL, POOL), "VALID")
    h = pooled.reshape(pooled.shape[0], -1)
    h = jnp.maximum(jnp.dot(h, p["w1"], precision=lax.Precision.HIGHEST) + p["b1"], 0.0)
    return jnp.dot(h, p["w2"], precision=lax.Precision.HIGHEST) + p["b2"]


if __name__ == "__main__":
    N, H, W = 2, 32, 32   # small spatial size; module formula applied to H=W=32
    key = jax.random.PRNGKey(0)
    kx, kp = jax.random.split(key)
    x = jax.random.normal(kx, (N, 1, H, W), jnp.float32)
    params = init_params(kp, H)

    fwd = jax.jit(mynet1_forward)
    out = jax.block_until_ready(fwd(x, params))
    ref = jax.block_until_ready(reference_forward(x, params))

    assert out.shape == (N, 2), out.shape
    assert jnp.allclose(out, ref, rtol=1e-2, atol=1e-2), (out, ref)
    print("KERNEL_OK")
</pallas_src>

<mosaic_0001>
module attributes {stable_mosaic.version = 11 : i64} {
  func.func @_fused_kernel(%arg0: i32, %arg1: memref<6x9xf32, #tpu.memory_space<smem>>, %arg2: memref<6xf32, #tpu.memory_space<smem>>, %arg3: memref<1x1x32x128xf32, #tpu.memory_space<vmem>>, %arg4: memref<15x29xbf16, #tpu.memory_space<vmem>>, %arg5: memref<768x512xbf16, #tpu.memory_space<vmem>>, %arg6: memref<1920x128xbf16, #tpu.memory_space<vmem>>, %arg7: memref<1x128xf32, #tpu.memory_space<vmem>>, %arg8: memref<128x2xf32, #tpu.memory_space<vmem>>, %arg9: memref<1x2xf32, #tpu.memory_space<vmem>>, %arg10: memref<1x4x2xf32, #tpu.memory_space<vmem>>, %arg11: memref<29x768xf32, #tpu.memory_space<vmem>>, %arg12: memref<4x1920xf32, #tpu.memory_space<vmem>>) attributes {dimension_semantics = [#tpu.dimension_semantics<parallel>], iteration_bounds = array<i64: 1>, scalar_prefetch = 0 : i64, scratch_operands = 2 : i64, tpu.core_type = #tpu.core_type<tc>, window_params = [{transform_indices = @transform_0, window_bounds = array<i64: 6, 9>}, {transform_indices = @transform_1, window_bounds = array<i64: 6>}, {transform_indices = @transform_2, window_bounds = array<i64: 1, 1, 32, 128>}, {pipeline_mode = #tpu.pipeline_mode<synchronous>, transform_indices = @transform_3, window_bounds = array<i64: 15, 29>}, {pipeline_mode = #tpu.pipeline_mode<synchronous>, transform_indices = @transform_4, window_bounds = array<i64: 768, 512>}, {pipeline_mode = #tpu.pipeline_mode<synchronous>, transform_indices = @transform_5, window_bounds = array<i64: 1920, 128>}, {pipeline_mode = #tpu.pipeline_mode<synchronous>, transform_indices = @transform_6, window_bounds = array<i64: 1, 128>}, {pipeline_mode = #tpu.pipeline_mode<synchronous>, transform_indices = @transform_7, window_bounds = array<i64: 128, 2>}, {pipeline_mode = #tpu.pipeline_mode<synchronous>, transform_indices = @transform_8, window_bounds = array<i64: 1, 2>}, {transform_indices = @transform_9, window_bounds = array<i64: 1, 4, 2>}]} {
    %c0 = arith.constant 0 : index
    %c0_0 = arith.constant 0 : index
    %0 = memref.load %arg1[%c0, %c0_0] : memref<6x9xf32, #tpu.memory_space<smem>>
    %c0_1 = arith.constant 0 : index
    %c1 = arith.constant 1 : index
    %1 = memref.load %arg1[%c0_1, %c1] : memref<6x9xf32, #tpu.memory_space<smem>>
    %c0_2 = arith.constant 0 : index
    %c2 = arith.constant 2 : index
    %2 = memref.load %arg1[%c0_2, %c2] : memref<6x9xf32, #tpu.memory_space<smem>>
    %c0_3 = arith.constant 0 : index
    %c3 = arith.constant 3 : index
    %3 = memref.load %arg1[%c0_3, %c3] : memref<6x9xf32, #tpu.memory_space<smem>>
    %c0_4 = arith.constant 0 : index
    %c4 = arith.constant 4 : index
    %4 = memref.load %arg1[%c0_4, %c4] : memref<6x9xf32, #tpu.memory_space<smem>>
    %c0_5 = arith.constant 0 : index
    %c5 = arith.constant 5 : index
    %5 = memref.load %arg1[%c0_5, %c5] : memref<6x9xf32, #tpu.memory_space<smem>>
    %c0_6 = arith.constant 0 : index
    %c6 = arith.constant 6 : index
    %6 = memref.load %arg1[%c0_6, %c6] : memref<6x9xf32, #tpu.memory_space<smem>>
    %c0_7 = arith.constant 0 : index
    %c7 = arith.constant 7 : index
    %7 = memref.load %arg1[%c0_7, %c7] : memref<6x9xf32, #tpu.memory_space<smem>>
    %c0_8 = arith.constant 0 : index
    %c8 = arith.constant 8 : index
    %8 = memref.load %arg1[%c0_8, %c8] : memref<6x9xf32, #tpu.memory_space<smem>>
    %c1_9 = arith.constant 1 : index
    %c0_10 = arith.constant 0 : index
    %9 = memref.load %arg1[%c1_9, %c0_10] : memref<6x9xf32, #tpu.memory_space<smem>>
    %c1_11 = arith.constant 1 : index
    %c1_12 = arith.constant 1 : index
    %10 = memref.load %arg1[%c1_11, %c1_12] : memref<6x9xf32, #tpu.memory_space<smem>>
    %c1_13 = arith.constant 1 : index
    %c2_14 = arith.constant 2 : index
    %11 = memref.load %arg1[%c1_13, %c2_14] : memref<6x9xf32, #tpu.memory_space<smem>>
    %c1_15 = arith.constant 1 : index
    %c3_16 = arith.constant 3 : index
    %12 = memref.load %arg1[%c1_15, %c3_16] : memref<6x9xf32, #tpu.memory_space<smem>>
    %c1_17 = arith.constant 1 : index
    %c4_18 = arith.constant 4 : index
    %13 = memref.load %arg1[%c1_17, %c4_18] : memref<6x9xf32, #tpu.memory_space<smem>>
    %c1_19 = arith.constant 1 : index
    %c5_20 = arith.constant 5 : index
    %14 = memref.load %arg1[%c1_19, %c5_20] : memref<6x9xf32, #tpu.memory_space<smem>>
    %c1_21 = arith.constant 1 : index
    %c6_22 = arith.constant 6 : index
    %15 = memref.load %arg1[%c1_21, %c6_22] : memref<6x9xf32, #tpu.memory_space<smem>>
    %c1_23 = arith.constant 1 : index
    %c7_24 = arith.constant 7 : index
    %16 = memref.load %arg1[%c1_23, %c7_24] : memref<6x9xf32, #tpu.memory_space<smem>>
    %c1_25 = arith.constant 1 : index
    %c8_26 = arith.constant 8 : index
    %17 = memref.load %arg1[%c1_25, %c8_26] : memref<6x9xf32, #tpu.memory_space<smem>>
    %c2_27 = arith.constant 2 : index
    %c0_28 = arith.constant 0 : index
    %18 = memref.load %arg1[%c2_27, %c0_28] : memref<6x9xf32, #tpu.memory_space<smem>>
    %c2_29 = arith.constant 2 : index
    %c1_30 = arith.constant 1 : index
    %19 = memref.load %arg1[%c2_29, %c1_30] : memref<6x9xf32, #tpu.memory_space<smem>>
    %c2_31 = arith.constant 2 : index
    %c2_32 = arith.constant 2 : index
    %20 = memref.load %arg1[%c2_31, %c2_32] : memref<6x9xf32, #tpu.memory_space<smem>>
    %c2_33 = arith.constant 2 : index
    %c3_34 = arith.constant 3 : index
    %21 = memref.load %arg1[%c2_33, %c3_34] : memref<6x9xf32, #tpu.memory_space<smem>>
    %c2_35 = arith.constant 2 : index
    %c4_36 = arith.constant 4 : index
    %22 = memref.load %arg1[%c2_35, %c4_36] : memref<6x9xf32, #tpu.memory_space<smem>>
    %c2_37 = arith.constant 2 : index
    %c5_38 = arith.constant 5 : index
    %23 = memref.load %arg1[%c2_37, %c5_38] : memref<6x9xf32, #tpu.memory_space<smem>>
    %c2_39 = arith.constant 2 : index
    %c6_40 = arith.constant 6 : index
    %24 = memref.load %arg1[%c2_39, %c6_40] : memref<6x9xf32, #tpu.memory_space<smem>>
    %c2_41 = arith.constant 2 : index
    %c7_42 = arith.constant 7 : index
    %25 = memref.load %arg1[%c2_41, %c7_42] : memref<6x9xf32, #tpu.memory_space<smem>>
    %c2_43 = arith.constant 2 : index
    %c8_44 = arith.constant 8 : index
    %26 = memref.load %arg1[%c2_43, %c8_44] : memref<6x9xf32, #tpu.memory_space<smem>>
    %c3_45 = arith.constant 3 : index
    %c0_46 = arith.constant 0 : index
    %27 = memref.load %arg1[%c3_45, %c0_46] : memref<6x9xf32, #tpu.memory_space<smem>>
    %c3_47 = arith.constant 3 : index
    %c1_48 = arith.constant 1 : index
    %28 = memref.load %arg1[%c3_47, %c1_48] : memref<6x9xf32, #tpu.memory_space<smem>>
    %c3_49 = arith.constant 3 : index
    %c2_50 = arith.constant 2 : index
    %29 = memref.load %arg1[%c3_49, %c2_50] : memref<6x9xf32, #tpu.memory_space<smem>>
    %c3_51 = arith.constant 3 : index
    %c3_52 = arith.constant 3 : index
    %30 = memref.load %arg1[%c3_51, %c3_52] : memref<6x9xf32, #tpu.memory_space<smem>>
    %c3_53 = arith.constant 3 : index
    %c4_54 = arith.constant 4 : index
    %31 = memref.load %arg1[%c3_53, %c4_54] : memref<6x9xf32, #tpu.memory_space<smem>>
    %c3_55 = arith.constant 3 : index
    %c5_56 = arith.constant 5 : index
    %32 = memref.load %arg1[%c3_55, %c5_56] : memref<6x9xf32, #tpu.memory_space<smem>>
    %c3_57 = arith.constant 3 : index
    %c6_58 = arith.constant 6 : index
    %33 = memref.load %arg1[%c3_57, %c6_58] : memref<6x9xf32, #tpu.memory_space<smem>>
    %c3_59 = arith.constant 3 : index
    %c7_60 = arith.constant 7 : index
    %34 = memref.load %arg1[%c3_59, %c7_60] : memref<6x9xf32, #tpu.memory_space<smem>>
    %c3_61 = arith.constant 3 : index
    %c8_62 = arith.constant 8 : index
    %35 = memref.load %arg1[%c3_61, %c8_62] : memref<6x9xf32, #tpu.memory_space<smem>>
    %c4_63 = arith.constant 4 : index
    %c0_64 = arith.constant 0 : index
    %36 = memref.load %arg1[%c4_63, %c0_64] : memref<6x9xf32, #tpu.memory_space<smem>>
    %c4_65 = arith.constant 4 : index
    %c1_66 = arith.constant 1 : index
    %37 = memref.load %arg1[%c4_65, %c1_66] : memref<6x9xf32, #tpu.memory_space<smem>>
    %c4_67 = arith.constant 4 : index
    %c2_68 = arith.constant 2 : index
    %38 = memref.load %arg1[%c4_67, %c2_68] : memref<6x9xf32, #tpu.memory_space<smem>>
    %c4_69 = arith.constant 4 : index
    %c3_70 = arith.constant 3 : index
    %39 = memref.load %arg1[%c4_69, %c3_70] : memref<6x9xf32, #tpu.memory_space<smem>>
    %c4_71 = arith.constant 4 : index
    %c4_72 = arith.constant 4 : index
    %40 = memref.load %arg1[%c4_71, %c4_72] : memref<6x9xf32, #tpu.memory_space<smem>>
    %c4_73 = arith.constant 4 : index
    %c5_74 = arith.constant 5 : index
    %41 = memref.load %arg1[%c4_73, %c5_74] : memref<6x9xf32, #tpu.memory_space<smem>>
    %c4_75 = arith.constant 4 : index
    %c6_76 = arith.constant 6 : index
    %42 = memref.load %arg1[%c4_75, %c6_76] : memref<6x9xf32, #tpu.memory_space<smem>>
    %c4_77 = arith.constant 4 : index
    %c7_78 = arith.constant 7 : index
    %43 = memref.load %arg1[%c4_77, %c7_78] : memref<6x9xf32, #tpu.memory_space<smem>>
    %c4_79 = arith.constant 4 : index
    %c8_80 = arith.constant 8 : index
    %44 = memref.load %arg1[%c4_79, %c8_80] : memref<6x9xf32, #tpu.memory_space<smem>>
    %c5_81 = arith.constant 5 : index
    %c0_82 = arith.constant 0 : index
    %45 = memref.load %arg1[%c5_81, %c0_82] : memref<6x9xf32, #tpu.memory_space<smem>>
    %c5_83 = arith.constant 5 : index
    %c1_84 = arith.constant 1 : index
    %46 = memref.load %arg1[%c5_83, %c1_84] : memref<6x9xf32, #tpu.memory_space<smem>>
    %c5_85 = arith.constant 5 : index
    %c2_86 = arith.constant 2 : index
    %47 = memref.load %arg1[%c5_85, %c2_86] : memref<6x9xf32, #tpu.memory_space<smem>>
    %c5_87 = arith.constant 5 : index
    %c3_88 = arith.constant 3 : index
    %48 = memref.load %arg1[%c5_87, %c3_88] : memref<6x9xf32, #tpu.memory_space<smem>>
    %c5_89 = arith.constant 5 : index
    %c4_90 = arith.constant 4 : index
    %49 = memref.load %arg1[%c5_89, %c4_90] : memref<6x9xf32, #tpu.memory_space<smem>>
    %c5_91 = arith.constant 5 : index
    %c5_92 = arith.constant 5 : index
    %50 = memref.load %arg1[%c5_91, %c5_92] : memref<6x9xf32, #tpu.memory_space<smem>>
    %c5_93 = arith.constant 5 : index
    %c6_94 = arith.constant 6 : index
    %51 = memref.load %arg1[%c5_93, %c6_94] : memref<6x9xf32, #tpu.memory_space<smem>>
    %c5_95 = arith.constant 5 : index
    %c7_96 = arith.constant 7 : index
    %52 = memref.load %arg1[%c5_95, %c7_96] : memref<6x9xf32, #tpu.memory_space<smem>>
    %c5_97 = arith.constant 5 : index
    %c8_98 = arith.constant 8 : index
    %53 = memref.load %arg1[%c5_97, %c8_98] : memref<6x9xf32, #tpu.memory_space<smem>>
    %c0_99 = arith.constant 0 : index
    %54 = memref.load %arg2[%c0_99] : memref<6xf32, #tpu.memory_space<smem>>
    %c1_100 = arith.constant 1 : index
    %55 = memref.load %arg2[%c1_100] : memref<6xf32, #tpu.memory_space<smem>>
    %c2_101 = arith.constant 2 : index
    %56 = memref.load %arg2[%c2_101] : memref<6xf32, #tpu.memory_space<smem>>
    %c3_102 = arith.constant 3 : index
    %57 = memref.load %arg2[%c3_102] : memref<6xf32, #tpu.memory_space<smem>>
    %c4_103 = arith.constant 4 : index
    %58 = memref.load %arg2[%c4_103] : memref<6xf32, #tpu.memory_space<smem>>
    %c5_104 = arith.constant 5 : index
    %59 = memref.load %arg2[%c5_104] : memref<6xf32, #tpu.memory_space<smem>>
    %c0_105 = arith.constant 0 : index
    %c0_106 = arith.constant 0 : index
    %60 = vector.load %arg4[%c0_105, %c0_106] : memref<15x29xbf16, #tpu.memory_space<vmem>>, vector<15x29xbf16>
    %c0_107 = arith.constant 0 : index
    %c0_108 = arith.constant 0 : index
    %61 = vector.load %arg5[%c0_107, %c0_108] : memref<768x512xbf16, #tpu.memory_space<vmem>>, vector<768x512xbf16>
    %cst = arith.constant 0.000000e+00 : f32
    %62 = vector.broadcast %cst : f32 to vector<29x768xf32>
    %c0_109 = arith.constant 0 : index
    %c0_110 = arith.constant 0 : index
    %63 = vector.load %arg11[%c0_109, %c0_110] : memref<29x768xf32, #tpu.memory_space<vmem>>, vector<29x768xf32>
    tpu.vector_store %arg11[%c0_109, %c0_110], %62 {strides = array<i32>} : memref<29x768xf32, #tpu.memory_space<vmem>>, vector<29x768xf32>,
    %c0_111 = arith.constant 0 : index
    %c0_112 = arith.constant 0 : index
    %c0_113 = arith.constant 0 : index
    %c0_114 = arith.constant 0 : index
    %64 = vector.load %arg3[%c0_111, %c0_112, %c0_113, %c0_114] : memref<1x1x32x128xf32, #tpu.memory_space<vmem>>, vector<1x1x32x128xf32>
    %65 = vector.shape_cast %64 : vector<1x1x32x128xf32> to vector<32x128xf32>
    %66 = vector.extract_strided_slice %65 {offsets = [0, 0], sizes = [30, 126], strides = [1, 1]} : vector<32x128xf32> to vector<30x126xf32>
    %67 = vector.extract_strided_slice %65 {offsets = [0, 1], sizes = [30, 126], strides = [1, 1]} : vector<32x128xf32> to vector<30x126xf32>
    %68 = vector.extract_strided_slice %65 {offsets = [0, 2], sizes = [30, 126], strides = [1, 1]} : vector<32x128xf32> to vector<30x126xf32>
    %69 = vector.extract_strided_slice %65 {offsets = [1, 0], sizes = [30, 126], strides = [1, 1]} : vector<32x128xf32> to vector<30x126xf32>
    %70 = vector.extract_strided_slice %65 {offsets = [1, 1], sizes = [30, 126], strides = [1, 1]} : vector<32x128xf32> to vector<30x126xf32>
    %71 = vector.extract_strided_slice %65 {offsets = [1, 2], sizes = [30, 126], strides = [1, 1]} : vector<32x128xf32> to vector<30x126xf32>
    %72 = vector.extract_strided_slice %65 {offsets = [2, 0], sizes = [30, 126], strides = [1, 1]} : vector<32x128xf32> to vector<30x126xf32>
    %73 = vector.extract_strided_slice %65 {offsets = [2, 1], sizes = [30, 126], strides = [1, 1]} : vector<32x128xf32> to vector<30x126xf32>
    %74 = vector.extract_strided_slice %65 {offsets = [2, 2], sizes = [30, 126], strides = [1, 1]} : vector<32x128xf32> to vector<30x126xf32>
    %75 = vector.broadcast %0 : f32 to vector<30x126xf32>
    %76 = arith.mulf %75, %66 : vector<30x126xf32>
    %77 = vector.broadcast %54 : f32 to vector<30x126xf32>
    %78 = arith.addf %76, %77 : vector<30x126xf32>
    %79 = vector.broadcast %1 : f32 to vector<30x126xf32>
    %80 = arith.mulf %79, %67 : vector<30x126xf32>
    %81 = arith.addf %78, %80 : vector<30x126xf32>
    %82 = vector.broadcast %2 : f32 to vector<30x126xf32>
    %83 = arith.mulf %82, %68 : vector<30x126xf32>
    %84 = arith.addf %81, %83 : vector<30x126xf32>
    %85 = vector.broadcast %3 : f32 to vector<30x126xf32>
    %86 = arith.mulf %85, %69 : vector<30x126xf32>
    %87 = arith.addf %84, %86 : vector<30x126xf32>
    %88 = vector.broadcast %4 : f32 to vector<30x126xf32>
    %89 = arith.mulf %88, %70 : vector<30x126xf32>
    %90 = arith.addf %87, %89 : vector<30x126xf32>
    %91 = vector.broadcast %5 : f32 to vector<30x126xf32>
    %92 = arith.mulf %91, %71 : vector<30x126xf32>
    %93 = arith.addf %90, %92 : vector<30x126xf32>
    %94 = vector.broadcast %6 : f32 to vector<30x126xf32>
    %95 = arith.mulf %94, %72 : vector<30x126xf32>
    %96 = arith.addf %93, %95 : vector<30x126xf32>
    %97 = vector.broadcast %7 : f32 to vector<30x126xf32>
    %98 = arith.mulf %97, %73 : vector<30x126xf32>
    %99 = arith.addf %96, %98 : vector<30x126xf32>
    %100 = vector.broadcast %8 : f32 to vector<30x126xf32>
    %101 = arith.mulf %100, %74 : vector<30x126xf32>
    %102 = arith.addf %99, %101 : vector<30x126xf32>
    %103 = vector.extract_strided_slice %102 {offsets = [0, 0], sizes = [29, 125], strides = [1, 1]} : vector<30x126xf32> to vector<29x125xf32>
    %104 = vector.extract_strided_slice %102 {offsets = [1, 0], sizes = [29, 125], strides = [1, 1]} : vector<30x126xf32> to vector<29x125xf32>
    %105 = arith.maximumf %103, %104 : vector<29x125xf32>
    %106 = vector.extract_strided_slice %102 {offsets = [0, 1], sizes = [29, 125], strides = [1, 1]} : vector<30x126xf32> to vector<29x125xf32>
    %107 = vector.extract_strided_slice %102 {offsets = [1, 1], sizes = [29, 125], strides = [1, 1]} : vector<30x126xf32> to vector<29x125xf32>
    %108 = arith.maximumf %106, %107 : vector<29x125xf32>
    %109 = arith.maximumf %105, %108 : vector<29x125xf32>
    %c0_115 = arith.constant 0 : index
    %c0_116 = arith.constant 0 : index
    %110 = vector.load %arg11[%c0_115, %c0_116] : memref<29x768xf32, #tpu.memory_space<vmem>>, vector<29x125xf32>
    tpu.vector_store %arg11[%c0_115, %c0_116], %109 {strides = array<i32>} : memref<29x768xf32, #tpu.memory_space<vmem>>, vector<29x125xf32>,
    %111 = vector.broadcast %9 : f32 to vector<30x126xf32>
    %112 = arith.mulf %111, %66 : vector<30x126xf32>
    %113 = vector.broadcast %55 : f32 to vector<30x126xf32>
    %114 = arith.addf %112, %113 : vector<30x126xf32>
    %115 = vector.broadcast %10 : f32 to vector<30x126xf32>
    %116 = arith.mulf %115, %67 : vector<30x126xf32>
    %117 = arith.addf %114, %116 : vector<30x126xf32>
    %118 = vector.broadcast %11 : f32 to vector<30x126xf32>
    %119 = arith.mulf %118, %68 : vector<30x126xf32>
    %120 = arith.addf %117, %119 : vector<30x126xf32>
    %121 = vector.broadcast %12 : f32 to vector<30x126xf32>
    %122 = arith.mulf %121, %69 : vector<30x126xf32>
    %123 = arith.addf %120, %122 : vector<30x126xf32>
    %124 = vector.broadcast %13 : f32 to vector<30x126xf32>
    %125 = arith.mulf %124, %70 : vector<30x126xf32>
    %126 = arith.addf %123, %125 : vector<30x126xf32>
    %127 = vector.broadcast %14 : f32 to vector<30x126xf32>
    %128 = arith.mulf %127, %71 : vector<30x126xf32>
    %129 = arith.addf %126, %128 : vector<30x126xf32>
    %130 = vector.broadcast %15 : f32 to vector<30x126xf32>
    %131 = arith.mulf %130, %72 : vector<30x126xf32>
    %132 = arith.addf %129, %131 : vector<30x126xf32>
    %133 = vector.broadcast %16 : f32 to vector<30x126xf32>
    %134 = arith.mulf %133, %73 : vector<30x126xf32>
    %135 = arith.addf %132, %134 : vector<30x126xf32>
    %136 = vector.broadcast %17 : f32 to vector<30x126xf32>
    %137 = arith.mulf %136, %74 : vector<30x126xf32>
    %138 = arith.addf %135, %137 : vector<30x126xf32>
    %139 = vector.extract_strided_slice %138 {offsets = [0, 0], sizes = [29, 125], strides = [1, 1]} : vector<30x126xf32> to vector<29x125xf32>
    %140 = vector.extract_strided_slice %138 {offsets = [1, 0], sizes = [29, 125], strides = [1, 1]} : vector<30x126xf32> to vector<29x125xf32>
    %141 = arith.maximumf %139, %140 : vector<29x125xf32>
    %142 = vector.extract_strided_slice %138 {offsets = [0, 1], sizes = [29, 125], strides = [1, 1]} : vector<30x126xf32> to vector<29x125xf32>
    %143 = vector.extract_strided_slice %138 {offsets = [1, 1], sizes = [29, 125], strides = [1, 1]} : vector<30x126xf32> to vector<29x125xf32>
    %144 = arith.maximumf %142, %143 : vector<29x125xf32>
    %145 = arith.maximumf %141, %144 : vector<29x125xf32>
    %c0_117 = arith.constant 0 : index
    %c128 = arith.constant 128 : index
    %146 = vector.load %arg11[%c0_117, %c128] : memref<29x768xf32, #tpu.memory_space<vmem>>, vector<29x125xf32>
    tpu.vector_store %arg11[%c0_117, %c128], %145 {strides = array<i32>} : memref<29x768xf32, #tpu.memory_space<vmem>>, vector<29x125xf32>,
    %147 = vector.broadcast %18 : f32 to vector<30x126xf32>
    %148 = arith.mulf %147, %66 : vector<30x126xf32>
    %149 = vector.broadcast %56 : f32 to vector<30x126xf32>
    %150 = arith.addf %148, %149 : vector<30x126xf32>
    %151 = vector.broadcast %19 : f32 to vector<30x126xf32>
    %152 = arith.mulf %151, %67 : vector<30x126xf32>
    %153 = arith.addf %150, %152 : vector<30x126xf32>
    %154 = vector.broadcast %20 : f32 to vector<30x126xf32>
    %155 = arith.mulf %154, %68 : vector<30x126xf32>
    %156 = arith.addf %153, %155 : vector<30x126xf32>
    %157 = vector.broadcast %21 : f32 to vector<30x126xf32>
    %158 = arith.mulf %157, %69 : vector<30x126xf32>
    %159 = arith.addf %156, %158 : vector<30x126xf32>
    %160 = vector.broadcast %22 : f32 to vector<30x126xf32>
    %161 = arith.mulf %160, %70 : vector<30x126xf32>
    %162 = arith.addf %159, %161 : vector<30x126xf32>
    %163 = vector.broadcast %23 : f32 to vector<30x126xf32>
    %164 = arith.mulf %163, %71 : vector<30x126xf32>
    %165 = arith.addf %162, %164 : vector<30x126xf32>
    %166 = vector.broadcast %24 : f32 to vector<30x126xf32>
    %167 = arith.mulf %166, %72 : vector<30x126xf32>
    %168 = arith.addf %165, %167 : vector<30x126xf32>
    %169 = vector.broadcast %25 : f32 to vector<30x126xf32>
    %170 = arith.mulf %169, %73 : vector<30x126xf32>
    %171 = arith.addf %168, %170 : vector<30x126xf32>
    %172 = vector.broadcast %26 : f32 to vector<30x126xf32>
    %173 = arith.mulf %172, %74 : vector<30x126xf32>
    %174 = arith.addf %171, %173 : vector<30x126xf32>
    %175 = vector.extract_strided_slice %174 {offsets = [0, 0], sizes = [29, 125], strides = [1, 1]} : vector<30x126xf32> to vector<29x125xf32>
    %176 = vector.extract_strided_slice %174 {offsets = [1, 0], sizes = [29, 125], strides = [1, 1]} : vector<30x126xf32> to vector<29x125xf32>
    %177 = arith.maximumf %175, %176 : vector<29x125xf32>
    %178 = vector.extract_strided_slice %174 {offsets = [0, 1], sizes = [29, 125], strides = [1, 1]} : vector<30x126xf32> to vector<29x125xf32>
    %179 = vector.extract_strided_slice %174 {offsets = [1, 1], sizes = [29, 125], strides = [1, 1]} : vector<30x126xf32> to vector<29x125xf32>
    %180 = arith.maximumf %178, %179 : vector<29x125xf32>
    %181 = arith.maximumf %177, %180 : vector<29x125xf32>
    %c0_118 = arith.constant 0 : index
    %c256 = arith.constant 256 : index
    %182 = vector.load %arg11[%c0_118, %c256] : memref<29x768xf32, #tpu.memory_space<vmem>>, vector<29x125xf32>
    tpu.vector_store %arg11[%c0_118, %c256], %181 {strides = array<i32>} : memref<29x768xf32, #tpu.memory_space<vmem>>, vector<29x125xf32>,
    %183 = vector.broadcast %27 : f32 to vector<30x126xf32>
    %184 = arith.mulf %183, %66 : vector<30x126xf32>
    %185 = vector.broadcast %57 : f32 to vector<30x126xf32>
    %186 = arith.addf %184, %185 : vector<30x126xf32>
    %187 = vector.broadcast %28 : f32 to vector<30x126xf32>
    %188 = arith.mulf %187, %67 : vector<30x126xf32>
    %189 = arith.addf %186, %188 : vector<30x126xf32>
    %190 = vector.broadcast %29 : f32 to vector<30x126xf32>
    %191 = arith.mulf %190, %68 : vector<30x126xf32>
    %192 = arith.addf %189, %191 : vector<30x126xf32>
    %193 = vector.broadcast %30 : f32 to vector<30x126xf32>
    %194 = arith.mulf %193, %69 : vector<30x126xf32>
    %195 = arith.addf %192, %194 : vector<30x126xf32>
    %196 = vector.broadcast %31 : f32 to vector<30x126xf32>
    %197 = arith.mulf %196, %70 : vector<30x126xf32>
    %198 = arith.addf %195, %197 : vector<30x126xf32>
    %199 = vector.broadcast %32 : f32 to vector<30x126xf32>
    %200 = arith.mulf %199, %71 : vector<30x126xf32>
    %201 = arith.addf %198, %200 : vector<30x126xf32>
    %202 = vector.broadcast %33 : f32 to vector<30x126xf32>
    %203 = arith.mulf %202, %72 : vector<30x126xf32>
    %204 = arith.addf %201, %203 : vector<30x126xf32>
    %205 = vector.broadcast %34 : f32 to vector<30x126xf32>
    %206 = arith.mulf %205, %73 : vector<30x126xf32>
    %207 = arith.addf %204, %206 : vector<30x126xf32>
    %208 = vector.broadcast %35 : f32 to vector<30x126xf32>
    %209 = arith.mulf %208, %74 : vector<30x126xf32>
    %210 = arith.addf %207, %209 : vector<30x126xf32>
    %211 = vector.extract_strided_slice %210 {offsets = [0, 0], sizes = [29, 125], strides = [1, 1]} : vector<30x126xf32> to vector<29x125xf32>
    %212 = vector.extract_strided_slice %210 {offsets = [1, 0], sizes = [29, 125], strides = [1, 1]} : vector<30x126xf32> to vector<29x125xf32>
    %213 = arith.maximumf %211, %212 : vector<29x125xf32>
    %214 = vector.extract_strided_slice %210 {offsets = [0, 1], sizes = [29, 125], strides = [1, 1]} : vector<30x126xf32> to vector<29x125xf32>
    %215 = vector.extract_strided_slice %210 {offsets = [1, 1], sizes = [29, 125], strides = [1, 1]} : vector<30x126xf32> to vector<29x125xf32>
    %216 = arith.maximumf %214, %215 : vector<29x125xf32>
    %217 = arith.maximumf %213, %216 : vector<29x125xf32>
    %c0_119 = arith.constant 0 : index
    %c384 = arith.constant 384 : index
    %218 = vector.load %arg11[%c0_119, %c384] : memref<29x768xf32, #tpu.memory_space<vmem>>, vector<29x125xf32>
    tpu.vector_store %arg11[%c0_119, %c384], %217 {strides = array<i32>} : memref<29x768xf32, #tpu.memory_space<vmem>>, vector<29x125xf32>,
    %219 = vector.broadcast %36 : f32 to vector<30x126xf32>
    %220 = arith.mulf %219, %66 : vector<30x126xf32>
    %221 = vector.broadcast %58 : f32 to vector<30x126xf32>
    %222 = arith.addf %220, %221 : vector<30x126xf32>
    %223 = vector.broadcast %37 : f32 to vector<30x126xf32>
    %224 = arith.mulf %223, %67 : vector<30x126xf32>
    %225 = arith.addf %222, %224 : vector<30x126xf32>
    %226 = vector.broadcast %38 : f32 to vector<30x126xf32>
    %227 = arith.mulf %226, %68 : vector<30x126xf32>
    %228 = arith.addf %225, %227 : vector<30x126xf32>
    %229 = vector.broadcast %39 : f32 to vector<30x126xf32>
    %230 = arith.mulf %229, %69 : vector<30x126xf32>
    %231 = arith.addf %228, %230 : vector<30x126xf32>
    %232 = vector.broadcast %40 : f32 to vector<30x126xf32>
    %233 = arith.mulf %232, %70 : vector<30x126xf32>
    %234 = arith.addf %231, %233 : vector<30x126xf32>
    %235 = vector.broadcast %41 : f32 to vector<30x126xf32>
    %236 = arith.mulf %235, %71 : vector<30x126xf32>
    %237 = arith.addf %234, %236 : vector<30x126xf32>
    %238 = vector.broadcast %42 : f32 to vector<30x126xf32>
    %239 = arith.mulf %238, %72 : vector<30x126xf32>
    %240 = arith.addf %237, %239 : vector<30x126xf32>
    %241 = vector.broadcast %43 : f32 to vector<30x126xf32>
    %242 = arith.mulf %241, %73 : vector<30x126xf32>
    %243 = arith.addf %240, %242 : vector<30x126xf32>
    %244 = vector.broadcast %44 : f32 to vector<30x126xf32>
    %245 = arith.mulf %244, %74 : vector<30x126xf32>
    %246 = arith.addf %243, %245 : vector<30x126xf32>
    %247 = vector.extract_strided_slice %246 {offsets = [0, 0], sizes = [29, 125], strides = [1, 1]} : vector<30x126xf32> to vector<29x125xf32>
    %248 = vector.extract_strided_slice %246 {offsets = [1, 0], sizes = [29, 125], strides = [1, 1]} : vector<30x126xf32> to vector<29x125xf32>
    %249 = arith.maximumf %247, %248 : vector<29x125xf32>
    %250 = vector.extract_strided_slice %246 {offsets = [0, 1], sizes = [29, 125], strides = [1, 1]} : vector<30x126xf32> to vector<29x125xf32>
    %251 = vector.extract_strided_slice %246 {offsets = [1, 1], sizes = [29, 125], strides = [1, 1]} : vector<30x126xf32> to vector<29x125xf32>
    %252 = arith.maximumf %250, %251 : vector<29x125xf32>
    %253 = arith.maximumf %249, %252 : vector<29x125xf32>
    %c0_120 = arith.constant 0 : index
    %c512 = arith.constant 512 : index
    %254 = vector.load %arg11[%c0_120, %c512] : memref<29x768xf32, #tpu.memory_space<vmem>>, vector<29x125xf32>
    tpu.vector_store %arg11[%c0_120, %c512], %253 {strides = array<i32>} : memref<29x768xf32, #tpu.memory_space<vmem>>, vector<29x125xf32>,
    %255 = vector.broadcast %45 : f32 to vector<30x126xf32>
    %256 = arith.mulf %255, %66 : vector<30x126xf32>
    %257 = vector.broadcast %59 : f32 to vector<30x126xf32>
    %258 = arith.addf %256, %257 : vector<30x126xf32>
    %259 = vector.broadcast %46 : f32 to vector<30x126xf32>
    %260 = arith.mulf %259, %67 : vector<30x126xf32>
    %261 = arith.addf %258, %260 : vector<30x126xf32>
    %262 = vector.broadcast %47 : f32 to vector<30x126xf32>
    %263 = arith.mulf %262, %68 : vector<30x126xf32>
    %264 = arith.addf %261, %263 : vector<30x126xf32>
    %265 = vector.broadcast %48 : f32 to vector<30x126xf32>
    %266 = arith.mulf %265, %69 : vector<30x126xf32>
    %267 = arith.addf %264, %266 : vector<30x126xf32>
    %268 = vector.broadcast %49 : f32 to vector<30x126xf32>
    %269 = arith.mulf %268, %70 : vector<30x126xf32>
    %270 = arith.addf %267, %269 : vector<30x126xf32>
    %271 = vector.broadcast %50 : f32 to vector<30x126xf32>
    %272 = arith.mulf %271, %71 : vector<30x126xf32>
    %273 = arith.addf %270, %272 : vector<30x126xf32>
    %274 = vector.broadcast %51 : f32 to vector<30x126xf32>
    %275 = arith.mulf %274, %72 : vector<30x126xf32>
    %276 = arith.addf %273, %275 : vector<30x126xf32>
    %277 = vector.broadcast %52 : f32 to vector<30x126xf32>
    %278 = arith.mulf %277, %73 : vector<30x126xf32>
    %279 = arith.addf %276, %278 : vector<30x126xf32>
    %280 = vector.broadcast %53 : f32 to vector<30x126xf32>
    %281 = arith.mulf %280, %74 : vector<30x126xf32>
    %282 = arith.addf %279, %281 : vector<30x126xf32>
    %283 = vector.extract_strided_slice %282 {offsets = [0, 0], sizes = [29, 125], strides = [1, 1]} : vector<30x126xf32> to vector<29x125xf32>
    %284 = vector.extract_strided_slice %282 {offsets = [1, 0], sizes = [29, 125], strides = [1, 1]} : vector<30x126xf32> to vector<29x125xf32>
    %285 = arith.maximumf %283, %284 : vector<29x125xf32>
    %286 = vector.extract_strided_slice %282 {offsets = [0, 1], sizes = [29, 125], strides = [1, 1]} : vector<30x126xf32> to vector<29x125xf32>
    %287 = vector.extract_strided_slice %282 {offsets = [1, 1], sizes = [29, 125], strides = [1, 1]} : vector<30x126xf32> to vector<29x125xf32>
    %288 = arith.maximumf %286, %287 : vector<29x125xf32>
    %289 = arith.maximumf %285, %288 : vector<29x125xf32>
    %c0_121 = arith.constant 0 : index
    %c640 = arith.constant 640 : index
    %290 = vector.load %arg11[%c0_121, %c640] : memref<29x768xf32, #tpu.memory_space<vmem>>, vector<29x125xf32>
    tpu.vector_store %arg11[%c0_121, %c640], %289 {strides = array<i32>} : memref<29x768xf32, #tpu.memory_space<vmem>>, vector<29x125xf32>,
    %c0_122 = arith.constant 0 : index
    %c0_123 = arith.constant 0 : index
    %291 = vector.load %arg11[%c0_122, %c0_123] : memref<29x768xf32, #tpu.memory_space<vmem>>, vector<29x768xf32>
    %292 = arith.truncf %291 : vector<29x768xf32> to vector<29x768xbf16>
    %cst_124 = arith.constant dense<0.000000e+00> : vector<15x768xf32>
    %293 = tpu.matmul %60, %292, %cst_124 {dimension_numbers = #tpu.dot_dimension_numbers<[1], [0], [0], [1], [0, 0, 1, 1], [], []>} : vector<15x29xbf16>, vector<29x768xbf16>, vector<15x768xf32> -> vector<15x768xf32>
    %294 = arith.truncf %293 : vector<15x768xf32> to vector<15x768xbf16>
    %cst_125 = arith.constant dense<0.000000e+00> : vector<15x512xf32>
    %295 = tpu.matmul %294, %61, %cst_125 {dimension_numbers = #tpu.dot_dimension_numbers<[1], [0], [0], [1], [0, 0, 1, 1], [], []>} : vector<15x768xbf16>, vector<768x512xbf16>, vector<15x512xf32> -> vector<15x512xf32>
    %296 = vector.extract_strided_slice %295 {offsets = [0, 0], sizes = [1, 128], strides = [1, 1]} : vector<15x512xf32> to vector<1x128xf32>
    %c0_126 = arith.constant 0 : index
    %c0_127 = arith.constant 0 : index
    %297 = vector.load %arg12[%c0_126, %c0_127] : memref<4x1920xf32, #tpu.memory_space<vmem>>, vector<1x128xf32>
    tpu.vector_store %arg12[%c0_126, %c0_127], %296 {strides = array<i32>} : memref<4x1920xf32, #tpu.memory_space<vmem>>, vector<1x128xf32>,
    %298 = vector.extract_strided_slice %295 {offsets = [1, 0], sizes = [1, 128], strides = [1, 1]} : vector<15x512xf32> to vector<1x128xf32>
    %c0_128 = arith.constant 0 : index
    %c128_129 = arith.constant 128 : index
    %299 = vector.load %arg12[%c0_128, %c128_129] : memref<4x1920xf32, #tpu.memory_space<vmem>>, vector<1x128xf32>
    tpu.vector_store %arg12[%c0_128, %c128_129], %298 {strides = array<i32>} : memref<4x1920xf32, #tpu.memory_space<vmem>>, vector<1x128xf32>,
    %300 = vector.extract_strided_slice %295 {offsets = [2, 0], sizes = [1, 128], strides = [1, 1]} : vector<15x512xf32> to vector<1x128xf32>
    %c0_130 = arith.constant 0 : index
    %c256_131 = arith.constant 256 : index
    %301 = vector.load %arg12[%c0_130, %c256_131] : memref<4x1920xf32, #tpu.memory_space<vmem>>, vector<1x128xf32>
    tpu.vector_store %arg12[%c0_130, %c256_131], %300 {strides = array<i32>} : memref<4x1920xf32, #tpu.memory_space<vmem>>, vector<1x128xf32>,
    %302 = vector.extract_strided_slice %295 {offsets = [3, 0], sizes = [1, 128], strides = [1, 1]} : vector<15x512xf32> to vector<1x128xf32>
    %c0_132 = arith.constant 0 : index
    %c384_133 = arith.constant 384 : index
    %303 = vector.load %arg12[%c0_132, %c384_133] : memref<4x1920xf32, #tpu.memory_space<vmem>>, vector<1x128xf32>
    tpu.vector_store %arg12[%c0_132, %c384_133], %302 {strides = array<i32>} : memref<4x1920xf32, #tpu.memory_space<vmem>>, vector<1x128xf32>,
    %304 = vector.extract_strided_slice %295 {offsets = [4, 0], sizes = [1, 128], strides = [1, 1]} : vector<15x512xf32> to vector<1x128xf32>
    %c0_134 = arith.constant 0 : index
    %c512_135 = arith.constant 512 : index
    %305 = vector.load %arg12[%c0_134, %c512_135] : memref<4x1920xf32, #tpu.memory_space<vmem>>, vector<1x128xf32>
    tpu.vector_store %arg12[%c0_134, %c512_135], %304 {strides = array<i32>} : memref<4x1920xf32, #tpu.memory_space<vmem>>, vector<1x128xf32>,
    %306 = vector.extract_strided_slice %295 {offsets = [5, 0], sizes = [1, 128], strides = [1, 1]} : vector<15x512xf32> to vector<1x128xf32>
    %c0_136 = arith.constant 0 : index
    %c640_137 = arith.constant 640 : index
    %307 = vector.load %arg12[%c0_136, %c640_137] : memref<4x1920xf32, #tpu.memory_space<vmem>>, vector<1x128xf32>
    tpu.vector_store %arg12[%c0_136, %c640_137], %306 {strides = array<i32>} : memref<4x1920xf32, #tpu.memory_space<vmem>>, vector<1x128xf32>,
    %308 = vector.extract_strided_slice %295 {offsets = [6, 0], sizes = [1, 128], strides = [1, 1]} : vector<15x512xf32> to vector<1x128xf32>
    %c0_138 = arith.constant 0 : index
    %c768 = arith.constant 768 : index
    %309 = vector.load %arg12[%c0_138, %c768] : memref<4x1920xf32, #tpu.memory_space<vmem>>, vector<1x128xf32>
    tpu.vector_store %arg12[%c0_138, %c768], %308 {strides = array<i32>} : memref<4x1920xf32, #tpu.memory_space<vmem>>, vector<1x128xf32>,
    %310 = vector.extract_strided_slice %295 {offsets = [7, 0], sizes = [1, 128], strides = [1, 1]} : vector<15x512xf32> to vector<1x128xf32>
    %c0_139 = arith.constant 0 : index
    %c896 = arith.constant 896 : index
    %311 = vector.load %arg12[%c0_139, %c896] : memref<4x1920xf32, #tpu.memory_space<vmem>>, vector<1x128xf32>
    tpu.vector_store %arg12[%c0_139, %c896], %310 {strides = array<i32>} : memref<4x1920xf32, #tpu.memory_space<vmem>>, vector<1x128xf32>,
    %312 = vector.extract_strided_slice %295 {offsets = [8, 0], sizes = [1, 128], strides = [1, 1]} : vector<15x512xf32> to vector<1x128xf32>
    %c0_140 = arith.constant 0 : index
    %c1024 = arith.constant 1024 : index
    %313 = vector.load %arg12[%c0_140, %c1024] : memref<4x1920xf32, #tpu.memory_space<vmem>>, vector<1x128xf32>
    tpu.vector_store %arg12[%c0_140, %c1024], %312 {strides = array<i32>} : memref<4x1920xf32, #tpu.memory_space<vmem>>, vector<1x128xf32>,
    %314 = vector.extract_strided_slice %295 {offsets = [9, 0], sizes = [1, 128], strides = [1, 1]} : vector<15x512xf32> to vector<1x128xf32>
    %c0_141 = arith.constant 0 : index
    %c1152 = arith.constant 1152 : index
    %315 = vector.load %arg12[%c0_141, %c1152] : memref<4x1920xf32, #tpu.memory_space<vmem>>, vector<1x128xf32>
    tpu.vector_store %arg12[%c0_141, %c1152], %314 {strides = array<i32>} : memref<4x1920xf32, #tpu.memory_space<vmem>>, vector<1x128xf32>,
    %316 = vector.extract_strided_slice %295 {offsets = [10, 0], sizes = [1, 128], strides = [1, 1]} : vector<15x512xf32> to vector<1x128xf32>
    %c0_142 = arith.constant 0 : index
    %c1280 = arith.constant 1280 : index
    %317 = vector.load %arg12[%c0_142, %c1280] : memref<4x1920xf32, #tpu.memory_space<vmem>>, vector<1x128xf32>
    tpu.vector_store %arg12[%c0_142, %c1280], %316 {strides = array<i32>} : memref<4x1920xf32, #tpu.memory_space<vmem>>, vector<1x128xf32>,
    %318 = vector.extract_strided_slice %295 {offsets = [11, 0], sizes = [1, 128], strides = [1, 1]} : vector<15x512xf32> to vector<1x128xf32>
    %c0_143 = arith.constant 0 : index
    %c1408 = arith.constant 1408 : index
    %319 = vector.load %arg12[%c0_143, %c1408] : memref<4x1920xf32, #tpu.memory_space<vmem>>, vector<1x128xf32>
    tpu.vector_store %arg12[%c0_143, %c1408], %318 {strides = array<i32>} : memref<4x1920xf32, #tpu.memory_space<vmem>>, vector<1x128xf32>,
    %320 = vector.extract_strided_slice %295 {offsets = [12, 0], sizes = [1, 128], strides = [1, 1]} : vector<15x512xf32> to vector<1x128xf32>
    %c0_144 = arith.constant 0 : index
    %c1536 = arith.constant 1536 : index
    %321 = vector.load %arg12[%c0_144, %c1536] : memref<4x1920xf32, #tpu.memory_space<vmem>>, vector<1x128xf32>
    tpu.vector_store %arg12[%c0_144, %c1536], %320 {strides = array<i32>} : memref<4x1920xf32, #tpu.memory_space<vmem>>, vector<1x128xf32>,
    %322 = vector.extract_strided_slice %295 {offsets = [13, 0], sizes = [1, 128], strides = [1, 1]} : vector<15x512xf32> to vector<1x128xf32>
    %c0_145 = arith.constant 0 : index
    %c1664 = arith.constant 1664 : index
    %323 = vector.load %arg12[%c0_145, %c1664] : memref<4x1920xf32, #tpu.memory_space<vmem>>, vector<1x128xf32>
    tpu.vector_store %arg12[%c0_145, %c1664], %322 {strides = array<i32>} : memref<4x1920xf32, #tpu.memory_space<vmem>>, vector<1x128xf32>,
    %324 = vector.extract_strided_slice %295 {offsets = [14, 0], sizes = [1, 128], strides = [1, 1]} : vector<15x512xf32> to vector<1x128xf32>
    %c0_146 = arith.constant 0 : index
    %c1792 = arith.constant 1792 : index
    %325 = vector.load %arg12[%c0_146, %c1792] : memref<4x1920xf32, #tpu.memory_space<vmem>>, vector<1x128xf32>
    tpu.vector_store %arg12[%c0_146, %c1792], %324 {strides = array<i32>} : memref<4x1920xf32, #tpu.memory_space<vmem>>, vector<1x128xf32>,
    %326 = vector.extract_strided_slice %295 {offsets = [0, 128], sizes = [1, 128], strides = [1, 1]} : vector<15x512xf32> to vector<1x128xf32>
    %c1_147 = arith.constant 1 : index
    %c0_148 = arith.constant 0 : index
    %327 = vector.load %arg12[%c1_147, %c0_148] : memref<4x1920xf32, #tpu.memory_space<vmem>>, vector<1x128xf32>
    tpu.vector_store %arg12[%c1_147, %c0_148], %326 {strides = array<i32>} : memref<4x1920xf32, #tpu.memory_space<vmem>>, vector<1x128xf32>,
    %328 = vector.extract_strided_slice %295 {offsets = [1, 128], sizes = [1, 128], strides = [1, 1]} : vector<15x512xf32> to vector<1x128xf32>
    %c1_149 = arith.constant 1 : index
    %c128_150 = arith.constant 128 : index
    %329 = vector.load %arg12[%c1_149, %c128_150] : memref<4x1920xf32, #tpu.memory_space<vmem>>, vector<1x128xf32>
    tpu.vector_store %arg12[%c1_149, %c128_150], %328 {strides = array<i32>} : memref<4x1920xf32, #tpu.memory_space<vmem>>, vector<1x128xf32>,
    %330 = vector.extract_strided_slice %295 {offsets = [2, 128], sizes = [1, 128], strides = [1, 1]} : vector<15x512xf32> to vector<1x128xf32>
    %c1_151 = arith.constant 1 : index
    %c256_152 = arith.constant 256 : index
    %331 = vector.load %arg12[%c1_151, %c256_152] : memref<4x1920xf32, #tpu.memory_space<vmem>>, vector<1x128xf32>
    tpu.vector_store %arg12[%c1_151, %c256_152], %330 {strides = array<i32>} : memref<4x1920xf32, #tpu.memory_space<vmem>>, vector<1x128xf32>,
    %332 = vector.extract_strided_slice %295 {offsets = [3, 128], sizes = [1, 128], strides = [1, 1]} : vector<15x512xf32> to vector<1x128xf32>
    %c1_153 = arith.constant 1 : index
    %c384_154 = arith.constant 384 : index
    %333 = vector.load %arg12[%c1_153, %c384_154] : memref<4x1920xf32, #tpu.memory_space<vmem>>, vector<1x128xf32>
    tpu.vector_store %arg12[%c1_153, %c384_154], %332 {strides = array<i32>} : memref<4x1920xf32, #tpu.memory_space<vmem>>, vector<1x128xf32>,
    %334 = vector.extract_strided_slice %295 {offsets = [4, 128], sizes = [1, 128], strides = [1, 1]} : vector<15x512xf32> to vector<1x128xf32>
    %c1_155 = arith.constant 1 : index
    %c512_156 = arith.constant 512 : index
    %335 = vector.load %arg12[%c1_155, %c512_156] : memref<4x1920xf32, #tpu.memory_space<vmem>>, vector<1x128xf32>
    tpu.vector_store %arg12[%c1_155, %c512_156], %334 {strides = array<i32>} : memref<4x1920xf32, #tpu.memory_space<vmem>>, vector<1x128xf32>,
    %336 = vector.extract_strided_slice %295 {offsets = [5, 128], sizes = [1, 128], strides = [1, 1]} : vector<15x512xf32> to vector<1x128xf32>
    %c1_157 = arith.constant 1 : index
    %c640_158 = arith.constant 640 : index
    %337 = vector.load %arg12[%c1_157, %c640_158] : memref<4x1920xf32, #tpu.memory_space<vmem>>, vector<1x128xf32>
    tpu.vector_store %arg12[%c1_157, %c640_158], %336 {strides = array<i32>} : memref<4x1920xf32, #tpu.memory_space<vmem>>, vector<1x128xf32>,
    %338 = vector.extract_strided_slice %295 {offsets = [6, 128], sizes = [1, 128], strides = [1, 1]} : vector<15x512xf32> to vector<1x128xf32>
    %c1_159 = arith.constant 1 : index
    %c768_160 = arith.constant 768 : index
    %339 = vector.load %arg12[%c1_159, %c768_160] : memref<4x1920xf32, #tpu.memory_space<vmem>>, vector<1x128xf32>
    tpu.vector_store %arg12[%c1_159, %c768_160], %338 {strides = array<i32>} : memref<4x1920xf32, #tpu.memory_space<vmem>>, vector<1x128xf32>,
    %340 = vector.extract_strided_slice %295 {offsets = [7, 128], sizes = [1, 128], strides = [1, 1]} : vector<15x512xf32> to vector<1x128xf32>
    %c1_161 = arith.constant 1 : index
    %c896_162 = arith.constant 896 : index
    %341 = vector.load %arg12[%c1_161, %c896_162] : memref<4x1920xf32, #tpu.memory_space<vmem>>, vector<1x128xf32>
    tpu.vector_store %arg12[%c1_161, %c896_162], %340 {strides = array<i32>} : memref<4x1920xf32, #tpu.memory_space<vmem>>, vector<1x128xf32>,
    %342 = vector.extract_strided_slice %295 {offsets = [8, 128], sizes = [1, 128], strides = [1, 1]} : vector<15x512xf32> to vector<1x128xf32>
    %c1_163 = arith.constant 1 : index
    %c1024_164 = arith.constant 1024 : index
    %343 = vector.load %arg12[%c1_163, %c1024_164] : memref<4x1920xf32, #tpu.memory_space<vmem>>, vector<1x128xf32>
    tpu.vector_store %arg12[%c1_163, %c1024_164], %342 {strides = array<i32>} : memref<4x1920xf32, #tpu.memory_space<vmem>>, vector<1x128xf32>,
    %344 = vector.extract_strided_slice %295 {offsets = [9, 128], sizes = [1, 128], strides = [1, 1]} : vector<15x512xf32> to vector<1x128xf32>
    %c1_165 = arith.constant 1 : index
    %c1152_166 = arith.constant 1152 : index
    %345 = vector.load %arg12[%c1_165, %c1152_166] : memref<4x1920xf32, #tpu.memory_space<vmem>>, vector<1x128xf32>
    tpu.vector_store %arg12[%c1_165, %c1152_166], %344 {strides = array<i32>} : memref<4x1920xf32, #tpu.memory_space<vmem>>, vector<1x128xf32>,
    %346 = vector.extract_strided_slice %295 {offsets = [10, 128], sizes = [1, 128], strides = [1, 1]} : vector<15x512xf32> to vector<1x128xf32>
    %c1_167 = arith.constant 1 : index
    %c1280_168 = arith.constant 1280 : index
    %347 = vector.load %arg12[%c1_167, %c1280_168] : memref<4x1920xf32, #tpu.memory_space<vmem>>, vector<1x128xf32>
    tpu.vector_store %arg12[%c1_167, %c1280_168], %346 {strides = array<i32>} : memref<4x1920xf32, #tpu.memory_space<vmem>>, vector<1x128xf32>,
    %348 = vector.extract_strided_slice %295 {offsets = [11, 128], sizes = [1, 128], strides = [1, 1]} : vector<15x512xf32> to vector<1x128xf32>
    %c1_169 = arith.constant 1 : index
    %c1408_170 = arith.constant 1408 : index
    %349 = vector.load %arg12[%c1_169, %c1408_170] : memref<4x1920xf32, #tpu.memory_space<vmem>>, vector<1x128xf32>
    tpu.vector_store %arg12[%c1_169, %c1408_170], %348 {strides = array<i32>} : memref<4x1920xf32, #tpu.memory_space<vmem>>, vector<1x128xf32>,
    %350 = vector.extract_strided_slice %295 {offsets = [12, 128], sizes = [1, 128], strides = [1, 1]} : vector<15x512xf32> to vector<1x128xf32>
    %c1_171 = arith.constant 1 : index
    %c1536_172 = arith.constant 1536 : index
    %351 = vector.load %arg12[%c1_171, %c1536_172] : memref<4x1920xf32, #tpu.memory_space<vmem>>, vector<1x128xf32>
    tpu.vector_store %arg12[%c1_171, %c1536_172], %350 {strides = array<i32>} : memref<4x1920xf32, #tpu.memory_space<vmem>>, vector<1x128xf32>,
    %352 = vector.extract_strided_slice %295 {offsets = [13, 128], sizes = [1, 128], strides = [1, 1]} : vector<15x512xf32> to vector<1x128xf32>
    %c1_173 = arith.constant 1 : index
    %c1664_174 = arith.constant 1664 : index
    %353 = vector.load %arg12[%c1_173, %c1664_174] : memref<4x1920xf32, #tpu.memory_space<vmem>>, vector<1x128xf32>
    tpu.vector_store %arg12[%c1_173, %c1664_174], %352 {strides = array<i32>} : memref<4x1920xf32, #tpu.memory_space<vmem>>, vector<1x128xf32>,
    %354 = vector.extract_strided_slice %295 {offsets = [14, 128], sizes = [1, 128], strides = [1, 1]} : vector<15x512xf32> to vector<1x128xf32>
    %c1_175 = arith.constant 1 : index
    %c1792_176 = arith.constant 1792 : index
    %355 = vector.load %arg12[%c1_175, %c1792_176] : memref<4x1920xf32, #tpu.memory_space<vmem>>, vector<1x128xf32>
    tpu.vector_store %arg12[%c1_175, %c1792_176], %354 {strides = array<i32>} : memref<4x1920xf32, #tpu.memory_space<vmem>>, vector<1x128xf32>,
    %356 = vector.extract_strided_slice %295 {offsets = [0, 256], sizes = [1, 128], strides = [1, 1]} : vector<15x512xf32> to vector<1x128xf32>
    %c2_177 = arith.constant 2 : index
    %c0_178 = arith.constant 0 : index
    %357 = vector.load %arg12[%c2_177, %c0_178] : memref<4x1920xf32, #tpu.memory_space<vmem>>, vector<1x128xf32>
    tpu.vector_store %arg12[%c2_177, %c0_178], %356 {strides = array<i32>} : memref<4x1920xf32, #tpu.memory_space<vmem>>, vector<1x128xf32>,
    %358 = vector.extract_strided_slice %295 {offsets = [1, 256], sizes = [1, 128], strides = [1, 1]} : vector<15x512xf32> to vector<1x128xf32>
    %c2_179 = arith.constant 2 : index
    %c128_180 = arith.constant 128 : index
    %359 = vector.load %arg12[%c2_179, %c128_180] : memref<4x1920xf32, #tpu.memory_space<vmem>>, vector<1x128xf32>
    tpu.vector_store %arg12[%c2_179, %c128_180], %358 {strides = array<i32>} : memref<4x1920xf32, #tpu.memory_space<vmem>>, vector<1x128xf32>,
    %360 = vector.extract_strided_slice %295 {offsets = [2, 256], sizes = [1, 128], strides = [1, 1]} : vector<15x512xf32> to vector<1x128xf32>
    %c2_181 = arith.constant 2 : index
    %c256_182 = arith.constant 256 : index
    %361 = vector.load %arg12[%c2_181, %c256_182] : memref<4x1920xf32, #tpu.memory_space<vmem>>, vector<1x128xf32>
    tpu.vector_store %arg12[%c2_181, %c256_182], %360 {strides = array<i32>} : memref<4x1920xf32, #tpu.memory_space<vmem>>, vector<1x128xf32>,
    %362 = vector.extract_strided_slice %295 {offsets = [3, 256], sizes = [1, 128], strides = [1, 1]} : vector<15x512xf32> to vector<1x128xf32>
    %c2_183 = arith.constant 2 : index
    %c384_184 = arith.constant 384 : index
    %363 = vector.load %arg12[%c2_183, %c384_184] : memref<4x1920xf32, #tpu.memory_space<vmem>>, vector<1x128xf32>
    tpu.vector_store %arg12[%c2_183, %c384_184], %362 {strides = array<i32>} : memref<4x1920xf32, #tpu.memory_space<vmem>>, vector<1x128xf32>,
    %364 = vector.extract_strided_slice %295 {offsets = [4, 256], sizes = [1, 128], strides = [1, 1]} : vector<15x512xf32> to vector<1x128xf32>
    %c2_185 = arith.constant 2 : index
    %c512_186 = arith.constant 512 : index
    %365 = vector.load %arg12[%c2_185, %c512_186] : memref<4x1920xf32, #tpu.memory_space<vmem>>, vector<1x128xf32>
    tpu.vector_store %arg12[%c2_185, %c512_186], %364 {strides = array<i32>} : memref<4x1920xf32, #tpu.memory_space<vmem>>, vector<1x128xf32>,
    %366 = vector.extract_strided_slice %295 {offsets = [5, 256], sizes = [1, 128], strides = [1, 1]} : vector<15x512xf32> to vector<1x128xf32>
    %c2_187 = arith.constant 2 : index
    %c640_188 = arith.constant 640 : index
    %367 = vector.load %arg12[%c2_187, %c640_188] : memref<4x1920xf32, #tpu.memory_space<vmem>>, vector<1x128xf32>
    tpu.vector_store %arg12[%c2_187, %c640_188], %366 {strides = array<i32>} : memref<4x1920xf32, #tpu.memory_space<vmem>>, vector<1x128xf32>,
    %368 = vector.extract_strided_slice %295 {offsets = [6, 256], sizes = [1, 128], strides = [1, 1]} : vector<15x512xf32> to vector<1x128xf32>
    %c2_189 = arith.constant 2 : index
    %c768_190 = arith.constant 768 : index
    %369 = vector.load %arg12[%c2_189, %c768_190] : memref<4x1920xf32, #tpu.memory_space<vmem>>, vector<1x128xf32>
    tpu.vector_store %arg12[%c2_189, %c768_190], %368 {strides = array<i32>} : memref<4x1920xf32, #tpu.memory_space<vmem>>, vector<1x128xf32>,
    %370 = vector.extract_strided_slice %295 {offsets = [7, 256], sizes = [1, 128], strides = [1, 1]} : vector<15x512xf32> to vector<1x128xf32>
    %c2_191 = arith.constant 2 : index
    %c896_192 = arith.constant 896 : index
    %371 = vector.load %arg12[%c2_191, %c896_192] : memref<4x1920xf32, #tpu.memory_space<vmem>>, vector<1x128xf32>
    tpu.vector_store %arg12[%c2_191, %c896_192], %370 {strides = array<i32>} : memref<4x1920xf32, #tpu.memory_space<vmem>>, vector<1x128xf32>,
    %372 = vector.extract_strided_slice %295 {offsets = [8, 256], sizes = [1, 128], strides = [1, 1]} : vector<15x512xf32> to vector<1x128xf32>
    %c2_193 = arith.constant 2 : index
    %c1024_194 = arith.constant 1024 : index
    %373 = vector.load %arg12[%c2_193, %c1024_194] : memref<4x1920xf32, #tpu.memory_space<vmem>>, vector<1x128xf32>
    tpu.vector_store %arg12[%c2_193, %c1024_194], %372 {strides = array<i32>} : memref<4x1920xf32, #tpu.memory_space<vmem>>, vector<1x128xf32>,
    %374 = vector.extract_strided_slice %295 {offsets = [9, 256], sizes = [1, 128], strides = [1, 1]} : vector<15x512xf32> to vector<1x128xf32>
    %c2_195 = arith.constant 2 : index
    %c1152_196 = arith.constant 1152 : index
    %375 = vector.load %arg12[%c2_195, %c1152_196] : memref<4x1920xf32, #tpu.memory_space<vmem>>, vector<1x128xf32>
    tpu.vector_store %arg12[%c2_195, %c1152_196], %374 {strides = array<i32>} : memref<4x1920xf32, #tpu.memory_space<vmem>>, vector<1x128xf32>,
    %376 = vector.extract_strided_slice %295 {offsets = [10, 256], sizes = [1, 128], strides = [1, 1]} : vector<15x512xf32> to vector<1x128xf32>
    %c2_197 = arith.constant 2 : index
    %c1280_198 = arith.constant 1280 : index
    %377 = vector.load %arg12[%c2_197, %c1280_198] : memref<4x1920xf32, #tpu.memory_space<vmem>>, vector<1x128xf32>
    tpu.vector_store %arg12[%c2_197, %c1280_198], %376 {strides = array<i32>} : memref<4x1920xf32, #tpu.memory_space<vmem>>, vector<1x128xf32>,
    %378 = vector.extract_strided_slice %295 {offsets = [11, 256], sizes = [1, 128], strides = [1, 1]} : vector<15x512xf32> to vector<1x128xf32>
    %c2_199 = arith.constant 2 : index
    %c1408_200 = arith.constant 1408 : index
    %379 = vector.load %arg12[%c2_199, %c1408_200] : memref<4x1920xf32, #tpu.memory_space<vmem>>, vector<1x128xf32>
    tpu.vector_store %arg12[%c2_199, %c1408_200], %378 {strides = array<i32>} : memref<4x1920xf32, #tpu.memory_space<vmem>>, vector<1x128xf32>,
    %380 = vector.extract_strided_slice %295 {offsets = [12, 256], sizes = [1, 128], strides = [1, 1]} : vector<15x512xf32> to vector<1x128xf32>
    %c2_201 = arith.constant 2 : index
    %c1536_202 = arith.constant 1536 : index
    %381 = vector.load %arg12[%c2_201, %c1536_202] : memref<4x1920xf32, #tpu.memory_space<vmem>>, vector<1x128xf32>
    tpu.vector_store %arg12[%c2_201, %c1536_202], %380 {strides = array<i32>} : memref<4x1920xf32, #tpu.memory_space<vmem>>, vector<1x128xf32>,
    %382 = vector.extract_strided_slice %295 {offsets = [13, 256], sizes = [1, 128], strides = [1, 1]} : vector<15x512xf32> to vector<1x128xf32>
    %c2_203 = arith.constant 2 : index
    %c1664_204 = arith.constant 1664 : index
    %383 = vector.load %arg12[%c2_203, %c1664_204] : memref<4x1920xf32, #tpu.memory_space<vmem>>, vector<1x128xf32>
    tpu.vector_store %arg12[%c2_203, %c1664_204], %382 {strides = array<i32>} : memref<4x1920xf32, #tpu.memory_space<vmem>>, vector<1x128xf32>,
    %384 = vector.extract_strided_slice %295 {offsets = [14, 256], sizes = [1, 128], strides = [1, 1]} : vector<15x512xf32> to vector<1x128xf32>
    %c2_205 = arith.constant 2 : index
    %c1792_206 = arith.constant 1792 : index
    %385 = vector.load %arg12[%c2_205, %c1792_206] : memref<4x1920xf32, #tpu.memory_space<vmem>>, vector<1x128xf32>
    tpu.vector_store %arg12[%c2_205, %c1792_206], %384 {strides = array<i32>} : memref<4x1920xf32, #tpu.memory_space<vmem>>, vector<1x128xf32>,
    %386 = vector.extract_strided_slice %295 {offsets = [0, 384], sizes = [1, 128], strides = [1, 1]} : vector<15x512xf32> to vector<1x128xf32>
    %c3_207 = arith.constant 3 : index
    %c0_208 = arith.constant 0 : index
    %387 = vector.load %arg12[%c3_207, %c0_208] : memref<4x1920xf32, #tpu.memory_space<vmem>>, vector<1x128xf32>
    tpu.vector_store %arg12[%c3_207, %c0_208], %386 {strides = array<i32>} : memref<4x1920xf32, #tpu.memory_space<vmem>>, vector<1x128xf32>,
    %388 = vector.extract_strided_slice %295 {offsets = [1, 384], sizes = [1, 128], strides = [1, 1]} : vector<15x512xf32> to vector<1x128xf32>
    %c3_209 = arith.constant 3 : index
    %c128_210 = arith.constant 128 : index
    %389 = vector.load %arg12[%c3_209, %c128_210] : memref<4x1920xf32, #tpu.memory_space<vmem>>, vector<1x128xf32>
    tpu.vector_store %arg12[%c3_209, %c128_210], %388 {strides = array<i32>} : memref<4x1920xf32, #tpu.memory_space<vmem>>, vector<1x128xf32>,
    %390 = vector.extract_strided_slice %295 {offsets = [2, 384], sizes = [1, 128], strides = [1, 1]} : vector<15x512xf32> to vector<1x128xf32>
    %c3_211 = arith.constant 3 : index
    %c256_212 = arith.constant 256 : index
    %391 = vector.load %arg12[%c3_211, %c256_212] : memref<4x1920xf32, #tpu.memory_space<vmem>>, vector<1x128xf32>
    tpu.vector_store %arg12[%c3_211, %c256_212], %390 {strides = array<i32>} : memref<4x1920xf32, #tpu.memory_space<vmem>>, vector<1x128xf32>,
    %392 = vector.extract_strided_slice %295 {offsets = [3, 384], sizes = [1, 128], strides = [1, 1]} : vector<15x512xf32> to vector<1x128xf32>
    %c3_213 = arith.constant 3 : index
    %c384_214 = arith.constant 384 : index
    %393 = vector.load %arg12[%c3_213, %c384_214] : memref<4x1920xf32, #tpu.memory_space<vmem>>, vector<1x128xf32>
    tpu.vector_store %arg12[%c3_213, %c384_214], %392 {strides = array<i32>} : memref<4x1920xf32, #tpu.memory_space<vmem>>, vector<1x128xf32>,
    %394 = vector.extract_strided_slice %295 {offsets = [4, 384], sizes = [1, 128], strides = [1, 1]} : vector<15x512xf32> to vector<1x128xf32>
    %c3_215 = arith.constant 3 : index
    %c512_216 = arith.constant 512 : index
    %395 = vector.load %arg12[%c3_215, %c512_216] : memref<4x1920xf32, #tpu.memory_space<vmem>>, vector<1x128xf32>
    tpu.vector_store %arg12[%c3_215, %c512_216], %394 {strides = array<i32>} : memref<4x1920xf32, #tpu.memory_space<vmem>>, vector<1x128xf32>,
    %396 = vector.extract_strided_slice %295 {offsets = [5, 384], sizes = [1, 128], strides = [1, 1]} : vector<15x512xf32> to vector<1x128xf32>
    %c3_217 = arith.constant 3 : index
    %c640_218 = arith.constant 640 : index
    %397 = vector.load %arg12[%c3_217, %c640_218] : memref<4x1920xf32, #tpu.memory_space<vmem>>, vector<1x128xf32>
    tpu.vector_store %arg12[%c3_217, %c640_218], %396 {strides = array<i32>} : memref<4x1920xf32, #tpu.memory_space<vmem>>, vector<1x128xf32>,
    %398 = vector.extract_strided_slice %295 {offsets = [6, 384], sizes = [1, 128], strides = [1, 1]} : vector<15x512xf32> to vector<1x128xf32>
    %c3_219 = arith.constant 3 : index
    %c768_220 = arith.constant 768 : index
    %399 = vector.load %arg12[%c3_219, %c768_220] : memref<4x1920xf32, #tpu.memory_space<vmem>>, vector<1x128xf32>
    tpu.vector_store %arg12[%c3_219, %c768_220], %398 {strides = array<i32>} : memref<4x1920xf32, #tpu.memory_space<vmem>>, vector<1x128xf32>,
    %400 = vector.extract_strided_slice %295 {offsets = [7, 384], sizes = [1, 128], strides = [1, 1]} : vector<15x512xf32> to vector<1x128xf32>
    %c3_221 = arith.constant 3 : index
    %c896_222 = arith.constant 896 : index
    %401 = vector.load %arg12[%c3_221, %c896_222] : memref<4x1920xf32, #tpu.memory_space<vmem>>, vector<1x128xf32>
    tpu.vector_store %arg12[%c3_221, %c896_222], %400 {strides = array<i32>} : memref<4x1920xf32, #tpu.memory_space<vmem>>, vector<1x128xf32>,
    %402 = vector.extract_strided_slice %295 {offsets = [8, 384], sizes = [1, 128], strides = [1, 1]} : vector<15x512xf32> to vector<1x128xf32>
    %c3_223 = arith.constant 3 : index
    %c1024_224 = arith.constant 1024 : index
    %403 = vector.load %arg12[%c3_223, %c1024_224] : memref<4x1920xf32, #tpu.memory_space<vmem>>, vector<1x128xf32>
    tpu.vector_store %arg12[%c3_223, %c1024_224], %402 {strides = array<i32>} : memref<4x1920xf32, #tpu.memory_space<vmem>>, vector<1x128xf32>,
    %404 = vector.extract_strided_slice %295 {offsets = [9, 384], sizes = [1, 128], strides = [1, 1]} : vector<15x512xf32> to vector<1x128xf32>
    %c3_225 = arith.constant 3 : index
    %c1152_226 = arith.constant 1152 : index
    %405 = vector.load %arg12[%c3_225, %c1152_226] : memref<4x1920xf32, #tpu.memory_space<vmem>>, vector<1x128xf32>
    tpu.vector_store %arg12[%c3_225, %c1152_226], %404 {strides = array<i32>} : memref<4x1920xf32, #tpu.memory_space<vmem>>, vector<1x128xf32>,
    %406 = vector.extract_strided_slice %295 {offsets = [10, 384], sizes = [1, 128], strides = [1, 1]} : vector<15x512xf32> to vector<1x128xf32>
    %c3_227 = arith.constant 3 : index
    %c1280_228 = arith.constant 1280 : index
    %407 = vector.load %arg12[%c3_227, %c1280_228] : memref<4x1920xf32, #tpu.memory_space<vmem>>, vector<1x128xf32>
    tpu.vector_store %arg12[%c3_227, %c1280_228], %406 {strides = array<i32>} : memref<4x1920xf32, #tpu.memory_space<vmem>>, vector<1x128xf32>,
    %408 = vector.extract_strided_slice %295 {offsets = [11, 384], sizes = [1, 128], strides = [1, 1]} : vector<15x512xf32> to vector<1x128xf32>
    %c3_229 = arith.constant 3 : index
    %c1408_230 = arith.constant 1408 : index
    %409 = vector.load %arg12[%c3_229, %c1408_230] : memref<4x1920xf32, #tpu.memory_space<vmem>>, vector<1x128xf32>
    tpu.vector_store %arg12[%c3_229, %c1408_230], %408 {strides = array<i32>} : memref<4x1920xf32, #tpu.memory_space<vmem>>, vector<1x128xf32>,
    %410 = vector.extract_strided_slice %295 {offsets = [12, 384], sizes = [1, 128], strides = [1, 1]} : vector<15x512xf32> to vector<1x128xf32>
    %c3_231 = arith.constant 3 : index
    %c1536_232 = arith.constant 1536 : index
    %411 = vector.load %arg12[%c3_231, %c1536_232] : memref<4x1920xf32, #tpu.memory_space<vmem>>, vector<1x128xf32>
    tpu.vector_store %arg12[%c3_231, %c1536_232], %410 {strides = array<i32>} : memref<4x1920xf32, #tpu.memory_space<vmem>>, vector<1x128xf32>,
    %412 = vector.extract_strided_slice %295 {offsets = [13, 384], sizes = [1, 128], strides = [1, 1]} : vector<15x512xf32> to vector<1x128xf32>
    %c3_233 = arith.constant 3 : index
    %c1664_234 = arith.constant 1664 : index
    %413 = vector.load %arg12[%c3_233, %c1664_234] : memref<4x1920xf32, #tpu.memory_space<vmem>>, vector<1x128xf32>
    tpu.vector_store %arg12[%c3_233, %c1664_234], %412 {strides = array<i32>} : memref<4x1920xf32, #tpu.memory_space<vmem>>, vector<1x128xf32>,
    %414 = vector.extract_strided_slice %295 {offsets = [14, 384], sizes = [1, 128], strides = [1, 1]} : vector<15x512xf32> to vector<1x128xf32>
    %c3_235 = arith.constant 3 : index
    %c1792_236 = arith.constant 1792 : index
    %415 = vector.load %arg12[%c3_235, %c1792_236] : memref<4x1920xf32, #tpu.memory_space<vmem>>, vector<1x128xf32>
    tpu.vector_store %arg12[%c3_235, %c1792_236], %414 {strides = array<i32>} : memref<4x1920xf32, #tpu.memory_space<vmem>>, vector<1x128xf32>,
    %c0_237 = arith.constant 0 : index
    %c0_238 = arith.constant 0 : index
    %416 = vector.load %arg12[%c0_237, %c0_238] : memref<4x1920xf32, #tpu.memory_space<vmem>>, vector<4x1920xf32>
    %417 = arith.truncf %416 : vector<4x1920xf32> to vector<4x1920xbf16>
    %c0_239 = arith.constant 0 : index
    %c0_240 = arith.constant 0 : index
    %418 = vector.load %arg6[%c0_239, %c0_240] : memref<1920x128xbf16, #tpu.memory_space<vmem>>, vector<1920x128xbf16>
    %cst_241 = arith.constant dense<0.000000e+00> : vector<4x128xf32>
    %419 = tpu.matmul %417, %418, %cst_241 {dimension_numbers = #tpu.dot_dimension_numbers<[1], [0], [0], [1], [0, 0, 1, 1], [], []>} : vector<4x1920xbf16>, vector<1920x128xbf16>, vector<4x128xf32> -> vector<4x128xf32>
    %c0_242 = arith.constant 0 : index
    %c0_243 = arith.constant 0 : index
    %420 = vector.load %arg7[%c0_242, %c0_243] : memref<1x128xf32, #tpu.memory_space<vmem>>, vector<1x128xf32>
    %421 = vector.broadcast %420 : vector<1x128xf32> to vector<4x128xf32>
    %422 = arith.addf %419, %421 : vector<4x128xf32>
    %cst_244 = arith.constant 0.000000e+00 : f32
    %423 = vector.broadcast %cst_244 : f32 to vector<4x128xf32>
    %424 = arith.maximumf %422, %423 : vector<4x128xf32>
    %c0_245 = arith.constant 0 : index
    %c0_246 = arith.constant 0 : index
    %425 = vector.load %arg8[%c0_245, %c0_246] : memref<128x2xf32, #tpu.memory_space<vmem>>, vector<128x2xf32>
    %cst_247 = arith.constant dense<0.000000e+00> : vector<4x2xf32>
    %426 = tpu.matmul %424, %425, %cst_247 {dimension_numbers = #tpu.dot_dimension_numbers<[1], [0], [0], [1], [0, 0, 1, 1], [], []>} : vector<4x128xf32>, vector<128x2xf32>, vector<4x2xf32> -> vector<4x2xf32>
    %c0_248 = arith.constant 0 : index
    %c0_249 = arith.constant 0 : index
    %427 = vector.load %arg9[%c0_248, %c0_249] : memref<1x2xf32, #tpu.memory_space<vmem>>, vector<1x2xf32>
    %428 = vector.broadcast %427 : vector<1x2xf32> to vector<4x2xf32>
    %429 = arith.addf %426, %428 : vector<4x2xf32>
    %c0_250 = arith.constant 0 : index
    %c0_251 = arith.constant 0 : index
    %c0_252 = arith.constant 0 : index
    %430 = vector.load %arg10[%c0_250, %c0_251, %c0_252] : memref<1x4x2xf32, #tpu.memory_space<vmem>>, vector<1x4x2xf32>
    %431 = vector.shape_cast %430 : vector<1x4x2xf32> to vector<4x2xf32>
    %432 = vector.shape_cast %429 : vector<4x2xf32> to vector<1x4x2xf32>
    tpu.vector_store %arg10[%c0_250, %c0_251, %c0_252], %432 {strides = array<i32>} : memref<1x4x2xf32, #tpu.memory_space<vmem>>, vector<1x4x2xf32>,
    return
  }
  func.func @transform_0(%arg0: i32) -> (i32, i32) {
    %c0_i32 = arith.constant 0 : i32
    %c0_i32_0 = arith.constant 0 : i32
    %c0_i32_1 = arith.constant 0 : i32
    return %c0_i32, %c0_i32_0 : i32, i32
  }
  func.func @transform_1(%arg0: i32) -> i32 {
    %c0_i32 = arith.constant 0 : i32
    %c0_i32_0 = arith.constant 0 : i32
    return %c0_i32 : i32
  }
  func.func @transform_2(%arg0: i32) -> (i32, i32, i32, i32) {
    %c0_i32 = arith.constant 0 : i32
    %c0_i32_0 = arith.constant 0 : i32
    %c0_i32_1 = arith.constant 0 : i32
    %c0_i32_2 = arith.constant 0 : i32
    return %arg0, %c0_i32, %c0_i32_0, %c0_i32_1 : i32, i32, i32, i32
  }
  func.func @transform_3(%arg0: i32) -> (i32, i32) {
    %c0_i32 = arith.constant 0 : i32
    %c0_i32_0 = arith.constant 0 : i32
    %c0_i32_1 = arith.constant 0 : i32
    return %c0_i32, %c0_i32_0 : i32, i32
  }
  func.func @transform_4(%arg0: i32) -> (i32, i32) {
    %c0_i32 = arith.constant 0 : i32
    %c0_i32_0 = arith.constant 0 : i32
    %c0_i32_1 = arith.constant 0 : i32
    return %c0_i32, %c0_i32_0 : i32, i32
  }
  func.func @transform_5(%arg0: i32) -> (i32, i32) {
    %c0_i32 = arith.constant 0 : i32
    %c0_i32_0 = arith.constant 0 : i32
    %c0_i32_1 = arith.constant 0 : i32
    return %c0_i32, %c0_i32_0 : i32, i32
  }
  func.func @transform_6(%arg0: i32) -> (i32, i32) {
    %c0_i32 = arith.constant 0 : i32
    %c0_i32_0 = arith.constant 0 : i32
    %c0_i32_1 = arith.constant 0 : i32
    return %c0_i32, %c0_i32_0 : i32, i32
  }
  func.func @transform_7(%arg0: i32) -> (i32, i32) {
    %c0_i32 = arith.constant 0 : i32
    %c0_i32_0 = arith.constant 0 : i32
    %c0_i32_1 = arith.constant 0 : i32
    return %c0_i32, %c0_i32_0 : i32, i32
  }
  func.func @transform_8(%arg0: i32) -> (i32, i32) {
    %c0_i32 = arith.constant 0 : i32
    %c0_i32_0 = arith.constant 0 : i32
    %c0_i32_1 = arith.constant 0 : i32
    return %c0_i32, %c0_i32_0 : i32, i32
  }
  func.func @transform_9(%arg0: i32) -> (i32, i32, i32) {
    %c0_i32 = arith.constant 0 : i32
    %c0_i32_0 = arith.constant 0 : i32
    %c0_i32_1 = arith.constant 0 : i32
    return %arg0, %c0_i32, %c0_i32_0 : i32, i32, i32
  }
}

</mosaic_0001>

<bundles_post_ra>
// kernel: mynet1_forward.1
= control target key start
LH: loop header
LB: loop body
LE: loop exit
PB: predicated region body
PF: predicated region fallthrough
CT: control target
= control target key end

     0   :  { %14 = vsyncpa [#allocation5], 0  ;;  %s8787_s0 = inlined_call_operand.vmem [shape: f32[6,9], index: 0, kind: input, shape index: {}]   ;;  %s8788_s1 = inlined_call_operand.vmem [shape: f32[6], index: 1, kind: input, shape index: {}]   ;;  %s8789_s2 = inlined_call_operand.vmem [shape: f32[1,1,32,128], index: 2, kind: input, shape index: {}]   ;;  %s8790_s3 = inlined_call_operand.vmem [shape: bf16[15,29], index: 3, kind: input, shape index: {}]   ;;  %s8791_s4 = inlined_call_operand.vmem [shape: bf16[768,512], index: 4, kind: input, shape index: {}]   ;;  %s8792_s5 = inlined_call_operand.vmem [shape: bf16[1920,128], index: 5, kind: input, shape index: {}]   ;;  %s8793_s6 = inlined_call_operand.vmem [shape: f32[1,128], index: 6, kind: input, shape index: {}]   ;;  %s8794_s7 = inlined_call_operand.vmem [shape: f32[128,2], index: 7, kind: input, shape index: {}]   ;;  %s8795_s8 = inlined_call_operand.vmem [shape: f32[1,2], index: 8, kind: input, shape index: {}]   ;;  %s8796_s9 = inlined_call_operand.vmem [shape: f32[1,4,2], index: 9, kind: output, shape index: {}]  }
   0x1   :  { %s22_s11 = sshll.u32 %s8787_s0, 4  ;;  %s23_s11 = int_to_ptr.vmem [resolvable:$true] %s22_s11 }
   0x2   :  { %15 = vsyncpa [#allocation7], 0  ;;  %s32_s14 = sshll.u32 %s8788_s1, 4  ;;  %s6217_s15 = scalar_lea.vmem %s23_s11, 128  ;;  %s33_s14 = int_to_ptr.vmem [resolvable:$true] %s32_s14 }
   0x3   :  { %p6218_p0 = scmp.ne.s32.totalorder %s23_s11, %s6217_s15  ;;  %p6222_p1 = scmp.lt.s32.totalorder %s23_s11, %s23_s11 }
   0x4   :  { %p6223_p2 = scmp.lt.s32.totalorder %s6217_s15, %s6217_s15 }
   0x6   :  { %p6224_p3 = por %p6223_p2, %p6222_p1 }
   0x8   :  { %p6225_p4 = pnand %p6224_p3, %p6218_p0 }
   0xa   :  { %6228 = shalt.err (!%p6225_p4)
}
   0xb   :  { %s6245_s16 = smov [#allocation4]   ;;  %s6229_s17 = scalar_lea.vmem %s33_s14, 16 }
   0xc   :  { %25 = dma.vmem_to_smem %s23_s11, 128, %s6245_s16, [#allocation5]  }
   0xd   :  { %p6230_p5 = scmp.ne.s32.totalorder %s33_s14, %s6229_s17  ;;  %p6234_p6 = scmp.lt.s32.totalorder %s33_s14, %s33_s14 }
   0xe   :  { %p6235_p7 = scmp.lt.s32.totalorder %s6229_s17, %s6229_s17 }
  0x10   :  { %p6236_p8 = por %p6235_p7, %p6234_p6 }
  0x12   :  { %p6237_p9 = pnand %p6236_p8, %p6230_p5 }
  0x14   :  { %6240 = shalt.err (!%p6237_p9)
}
  0x15   :  { %s6246_s0 = smov [#allocation6]  }
  0x16   :  { %35 = dma.vmem_to_smem %s33_s14, 16, %s6246_s0, [#allocation7]  }
  0x17   :  { %6241 = dma.done.wait [#allocation5], 128  }
  0x18   :  { %6242 = vsyncadd [#allocation5], 4294967168 }
  0x19   :  { %6243 = dma.done.wait [#allocation7], 16  }
  0x1a   :  { %6244 = vsyncadd [#allocation7], 4294967280 }
  0x1b   :  { %56 = sfence }
  0x1c   :  { %s5094_s1 = sld [smem:[#allocation4 + $0x81]]  ;;  %v6313_v0 = vld [vmem:[%s8789_s2 + $0x10] sm:$0xff]  ;;  %v6318_v1 = vld [vmem:[%s8789_s2] sm:$0xff]  ;;  %v6323_v3 = vld [vmem:[%s8789_s2 + $0x8] sm:$0xff]  ;;  %s5095_s25 = sld [smem:[#allocation4 + $0x82]]  ;;  %vm409_vm0 = vcmask 1046528  }
  0x1d   :  { %s5085_s18 = sld [smem:[#allocation4 + $0x1]]  ;;  %s6247_s26 = smov 127   ;;  %v6338_v11 = vld [vmem:[%s8789_s2 + $0x18] sm:$0xff]  ;;  %vm498_vm1 = vcmask 1045504   ;;  %vm617_vm2 = vcmask 1022976   ;;  %vm621_vm3 = vcmask 1019904  }
  0x1e   :  { %s5086_s29 = sld [smem:[#allocation4 + $0x2]]  ;;  %s5097_s30 = sld [smem:[#allocation4 + $0x84]]  ;;  %vm2059_vm4 = vcmask 236544   ;;  %vm6252_vm5 = vmmov 0   ;;  %vm5077_vm6 = vcmask 11264  }
  0x1f   :  { %s6248_s10 = smov 126   ;;  %s5088_s11 = sld [smem:[#allocation4 + $0x4]] }
  0x20   :  { %s5098_s12 = sld [smem:[#allocation4 + $0x85]]  ;;  %s5100_s14 = sld [smem:[#allocation4 + $0x87]] }
  0x21   :  { %s5089_s13 = sld [smem:[#allocation4 + $0x5]]  ;;  %s5091_s15 = sld [smem:[#allocation4 + $0x7]] }
  0x22   :  { %v633_v2 = vstv %s5094_s1  ;;  %v658_v12 = vstv %s5095_s25  ;;  %s5101_s16 = sld [smem:[#allocation4 + $0x88]]  ;;  %s5112_s0 = sld [smem:[#allocation4 + $0x181]] }
  0x23   :  { %v636_v4 = vmul.f32 %v633_v2, %v6313_v0  ;;  %v634_v5 = vmul.f32 %v633_v2, %v6318_v1  ;;  %v350_v6 = vstv %s5085_s18  ;;  %v635_v7 = vmul.f32 %v633_v2, %v6323_v3  ;;  %s5092_s17 = sld [smem:[#allocation4 + $0x8]]  ;;  %s5103_s1 = sld [smem:[#allocation4 + $0x101]] }
  0x24   :  { %v351_v8 = vmul.f32 %v350_v6, %v6318_v1  ;;  %v352_v9 = vmul.f32 %v350_v6, %v6323_v3  ;;  %v353_v10 = vmul.f32 %v350_v6, %v6313_v0  ;;  %v637_v13 = vmul.f32 %v633_v2, %v6338_v11  ;;  %s5113_s18 = sld [smem:[#allocation4 + $0x182]]  ;;  %s5115_s20 = sld [smem:[#allocation4 + $0x184]] }
  0x25   :  { %646 = vrot.lane.b32.xlu1 %v636_v4, %s6247_s26  ;;  %642 = vrot.lane.b32.xlu0 %v634_v5, %s6247_s26  ;;  %v659_v14 = vmul.f32 %v658_v12, %v6318_v1  ;;  %v660_v15 = vmul.f32 %v658_v12, %v6323_v3  ;;  %v661_v16 = vmul.f32 %v658_v12, %v6313_v0  ;;  %v375_v17 = vstv %s5086_s29  ;;  %s5104_s19 = sld [smem:[#allocation4 + $0x102]]  ;;  %s5106_s21 = sld [smem:[#allocation4 + $0x104]] }
  0x26   :  { %v354_v18 = vmul.f32 %v350_v6, %v6338_v11  ;;  %v376_v19 = vmul.f32 %v375_v17, %v6318_v1  ;;  %v707_v20 = vstv %s5097_s30  ;;  %v377_v21 = vmul.f32 %v375_v17, %v6323_v3  ;;  %s5116_s24 = sld [smem:[#allocation4 + $0x185]]  ;;  %s6764_s22 = sld [smem:[#allocation4 + $0x108]] }
  0x27   :  { %v378_v22 = vmul.f32 %v375_v17, %v6313_v0  ;;  %v708_v23 = vmul.f32 %v707_v20, %v6318_v1  ;;  %v709_v24 = vmul.f32 %v707_v20, %v6323_v3  ;;  %v710_v25 = vmul.f32 %v707_v20, %v6313_v0  ;;  %s6513_s30 = sld [smem:[#allocation4 + $0x105]]  ;;  %s5130_s23 = sld [smem:[#allocation4 + $0x281]] }
  0x28   :  { %v425_v26 = vstv %s5088_s11  ;;  %v662_v27 = vmul.f32 %v658_v12, %v6338_v11  ;;  %v379_v28 = vmul.f32 %v375_v17, %v6338_v11  ;;  %v711_v29 = vmul.f32 %v707_v20, %v6338_v11  ;;  %s5131_s28 = sld [smem:[#allocation4 + $0x282]]  ;;  %s7106_s25 = sld [smem:[#allocation4 + $0x207]] }
  0x29   :  { %644 = vrot.lane.b32.xlu0 %v635_v7, %s6247_s26  ;;  %359 = vrot.lane.b32.xlu1 %v351_v8, %s6247_s26  ;;  %v426_v30 = vmul.f32 %v425_v26, %v6318_v1  ;;  %v716_v31 = vrot.slane %v708_v23, 1  ;;  %v717_v32 = vrot.slane %v709_v24, 1  ;;  %v719_v33 = vrot.slane %v710_v25, 1  ;;  %s7121_s27 = sld [smem:[#allocation4 + $0x186]]  ;;  %s7215_s29 = sld [smem:[#allocation4 + $0x208]] }
  0x2a   :  { %v427_v34 = vmul.f32 %v425_v26, %v6323_v3  ;;  %v721_v35 = vrot.slane %v711_v29, 1  ;;  %v428_v36 = vmul.f32 %v425_v26, %v6313_v0  ;;  %v429_v37 = vmul.f32 %v425_v26, %v6338_v11 }
  0x2b   :  { %v718_v38 = vsel %vm409_vm0, %v716_v31, %v717_v32  ;;  %v720_v39 = vsel %vm409_vm0, %v717_v32, %v719_v33  ;;  %v434_v40 = vrot.slane %v426_v30, 1  ;;  %v739_v42 = vstv %s5098_s12 }
  0x2c   :  { %v435_v41 = vrot.slane %v427_v34, 1  ;;  %v437_v43 = vrot.slane %v428_v36, 1  ;;  %v439_v44 = vrot.slane %v429_v37, 1  ;;  %v722_v45 = vsel %vm409_vm0, %v719_v33, %v721_v35 }
  0x2d   :  { %361 = vrot.lane.b32.xlu0 %v352_v9, %s6247_s26  ;;  %363 = vrot.lane.b32.xlu1 %v353_v10, %s6247_s26  ;;  %v740_v47 = vmul.f32 %v739_v42, %v6318_v1  ;;  %v741_v48 = vmul.f32 %v739_v42, %v6323_v3  ;;  %v457_v51 = vstv %s5089_s13  ;;  %v742_v54 = vmul.f32 %v739_v42, %v6313_v0  ;;  %s5118_s13 = sld [smem:[#allocation4 + $0x187]] }
  0x2e   :  { %v436_v46 = vsel %vm409_vm0, %v434_v40, %v435_v41  ;;  %v438_v49 = vsel %vm409_vm0, %v435_v41, %v437_v43  ;;  %v440_v50 = vsel %vm409_vm0, %v437_v43, %v439_v44  ;;  %v743_v55 = vmul.f32 %v739_v42, %v6338_v11 }
  0x2f   :  { %v748_v52 = vrot.slane %v740_v47, 1  ;;  %v749_v53 = vrot.slane %v741_v48, 1  ;;  %v458_v56 = vmul.f32 %v457_v51, %v6318_v1  ;;  %v751_v58 = vrot.slane %v742_v54, 1 }
  0x30   :  { %v753_v59 = vrot.slane %v743_v55, 1  ;;  %v459_v60 = vmul.f32 %v457_v51, %v6323_v3  ;;  %v460_v61 = vmul.f32 %v457_v51, %v6313_v0  ;;  %v461_v62 = vmul.f32 %v457_v51, %v6338_v11 }
  0x31   :  { %648 = vrot.lane.b32.xlu0 %v637_v13, %s6247_s26  ;;  %667 = vrot.lane.b32.xlu1 %v659_v14, %s6248_s10  ;;  %v750_v57 = vsel %vm409_vm0, %v748_v52, %v749_v53  ;;  %v752_v63 = vsel %vm409_vm0, %v749_v53, %v751_v58  ;;  %v466_v4 = vrot.slane %v458_v56, 1  ;;  %v795_v9 = vstv %s5100_s14  ;;  %s5109_s14 = sld [smem:[#allocation4 + $0x107]] }
  0x32   :  { %v754_v2 = vsel %vm409_vm0, %v751_v58, %v753_v59  ;;  %v467_v5 = vrot.slane %v459_v60, 1  ;;  %v469_v7 = vrot.slane %v460_v61, 1  ;;  %v471_v8 = vrot.slane %v461_v62, 1 }
  0x33   :  { %v796_v10 = vmul.f32 %v795_v9, %v6318_v1  ;;  %v797_v12 = vmul.f32 %v795_v9, %v6323_v3  ;;  %v827_v30 = vstv %s5101_s16  ;;  %v546_v43 = vstv %s5092_s17  ;;  %s6568_s16 = sld [smem:[#allocation4 + $0x80]] }
  0x34   :  { %v468_v6 = vsel %vm409_vm0, %v466_v4, %v467_v5  ;;  %v470_v13 = vsel %vm409_vm0, %v467_v5, %v469_v7  ;;  %v472_v14 = vsel %vm409_vm0, %v469_v7, %v471_v8  ;;  %v829_v36 = vmul.f32 %v827_v30, %v6323_v3  ;;  %s6581_s17 = sld [smem:[#allocation6]] }
  0x35   :  { %669 = vrot.lane.b32.xlu0 %v660_v15, %s6248_s10  ;;  %671 = vrot.lane.b32.xlu1 %v661_v16, %s6248_s10  ;;  %v798_v15 = vmul.f32 %v795_v9, %v6313_v0  ;;  %v514_v16 = vstv %s5091_s15  ;;  %v804_v17 = vrot.slane %v796_v10, 2  ;;  %v549_v51 = vmul.f32 %v546_v43, %v6313_v0  ;;  %s6566_s15 = sld [smem:[#allocation6 + $0x1]] }
  0x36   :  { %v517_v25 = vmul.f32 %v514_v16, %v6313_v0  ;;  %v518_v29 = vmul.f32 %v514_v16, %v6338_v11  ;;  %v837_v42 = vrot.slane %v829_v36, 2  ;;  %v550_v52 = vmul.f32 %v546_v43, %v6338_v11 }
  0x37   :  { %v807_v20 = vrot.slane %v798_v15, 2  ;;  %v558_v55 = vrot.slane %v549_v51, 2  ;;  %v1191_v60 = vstv %s5112_s0  ;;  %v1216_v7 = vstv %s5113_s18  ;;  %s6584_s0 = sld [smem:[#allocation4]]  ;;  %s5096_s18 = sld [smem:[#allocation4 + $0x83]] }
  0x38   :  { %v526_v32 = vrot.slane %v517_v25, 2  ;;  %v528_v34 = vrot.slane %v518_v29, 2  ;;  %v560_v56 = vrot.slane %v550_v52, 2  ;;  %v1192_v61 = vmul.f32 %v1191_v60, %v6318_v1 }
  0x39   :  { %365 = vrot.lane.b32.xlu0 %v354_v18, %s6247_s26  ;;  %384 = vrot.lane.b32.xlu1 %v376_v19, %s6248_s10  ;;  %v805_v18 = vrot.slane %v797_v12, 2  ;;  %v799_v19 = vmul.f32 %v795_v9, %v6338_v11  ;;  %v1193_v62 = vmul.f32 %v1191_v60, %v6323_v3  ;;  %v1217_v9 = vmul.f32 %v1216_v7, %v6318_v1 }
  0x3a   :  { %v529_v40 = vsel %vm498_vm1, %v526_v32, %v528_v34  ;;  %v1218_v10 = vmul.f32 %v1216_v7, %v6323_v3  ;;  %v1219_v12 = vmul.f32 %v1216_v7, %v6313_v0  ;;  %v986_v25 = vstv %s5106_s21  ;;  %s6664_s21 = sld [smem:[#allocation4 + $0x6]] }
  0x3b   :  { %v806_v23 = vsel %vm498_vm1, %v804_v17, %v805_v18  ;;  %v809_v24 = vrot.slane %v799_v19, 2  ;;  %v808_v26 = vsel %vm498_vm1, %v805_v18, %v807_v20 }
  0x3d   :  { %386 = vrot.lane.b32.xlu0 %v377_v21, %s6248_s10  ;;  %388 = vrot.lane.b32.xlu1 %v378_v22, %s6248_s10  ;;  %v515_v21 = vmul.f32 %v514_v16, %v6318_v1  ;;  %v516_v22 = vmul.f32 %v514_v16, %v6323_v3  ;;  %v810_v31 = vsel %vm498_vm1, %v807_v20, %v809_v24 }
  0x41   :  { %673 = vrot.lane.b32.xlu0 %v662_v27, %s6248_s10  ;;  %390 = vrot.lane.b32.xlu1 %v379_v28, %s6248_s10  ;;  %v523_v27 = vrot.slane %v515_v21, 2  ;;  %v524_v28 = vrot.slane %v516_v22, 2 }
  0x43   :  { %v525_v33 = vsel %vm498_vm1, %v523_v27, %v524_v28  ;;  %v527_v37 = vsel %vm498_vm1, %v524_v28, %v526_v32  ;;  %v1220_v28 = vmul.f32 %v1216_v7, %v6338_v11 }
  0x45   :  { %723 = vrot.lane.b32.xlu0 %v718_v38, %s6247_s26  ;;  %725 = vrot.lane.b32.xlu1 %v720_v39, %s6247_s26  ;;  %v830_v38 = vmul.f32 %v827_v30, %v6313_v0  ;;  %v831_v39 = vmul.f32 %v827_v30, %v6338_v11 }
  0x47   :  { %v839_v47 = vrot.slane %v830_v38, 2  ;;  %v841_v48 = vrot.slane %v831_v39, 2  ;;  %v6521_v39 = vld [vmem:[%s8789_s2 + $0x18] sm:$0xff] }
  0x49   :  { %727 = vrot.lane.b32.xlu0 %v722_v45, %s6247_s26  ;;  %441 = vrot.lane.b32.xlu1 %v436_v46, %s6247_s26  ;;  %v548_v45 = vmul.f32 %v546_v43, %v6323_v3  ;;  %v840_v53 = vsel %vm498_vm1, %v837_v42, %v839_v47  ;;  %v842_v54 = vsel %vm498_vm1, %v839_v47, %v841_v48 }
  0x4d   :  { %443 = vrot.lane.b32.xlu0 %v438_v49, %s6247_s26  ;;  %445 = vrot.lane.b32.xlu1 %v440_v50, %s6247_s26  ;;  %v556_v50 = vrot.slane %v548_v45, 2 }
  0x4f   :  { %v559_v58 = vsel %vm498_vm1, %v556_v50, %v558_v55 }
  0x51   :  { %729 = vrot.lane.b32.xlu0 %v721_v35, %s6247_s26  ;;  %755 = vrot.lane.b32.xlu1 %v750_v57, %s6248_s10  ;;  %v828_v35 = vmul.f32 %v827_v30, %v6318_v1 }
  0x53   :  { %v836_v41 = vrot.slane %v828_v35, 2 }
  0x55   :  { %757 = vrot.lane.b32.xlu0 %v752_v63, %s6248_s10  ;;  %759 = vrot.lane.b32.xlu1 %v754_v2, %s6248_s10  ;;  %v838_v46 = vsel %vm498_vm1, %v836_v41, %v837_v42  ;;  %v912_v63 = vstv %s5103_s1  ;;  %v1194_v2 = vmul.f32 %v1191_v60, %v6313_v0  ;;  %s5119_s1 = sld [smem:[#allocation4 + $0x188]] }
  0x56   :  { %v913_v4 = vmul.f32 %v912_v63, %v6318_v1  ;;  %v914_v5 = vmul.f32 %v912_v63, %v6323_v3  ;;  %v916_v15 = vmul.f32 %v912_v63, %v6338_v11 }
  0x59   :  { %447 = vrot.lane.b32.xlu0 %v439_v44, %s6247_s26  ;;  %473 = vrot.lane.b32.xlu1 %v468_v6, %s6248_s10  ;;  %v547_v44 = vmul.f32 %v546_v43, %v6318_v1  ;;  %v915_v6 = vmul.f32 %v912_v63, %v6313_v0 }
  0x5b   :  { %v555_v49 = vrot.slane %v547_v44, 2  ;;  %v1297_v44 = vstv %s5116_s24  ;;  %s5121_s24 = sld [smem:[#allocation4 + $0x201]] }
  0x5d   :  { %475 = vrot.lane.b32.xlu0 %v470_v13, %s6248_s10  ;;  %477 = vrot.lane.b32.xlu1 %v472_v14, %s6248_s10  ;;  %v557_v57 = vsel %vm498_vm1, %v555_v49, %v556_v50  ;;  %v937_v13 = vstv %s5104_s19  ;;  %v1265_v14 = vstv %s5115_s20  ;;  %s6616_s19 = sld [smem:[#allocation4 + $0x3]]  ;;  %s6627_s20 = sld [smem:[#allocation4 + $0x86]] }
  0x5e   :  { %v938_v16 = vmul.f32 %v937_v13, %v6318_v1  ;;  %v1266_v19 = vmul.f32 %v1265_v14, %v6318_v1  ;;  %v939_v20 = vmul.f32 %v937_v13, %v6323_v3  ;;  %v940_v21 = vmul.f32 %v937_v13, %v6313_v0 }
  0x5f   :  { %v1267_v22 = vmul.f32 %v1265_v14, %v6323_v3  ;;  %v941_v0 = vmul.f32 %v937_v13, %v6338_v11  ;;  %v1269_v30 = vmul.f32 %v1265_v14, %v6338_v11 }
  0x60   :  { %v1274_v27 = vrot.slane %v1266_v19, 1 }
  0x61   :  { %761 = vrot.lane.b32.xlu0 %v753_v59, %s6248_s10  ;;  %479 = vrot.lane.b32.xlu1 %v471_v8, %s6248_s10  ;;  %v561_v59 = vsel %vm498_vm1, %v558_v55, %v560_v56  ;;  %v1195_v8 = vmul.f32 %v1191_v60, %v6338_v11  ;;  %v1275_v3 = vrot.slane %v1267_v22, 1  ;;  %v1279_v11 = vrot.slane %v1269_v30, 1 }
  0x63   :  { %v1276_v41 = vsel %vm409_vm0, %v1274_v27, %v1275_v3 }
  0x65   :  { %811 = vrot.lane.b32.xlu0 %v806_v23, %s6247_s26  ;;  %813 = vrot.lane.b32.xlu1 %v808_v26, %s6247_s26  ;;  %v6485_v23 = vld [vmem:[%s8789_s2 + $0x10] sm:$0xff] }
  0x66   :  { %v989_v38 = vmul.f32 %v6485_v23, %v986_v25 }
  0x68   :  { %v998_v47 = vrot.slane %v989_v38, 1 }
  0x69   :  { %815 = vrot.lane.b32.xlu0 %v810_v31, %s6247_s26  ;;  %530 = vrot.lane.b32.xlu1 %v525_v33, %s6247_s26  ;;  %v6500_v31 = vld [vmem:[%s8789_s2] sm:$0xff]  ;;  %v6506_v33 = vld [vmem:[%s8789_s2 + $0x8] sm:$0xff] }
  0x6a   :  { %v987_v32 = vmul.f32 %v6500_v31, %v986_v25  ;;  %v1298_v49 = vmul.f32 %v6500_v31, %v1297_v44  ;;  %v1299_v50 = vmul.f32 %v6506_v33, %v1297_v44 }
  0x6c   :  { %v1306_v55 = vrot.slane %v1298_v49, 1 }
  0x6d   :  { %532 = vrot.lane.b32.xlu0 %v527_v37, %s6247_s26  ;;  %534 = vrot.lane.b32.xlu1 %v529_v40, %s6247_s26  ;;  %v995_v37 = vrot.slane %v987_v32, 1  ;;  %v990_v40 = vmul.f32 %v6521_v39, %v986_v25 }
  0x71   :  { %817 = vrot.lane.b32.xlu0 %v809_v24, %s6247_s26  ;;  %843 = vrot.lane.b32.xlu1 %v838_v46, %s6248_s10  ;;  %v1268_v24 = vmul.f32 %v6485_v23, %v1265_v14 }
  0x73   :  { %v1277_v29 = vrot.slane %v1268_v24, 1 }
  0x75   :  { %845 = vrot.lane.b32.xlu0 %v840_v53, %s6248_s10  ;;  %847 = vrot.lane.b32.xlu1 %v842_v54, %s6248_s10  ;;  %v1278_v42 = vsel %vm409_vm0, %v1275_v3, %v1277_v29  ;;  %v1280_v51 = vsel %vm409_vm0, %v1277_v29, %v1279_v11 }
  0x79   :  { %536 = vrot.lane.b32.xlu0 %v528_v34, %s6247_s26  ;;  %562 = vrot.lane.b32.xlu1 %v557_v57, %s6248_s10  ;;  %v988_v34 = vmul.f32 %v6506_v33, %v986_v25  ;;  %v1300_v57 = vmul.f32 %v6485_v23, %v1297_v44 }
  0x7b   :  { %v996_v43 = vrot.slane %v988_v34, 1  ;;  %v1074_v34 = vstv %s5109_s14  ;;  %s5132_s14 = sld [smem:[#allocation4 + $0x283]] }
  0x7d   :  { %564 = vrot.lane.b32.xlu0 %v559_v58, %s6248_s10  ;;  %566 = vrot.lane.b32.xlu1 %v561_v59, %s6248_s10  ;;  %v997_v52 = vsel %vm409_vm0, %v995_v37, %v996_v43  ;;  %v1301_v58 = vmul.f32 %v6521_v39, %v1297_v44  ;;  %v999_v59 = vsel %vm409_vm0, %v996_v43, %v998_v47 }
  0x7e   :  { %v1075_v43 = vmul.f32 %v6500_v31, %v1074_v34  ;;  %v1076_v44 = vmul.f32 %v6506_v33, %v1074_v34 }
  0x81   :  { %849 = vrot.lane.b32.xlu0 %v841_v48, %s6248_s10  ;;  %568 = vrot.lane.b32.xlu1 %v560_v56, %s6248_s10  ;;  %v1000_v48 = vrot.slane %v990_v40, 1  ;;  %v1307_v56 = vrot.slane %v1299_v50, 1  ;;  %v1083_v50 = vrot.slane %v1075_v43, 2 }
  0x83   :  { %v1001_v60 = vsel %vm409_vm0, %v998_v47, %v1000_v48  ;;  %v1308_v7 = vsel %vm409_vm0, %v1306_v55, %v1307_v56  ;;  %v6612_v55 = vmul.f32 %v6521_v39, %v1074_v34 }
  0x85   :  { %1200 = vrot.lane.b32.xlu0 %v1192_v61, %s6247_s26  ;;  %1202 = vrot.lane.b32.xlu1 %v1193_v62, %s6247_s26  ;;  %v1018_v61 = vstv %s6513_s30  ;;  %8825 = vst [vmem:[#allocation10_spill] sm:$0xff] %v6612_v55  ;;  %s7227_s30 = sld [smem:[#allocation4 + $0x106]] }
  0x86   :  { %v1021_v13 = vmul.f32 %v6485_v23, %v1018_v61  ;;  %v1022_v14 = vmul.f32 %v6521_v39, %v1018_v61 }
  0x88   :  { %v1030_v22 = vrot.slane %v1021_v13, 1  ;;  %v1032_v24 = vrot.slane %v1022_v14, 1  ;;  %v623_v13 = vstv %s6568_s16  ;;  %v683_v14 = vstv %s5096_s18  ;;  %s5133_s16 = sld [smem:[#allocation4 + $0x284]]  ;;  %s5111_s18 = sld [smem:[#allocation4 + $0x180]] }
  0x89   :  { %1204 = vrot.lane.b32.xlu0 %v1194_v2, %s6247_s26  ;;  %921 = vrot.lane.b32.xlu1 %v913_v4, %s6247_s26  ;;  %v1309_v2 = vrot.slane %v1300_v57, 1  ;;  %v1311_v4 = vrot.slane %v1301_v58, 1  ;;  %v1385_v58 = vstv %s5119_s1  ;;  %v6668_v43 = vmul.f32 %v6521_v39, %v683_v14  ;;  %s5125_s1 = sld [smem:[#allocation4 + $0x205]] }
  0x8a   :  { %v1033_v32 = vsel %vm409_vm0, %v1030_v22, %v1032_v24 }
  0x8d   :  { %923 = vrot.lane.b32.xlu0 %v914_v5, %s6247_s26  ;;  %925 = vrot.lane.b32.xlu1 %v915_v6, %s6247_s26  ;;  %v1019_v5 = vmul.f32 %v6500_v31, %v1018_v61  ;;  %v1020_v6 = vmul.f32 %v6506_v33, %v1018_v61 }
  0x91   :  { %1206 = vrot.lane.b32.xlu0 %v1195_v8, %s6247_s26  ;;  %1225 = vrot.lane.b32.xlu1 %v1217_v9, %s6248_s10 }
  0x95   :  { %1227 = vrot.lane.b32.xlu0 %v1218_v10, %s6248_s10  ;;  %1229 = vrot.lane.b32.xlu1 %v1219_v12, %s6248_s10  ;;  %v1027_v10 = vrot.slane %v1019_v5, 1  ;;  %v1028_v12 = vrot.slane %v1020_v6, 1  ;;  %v1387_v5 = vmul.f32 %v6506_v33, %v1385_v58 }
  0x97   :  { %v6472_v17 = vpop.permute.xlu1 %646  ;;  %v6474_v18 = vpop.permute.xlu0 %642  ;;  %v1029_v25 = vsel %vm409_vm0, %v1027_v10, %v1028_v12  ;;  %v1031_v30 = vsel %vm409_vm0, %v1028_v12, %v1030_v22  ;;  %v6642_v22 = vmul.f32 %v6521_v39, %v1385_v58 }
  0x99   :  { %927 = vrot.lane.b32.xlu0 %v916_v15, %s6247_s26  ;;  %946 = vrot.lane.b32.xlu1 %v938_v16, %s6248_s10  ;;  %v1310_v15 = vsel %vm409_vm0, %v1307_v56, %v1309_v2  ;;  %v1312_v16 = vsel %vm409_vm0, %v1309_v2, %v1311_v4  ;;  %v8797_v2 = vrot.slane %v6612_v55, 2  ;;  %8827 = vst [vmem:[#allocation12_spill] sm:$0xff] %v6642_v22 }
  0x9b   :  { %v6488_v1 = vpop.permute.xlu0 %644  ;;  %v6490_v26 = vpop.permute.xlu1 %359 }
  0x9d   :  { %948 = vrot.lane.b32.xlu0 %v939_v20, %s6248_s10  ;;  %950 = vrot.lane.b32.xlu1 %v940_v21, %s6248_s10  ;;  %v1353_v21 = vstv %s5118_s13  ;;  %s5122_s13 = sld [smem:[#allocation4 + $0x202]] }
  0x9e   :  { %v1355_v3 = vmul.f32 %v6506_v33, %v1353_v21  ;;  %v1356_v29 = vmul.f32 %v6485_v23, %v1353_v21  ;;  %v6597_v40 = vmul.f32 %v6521_v39, %v1353_v21 }
  0x9f   :  { %v6509_v35 = vpop.permute.xlu0 %361  ;;  %v6511_v36 = vpop.permute.xlu1 %363 }
  0xa0   :  { %v1367_v49 = vrot.slane %v6597_v40, 2 }
  0xa1   :  { %1231 = vrot.lane.b32.xlu0 %v1220_v28, %s6248_s10  ;;  %952 = vrot.lane.b32.xlu1 %v941_v0, %s6248_s10  ;;  %v1354_v0 = vmul.f32 %v6500_v31, %v1353_v21  ;;  %v1388_v21 = vmul.f32 %v6485_v23, %v1385_v58 }
  0xa3   :  { %v6526_v45 = vpop.permute.xlu0 %648  ;;  %v6528_v46 = vpop.permute.xlu1 %667  ;;  %v1362_v38 = vrot.slane %v1354_v0, 2  ;;  %v6649_v0 = vstv %s6566_s15  ;;  %s5142_s15 = sld [smem:[#allocation6 + $0x5]] }
  0xa5   :  { %1281 = vrot.lane.b32.xlu0 %v1276_v41, %s6247_s26  ;;  %1283 = vrot.lane.b32.xlu1 %v1278_v42, %s6247_s26  ;;  %v1363_v41 = vrot.slane %v1355_v3, 2  ;;  %v1365_v42 = vrot.slane %v1356_v29, 2  ;;  %v624_v3 = vmul.f32 %v6500_v31, %v623_v13 }
  0xa7   :  { %v6536_v53 = vpop.permute.xlu0 %669  ;;  %v6538_v54 = vpop.permute.xlu1 %671  ;;  %v1364_v56 = vsel %vm498_vm1, %v1362_v38, %v1363_v41  ;;  %v1366_v57 = vsel %vm498_vm1, %v1363_v41, %v1365_v42  ;;  %v1368_v6 = vsel %vm498_vm1, %v1365_v42, %v1367_v49  ;;  %v6661_v38 = vmul.f32 %v6506_v33, %v683_v14 }
  0xa8   :  { %v400_v41 = vstv %s6616_s19  ;;  %v686_v42 = vmul.f32 %v6485_v23, %v683_v14  ;;  %s5102_s19 = sld [smem:[#allocation4 + $0x100]] }
  0xa9   :  { %1285 = vrot.lane.b32.xlu0 %v1280_v51, %s6247_s26  ;;  %1002 = vrot.lane.b32.xlu1 %v997_v52, %s6247_s26  ;;  %v1084_v51 = vrot.slane %v1076_v44, 2  ;;  %v1077_v52 = vmul.f32 %v6485_v23, %v1074_v34  ;;  %v684_v34 = vmul.f32 %v6500_v31, %v683_v14  ;;  %v1397_v44 = vrot.slane %v1388_v21, 2 }
  0xab   :  { %v6547_v62 = vpop.permute.xlu0 %365  ;;  %v6549_v63 = vpop.permute.xlu1 %384  ;;  %v1086_v61 = vrot.slane %v1077_v52, 2  ;;  %v625_v52 = vmul.f32 %v6506_v33, %v623_v13  ;;  %v692_v21 = vrot.slane %v684_v34, 1 }
  0xad   :  { %1004 = vrot.lane.b32.xlu0 %v999_v59, %s6247_s26  ;;  %1006 = vrot.lane.b32.xlu1 %v1001_v60, %s6247_s26  ;;  %v630_v34 = vadd.f32 %v6649_v0, %v625_v52 }
  0xaf   :  { %v6556_v8 = vpop.permute.xlu0 %386  ;;  %v6558_v9 = vpop.permute.xlu1 %388 }
  0xb1   :  { %1287 = vrot.lane.b32.xlu0 %v1279_v11, %s6247_s26  ;;  %1313 = vrot.lane.b32.xlu1 %v1308_v7, %s6248_s10  ;;  %v1085_v7 = vsel %vm498_vm1, %v1083_v50, %v1084_v51 }
  0xb3   :  { %v6570_v19 = vpop.permute.xlu0 %673  ;;  %v6572_v20 = vpop.permute.xlu1 %390 }
  0xb5   :  { %1315 = vrot.lane.b32.xlu0 %v1310_v15, %s6248_s10  ;;  %1317 = vrot.lane.b32.xlu1 %v1312_v16, %s6248_s10  ;;  %v1395_v16 = vrot.slane %v1387_v5, 2  ;;  %v6683_v5 = vmul.f32 %v6506_v33, %v400_v41 }
  0xb7   :  { %v6577_v27 = vpop.permute.xlu0 %723  ;;  %v6579_v28 = vpop.permute.xlu1 %725 }
  0xb9   :  { %1008 = vrot.lane.b32.xlu0 %v1000_v48, %s6247_s26  ;;  %1034 = vrot.lane.b32.xlu1 %v1029_v25, %s6248_s10  ;;  %v1089_v25 = vsel %vm498_vm1, %v1086_v61, %v8797_v2 }
  0xbb   :  { %v6592_v11 = vpop.permute.xlu0 %727  ;;  %v6594_v37 = vpop.permute.xlu1 %441 }
  0xbd   :  { %1036 = vrot.lane.b32.xlu0 %v1031_v30, %s6248_s10  ;;  %1038 = vrot.lane.b32.xlu1 %v1033_v32, %s6248_s10  ;;  %v6657_v32 = vstv %s6584_s0  ;;  %s5134_s0 = sld [smem:[#allocation4 + $0x285]] }
  0xbe   :  { %v341_v14 = vmul.f32 %v6500_v31, %v6657_v32  ;;  %v343_v40 = vmul.f32 %v6485_v23, %v6657_v32 }
  0xbf   :  { %v6603_v47 = vpop.permute.xlu0 %443  ;;  %v6605_v48 = vpop.permute.xlu1 %445 }
  0xc1   :  { %1319 = vrot.lane.b32.xlu0 %v1311_v4, %s6248_s10  ;;  %1040 = vrot.lane.b32.xlu1 %v1032_v24, %s6248_s10  ;;  %v1386_v4 = vmul.f32 %v6500_v31, %v1385_v58  ;;  %v1087_v24 = vsel %vm498_vm1, %v1084_v51, %v1086_v61  ;;  %v626_v51 = vmul.f32 %v6485_v23, %v623_v13  ;;  %v6679_v61 = vstv %s6581_s17  ;;  %s5124_s17 = sld [smem:[#allocation4 + $0x204]] }
  0xc2   :  { %v629_v58 = vadd.f32 %v6649_v0, %v624_v3  ;;  %v346_v52 = vadd.f32 %v6679_v61, %v341_v14 }
  0xc3   :  { %v6618_v59 = vpop.permute.xlu0 %729  ;;  %v6620_v60 = vpop.permute.xlu1 %755  ;;  %v1394_v15 = vrot.slane %v1386_v4, 2  ;;  %v401_v4 = vmul.f32 %v6500_v31, %v400_v41  ;;  %v631_v55 = vadd.f32 %v6649_v0, %v626_v51 }
  0xc4   :  { %8826 = vst [vmem:[#allocation11_spill] sm:$0xff] %v6618_v59  ;;  %v654_v51 = vadd.f32 %v6474_v18, %v629_v58  ;;  %v655_v58 = vadd.f32 %v6488_v1, %v630_v34  ;;  %v8832_v34 = vrot.slane %v6668_v43, 1 }
  0xc5   :  { %1369 = vrot.lane.b32.xlu0 %v1364_v56, %s6247_s26  ;;  %1371 = vrot.lane.b32.xlu1 %v1366_v57, %s6247_s26  ;;  %v1396_v56 = vsel %vm498_vm1, %v1394_v15, %v1395_v16  ;;  %v771_v57 = vstv %s6627_s20  ;;  %v342_v15 = vmul.f32 %v6506_v33, %v6657_v32  ;;  %v656_v18 = vadd.f32 %v6472_v17, %v631_v55  ;;  %s5140_s20 = sld [smem:[#allocation6 + $0x3]] }
  0xc6   :  { %v772_v2 = vmul.f32 %v6500_v31, %v771_v57  ;;  %v6701_v50 = vmul.f32 %v6506_v33, %v771_v57  ;;  %v679_v14 = vadd.f32 %v6528_v46, %v654_v51  ;;  %v680_v1 = vadd.f32 %v6536_v53, %v655_v58 }
  0xc7   :  { %v6633_v10 = vpop.permute.xlu0 %757  ;;  %v6635_v12 = vpop.permute.xlu1 %759  ;;  %v681_v46 = vadd.f32 %v6538_v54, %v656_v18  ;;  %v344_v55 = vmul.f32 %v6521_v39, %v6657_v32 }
  0xc9   :  { %1373 = vrot.lane.b32.xlu0 %v1368_v6, %s6247_s26  ;;  %1090 = vrot.lane.b32.xlu1 %v1085_v7, %s6247_s26 }
  0xcb   :  { %v6652_v29 = vpop.permute.xlu0 %447  ;;  %v6654_v30 = vpop.permute.xlu1 %473 }
  0xcc   :  { %8828 = vst [vmem:[#allocation13_spill] sm:$0xff] %v6652_v29 }
  0xcd   :  { %1092 = vrot.lane.b32.xlu0 %v1087_v24, %s6247_s26  ;;  %1094 = vrot.lane.b32.xlu1 %v1089_v25, %s6247_s26  ;;  %v693_v24 = vrot.slane %v6661_v38, 1  ;;  %v695_v25 = vrot.slane %v686_v42, 1  ;;  %v1398_v38 = vsel %vm498_vm1, %v1395_v16, %v1397_v44  ;;  %v8829_v42 = vrot.slane %v6642_v22, 2 }
  0xce   :  { %v347_v16 = vadd.f32 %v6679_v61, %v342_v15  ;;  %v627_v22 = vmul.f32 %v6521_v39, %v623_v13  ;;  %v489_v15 = vstv %s6664_s21  ;;  %v348_v13 = vadd.f32 %v6679_v61, %v343_v40  ;;  %s5114_s21 = sld [smem:[#allocation4 + $0x183]] }
  0xcf   :  { %v6685_v6 = vpop.permute.xlu0 %475  ;;  %v6687_v7 = vpop.permute.xlu1 %477  ;;  %v1400_v3 = vsel %vm498_vm1, %v1397_v44, %v8829_v42  ;;  %v403_v44 = vmul.f32 %v6485_v23, %v400_v41  ;;  %v6722_v42 = vmul.f32 %v6521_v39, %v400_v41  ;;  %v698_v40 = vsel %vm409_vm0, %v695_v25, %v8832_v34 }
  0xd0   :  { %v6744_v17 = vadd.f32 %v6649_v0, %v627_v22  ;;  %v6762_v54 = vmul.f32 %v6506_v33, %v489_v15  ;;  %v8833_v0 = vrot.slane %v6701_v50, 2  ;;  %v6780_v34 = vmul.f32 %v6521_v39, %v489_v15 }
  0xd1   :  { %1375 = vrot.lane.b32.xlu0 %v1367_v49, %s6247_s26  ;;  %1401 = vrot.lane.b32.xlu1 %v1396_v56, %s6248_s10  ;;  %v410_v49 = vrot.slane %v401_v4, 1  ;;  %v411_v56 = vrot.slane %v6683_v5, 1  ;;  %v780_v4 = vrot.slane %v772_v2, 2  ;;  %v6741_v2 = vmul.f32 %v6521_v39, %v771_v57 }
  0xd2   :  { %v413_v51 = vrot.slane %v403_v44, 1 }
  0xd3   :  { %v6712_v29 = vpop.permute.xlu0 %761  ;;  %v6714_v59 = vpop.permute.xlu1 %479  ;;  %v6758_v22 = vsel %vm409_vm0, %v410_v49, %v411_v56  ;;  %v782_v32 = vsel %vm498_vm1, %v780_v4, %v8833_v0  ;;  %v6776_v49 = vmul.f32 %v6485_v23, %v489_v15  ;;  %v371_v4 = vadd.f32 %v6490_v26, %v346_v52 }
  0xd4   :  { %8830 = vst [vmem:[#allocation14_spill] sm:$0xff] %v6712_v29  ;;  %8831 = vst [vmem:[#allocation15_spill] sm:$0xff] %v6714_v59  ;;  %v694_v59 = vsel %vm409_vm0, %v692_v21, %v693_v24  ;;  %v696_v21 = vsel %vm409_vm0, %v693_v24, %v695_v25  ;;  %v373_v0 = vadd.f32 %v6511_v36, %v348_v13  ;;  %v8800_v13 = vmov 0.0  }
  0xd5   :  { %1403 = vrot.lane.b32.xlu0 %v1398_v38, %s6248_s10  ;;  %1405 = vrot.lane.b32.xlu1 %v1400_v3, %s6248_s10  ;;  %v6736_v38 = vmul.f32 %v6485_v23, %v771_v57  ;;  %v6755_v57 = vmul.f32 %v6500_v31, %v489_v15  ;;  %v703_v5 = vadd.f32 %v694_v59, %v679_v14 }
  0xd6   :  { %v704_v58 = vadd.f32 %v696_v21, %v680_v1  ;;  %v705_v14 = vadd.f32 %v698_v40, %v681_v46  ;;  %v398_v26 = vadd.f32 %v6558_v9, %v373_v0  ;;  %v414_v36 = vsel %vm409_vm0, %v411_v56, %v413_v51  ;;  %313 = vst [vmem:[#allocation2 + $0x8] sm:$0xff] %v8800_v13 }
  0xd7   :  { %v6733_v41 = vpop.permute.xlu0 %811  ;;  %v6738_v3 = vpop.permute.xlu1 %813  ;;  %v783_v24 = vrot.slane %v6736_v38, 2  ;;  %v735_v18 = vadd.f32 %v6577_v27, %v703_v5  ;;  %v372_v38 = vadd.f32 %v6509_v35, %v347_v16  ;;  %v499_v25 = vrot.slane %v6755_v57, 2  ;;  %312 = vst [vmem:[#allocation2] sm:$0xff] %v8800_v13  ;;  %314 = vst [vmem:[#allocation2 + $0x10] sm:$0xff] %v8800_v13 }
  0xd8   :  { %v736_v53 = vadd.f32 %v6579_v28, %v704_v58  ;;  %v500_v27 = vrot.slane %v6762_v54, 2  ;;  %v396_v5 = vadd.f32 %v6549_v63, %v371_v4  ;;  %v8835_v28 = vrot.slane %v6722_v42, 1  ;;  %315 = vst [vmem:[#allocation2 + $0x18] sm:$0xff] %v8800_v13  ;;  %316 = vst [vmem:[#allocation2 + $0x20] sm:$0xff] %v8800_v13 }
  0xd9   :  { %v767_v29 = vadd.f32 %v6620_v60, %v735_v18  ;;  %v397_v15 = vadd.f32 %v6556_v8, %v372_v38  ;;  %317 = vst [vmem:[#allocation2 + $0x28] sm:$0xff] %v8800_v13  ;;  %318 = vst [vmem:[#allocation2 + $0x30] sm:$0xff] %v8800_v13  ;;  %v349_v63 = vadd.f32 %v6679_v61, %v344_v55  ;;  %v8836_v8 = vrot.slane %v6701_v50, 2 }
  0xda   :  { %v768_v60 = vadd.f32 %v6633_v10, %v736_v53  ;;  %319 = vst [vmem:[#allocation2 + $0x38] sm:$0xff] %v8800_v13  ;;  %320 = vst [vmem:[#allocation2 + $0x40] sm:$0xff] %v8800_v13  ;;  %v8837_v10 = vrot.slane %v6741_v2, 2  ;;  %v502_v56 = vrot.slane %v6776_v49, 2  ;;  %v657_v1 = vadd.f32 %v6526_v45, %v6744_v17 }
  0xdb   :  { %v6771_v44 = vpop.permute.xlu0 %815  ;;  %v6773_v59 = vpop.permute.xlu1 %530  ;;  %321 = vst [vmem:[#allocation2 + $0x48] sm:$0xff] %v8800_v13  ;;  %322 = vst [vmem:[#allocation2 + $0x50] sm:$0xff] %v8800_v13  ;;  %v784_v9 = vsel %vm498_vm1, %v8836_v8, %v783_v24  ;;  %v791_v46 = vadd.f32 %v782_v32, %v767_v29  ;;  %v504_v21 = vrot.slane %v6780_v34, 2  ;;  %v1106_v40 = vstv %s6764_s22  ;;  %s7078_s22 = sld [smem:[#allocation6 + $0x2]] }
  0xdc   :  { %8834 = vst [vmem:[#allocation16_spill] sm:$0xff] %v6773_v59  ;;  %v737_v59 = vadd.f32 %v6592_v11, %v705_v14  ;;  %v416_v11 = vsel %vm409_vm0, %v413_v51, %v8835_v28  ;;  %323 = vst [vmem:[#allocation2 + $0x58] sm:$0xff] %v8800_v13  ;;  %v421_v51 = vadd.f32 %v6758_v22, %v396_v5  ;;  %v8838_v38 = vrot.slane %v6668_v43, 1 }
  0xdd   :  { %324 = vst [vmem:[#allocation2 + $0x60] sm:$0xff] %v8800_v13  ;;  %325 = vst [vmem:[#allocation2 + $0x68] sm:$0xff] %v8800_v13  ;;  %v422_v61 = vadd.f32 %v414_v36, %v397_v15  ;;  %v423_v55 = vadd.f32 %v416_v11, %v398_v26  ;;  %v501_v50 = vsel %vm498_vm1, %v499_v25, %v500_v27 }
  0xde   :  { %v769_v16 = vadd.f32 %v6635_v12, %v737_v59  ;;  %326 = vst [vmem:[#allocation2 + $0x70] sm:$0xff] %v8800_v13  ;;  %327 = vst [vmem:[#allocation2 + $0x78] sm:$0xff] %v8800_v13  ;;  %v786_v12 = vsel %vm498_vm1, %v783_v24, %v8837_v10  ;;  %v682_v24 = vadd.f32 %v6570_v19, %v657_v1 }
  0xdf   :  { %v6793_v52 = vpop.permute.xlu0 %532  ;;  %v6795_v35 = vpop.permute.xlu1 %534  ;;  %328 = vst [vmem:[#allocation2 + $0x80] sm:$0xff] %v8800_v13  ;;  %329 = vst [vmem:[#allocation2 + $0x88] sm:$0xff] %v8800_v13  ;;  %v823_v59 = vadd.f32 %v6733_v41, %v791_v46  ;;  %v792_v49 = vadd.f32 %v784_v9, %v768_v60  ;;  %v453_v29 = vadd.f32 %v6594_v37, %v421_v51 }
  0xe0   :  { %330 = vst [vmem:[#allocation2 + $0x90] sm:$0x1f] %v8800_v13  ;;  %331 = vst [vmem:[#allocation2 + $0x98] sm:$0x1f] %v8800_v13  ;;  %v793_v45 = vadd.f32 %v786_v12, %v769_v16  ;;  %v454_v17 = vadd.f32 %v6603_v47, %v422_v61  ;;  %v1107_v22 = vmul.f32 %v6500_v31, %v1106_v40  ;;  %v8840_v16 = vld [vmem:[#allocation14_spill] sm:$0xff]  ;;  %v8841_v12 = vrot.slane %v6722_v42, 1 }
  0xe1   :  { %332 = vst [vmem:[#allocation2 + $0xa0] sm:$0x1f] %v8800_v13  ;;  %333 = vst [vmem:[#allocation2 + $0xa8] sm:$0x1f] %v8800_v13  ;;  %v6849_v32 = vmul.f32 %v6506_v33, %v1106_v40  ;;  %v455_v18 = vadd.f32 %v6605_v48, %v423_v55  ;;  %v824_v25 = vadd.f32 %v6738_v3, %v792_v49  ;;  %v8846_v49 = vrot.slane %v6741_v2, 2 }
  0xe2   :  { %334 = vst [vmem:[#allocation2 + $0xb0] sm:$0x1f] %v8800_v13  ;;  %335 = vst [vmem:[#allocation2 + $0xb8] sm:$0x1f] %v8800_v13  ;;  %v825_v58 = vadd.f32 %v6771_v44, %v793_v45  ;;  %v374_v41 = vadd.f32 %v6547_v62, %v349_v63  ;;  %v485_v14 = vadd.f32 %v6654_v30, %v453_v29 }
  0xe3   :  { %v818_v57 = vpop.permute.xlu0 %817  ;;  %v844_v53 = vpop.permute.xlu1 %843  ;;  %v486_v37 = vadd.f32 %v6685_v6, %v454_v17  ;;  %v503_v31 = vsel %vm498_vm1, %v500_v27, %v502_v56  ;;  %v706_v48 = vadd.f32 %v8838_v38, %v682_v24  ;;  %v487_v3 = vadd.f32 %v6687_v7, %v455_v18  ;;  %v8839_v27 = vld [vmem:[#allocation11_spill] sm:$0xff]  ;;  %v8844_v51 = vld [vmem:[#allocation16_spill] sm:$0xff] }
  0xe4   :  { %v855_v19 = vadd.f32 %v844_v53, %v823_v59  ;;  %v399_v62 = vadd.f32 %v6572_v20, %v374_v41  ;;  %v505_v30 = vsel %vm498_vm1, %v502_v56, %v504_v21  ;;  %v1115_v6 = vrot.slane %v1107_v22, 2  ;;  %v8847_v17 = vld [vmem:[#allocation15_spill] sm:$0xff] }
  0xe5   :  { %v1116_v54 = vrot.slane %v6849_v32, 2  ;;  %v738_v5 = vadd.f32 %v8839_v27, %v706_v48  ;;  %v510_v36 = vadd.f32 %v501_v50, %v485_v14  ;;  %v511_v7 = vadd.f32 %v503_v31, %v486_v37 }
  0xe6   :  { %v863_v15 = vrot.slane %v855_v19, 1  ;;  %v1109_v60 = vmul.f32 %v6485_v23, %v1106_v40  ;;  %v6874_v20 = vmul.f32 %v6521_v39, %v1106_v40  ;;  %v512_v8 = vadd.f32 %v505_v30, %v487_v3  ;;  %v8845_v40 = vld [vmem:[#allocation13_spill] sm:$0xff] }
  0xe7   :  { %v846_v47 = vpop.permute.xlu0 %845  ;;  %v848_v4 = vpop.permute.xlu1 %847  ;;  %v770_v63 = vadd.f32 %v8840_v16, %v738_v5  ;;  %v424_v56 = vadd.f32 %v8841_v12, %v399_v62  ;;  %v542_v61 = vadd.f32 %v8844_v51, %v510_v36  ;;  %v543_v23 = vadd.f32 %v6793_v52, %v511_v7  ;;  %v6965_v12 = vld [vmem:[%s8789_s2] sm:$0xff] }
  0xe8   :  { %v856_v0 = vadd.f32 %v846_v47, %v824_v25  ;;  %v6863_v44 = vadd.f32 %v848_v4, %v825_v58  ;;  %v544_v39 = vadd.f32 %v6795_v35, %v512_v8  ;;  %v1117_v53 = vsel %vm498_vm1, %v1115_v6, %v1116_v54 }
  0xe9   :  { %v456_v55 = vadd.f32 %v8845_v40, %v424_v56  ;;  %v1118_v24 = vrot.slane %v1109_v60, 2  ;;  %v1120_v59 = vrot.slane %v6874_v20, 2  ;;  %v794_v52 = vadd.f32 %v8846_v49, %v770_v63 }
  0xea   :  { %v864_v26 = vrot.slane %v856_v0, 1  ;;  %v866_v43 = vrot.slane %v6863_v44, 1  ;;  %v1749_v20 = vstv %s5130_s23  ;;  %v1470_v51 = vstv %s5121_s24  ;;  %s7087_s23 = sld [smem:[#allocation4 + $0x287]]  ;;  %s7094_s24 = sld [smem:[#allocation4 + $0x103]] }
  0xeb   :  { %v537_v28 = vpop.permute.xlu0 %536  ;;  %v563_v11 = vpop.permute.xlu1 %562  ;;  %v488_v22 = vadd.f32 %v8847_v17, %v456_v55  ;;  %v826_v32 = vadd.f32 %v818_v57, %v794_v52  ;;  %v1119_v2 = vsel %vm498_vm1, %v1116_v54, %v1118_v24  ;;  %v1121_v47 = vsel %vm498_vm1, %v1118_v24, %v1120_v59 }
  0xec   :  { %v865_v9 = vsel %vm409_vm0, %v863_v15, %v864_v26  ;;  %v867_v10 = vsel %vm409_vm0, %v864_v26, %v866_v43  ;;  %v574_v45 = vadd.f32 %v563_v11, %v542_v61  ;;  %v1750_v56 = vmul.f32 %v6965_v12, %v1749_v20 }
  0xed   :  { %v6881_v1 = vmax.f32 %v855_v19, %v865_v9  ;;  %v6883_v46 = vmax.f32 %v856_v0, %v867_v10  ;;  %v8848_v19 = vld [vmem:[#allocation10_spill] sm:$0xff]  ;;  %v513_v4 = vadd.f32 %v504_v21, %v488_v22  ;;  %v1751_v10 = vmul.f32 %v6506_v33, %v1749_v20  ;;  %v6978_v33 = vld [vmem:[%s8789_s2 + $0x10] sm:$0xff] }
  0xee   :  { %v8849_v41 = vrot.slane %v8848_v19, 2  ;;  %v582_v37 = vrot.slane %v574_v45, 1  ;;  %v1752_v40 = vmul.f32 %v6978_v33, %v1749_v20 }
  0xef   :  { %8842 = vst [vmem:[#allocation11_spill] sm:$0xff] %v6881_v1  ;;  %8843 = vst [vmem:[#allocation14_spill] sm:$0xff] %v6883_v46  ;;  %v565_v50 = vpop.permute.xlu0 %564  ;;  %882 = vrot.lane.b32.xlu0 %v6881_v1, %s6247_s26  ;;  %884 = vrot.lane.b32.xlu1 %v6883_v46, %s6247_s26  ;;  %v567_v42 = vpop.permute.xlu1 %566  ;;  %v545_v62 = vadd.f32 %v537_v28, %v513_v4 }
  0xf0   :  { %v575_v35 = vadd.f32 %v565_v50, %v543_v23  ;;  %v576_v29 = vadd.f32 %v567_v42, %v544_v39  ;;  %v1471_v39 = vmul.f32 %v6965_v12, %v1470_v51  ;;  %v1473_v42 = vmul.f32 %v6978_v33, %v1470_v51 }
  0xf2   :  { %v583_v18 = vrot.slane %v575_v35, 1  ;;  %v585_v25 = vrot.slane %v576_v29, 1 }
  0xf3   :  { %v850_v58 = vpop.permute.xlu0 %849  ;;  %1096 = vrot.lane.b32.xlu0 %v8849_v41, %s6247_s26  ;;  %1122 = vrot.lane.b32.xlu1 %v1117_v53, %s6248_s10  ;;  %v569_v14 = vpop.permute.xlu1 %568  ;;  %v6991_v53 = vld [vmem:[%s8789_s2 + $0x8] sm:$0xff] }
  0xf4   :  { %v858_v31 = vadd.f32 %v850_v58, %v826_v32  ;;  %v586_v38 = vsel %vm409_vm0, %v583_v18, %v585_v25  ;;  %v584_v48 = vsel %vm409_vm0, %v582_v37, %v583_v18  ;;  %v577_v21 = vadd.f32 %v569_v14, %v545_v62 }
  0xf5   :  { %v6914_v30 = vmax.f32 %v575_v35, %v586_v38  ;;  %v6916_v6 = vmax.f32 %v574_v45, %v584_v48  ;;  %v1472_v24 = vmul.f32 %v6991_v53, %v1470_v51  ;;  %v7004_v35 = vld [vmem:[%s8789_s2 + $0x18] sm:$0xff]  ;;  %v1823_v37 = vstv %s5133_s16  ;;  %s5123_s16 = sld [smem:[#allocation4 + $0x203]] }
  0xf6   :  { %v868_v57 = vrot.slane %v858_v31, 1  ;;  %v587_v15 = vrot.slane %v577_v21, 1  ;;  %v1474_v14 = vmul.f32 %v7004_v35, %v1470_v51  ;;  %v1826_v38 = vmul.f32 %v6978_v33, %v1823_v37 }
  0xf7   :  { %v6908_v3 = vpop.permute.xlu0 %1200  ;;  %1124 = vrot.lane.b32.xlu0 %v1119_v2, %s6248_s10  ;;  %1126 = vrot.lane.b32.xlu1 %v1121_v47, %s6248_s10  ;;  %v6912_v0 = vpop.permute.xlu1 %1202  ;;  %8850 = vst [vmem:[#allocation16_spill] sm:$0xff] %v6914_v30  ;;  %8851 = vst [vmem:[#allocation13_spill] sm:$0xff] %v6916_v6  ;;  %v1824_v48 = vmul.f32 %v6965_v12, %v1823_v37  ;;  %v1544_v62 = vstv %s5124_s17  ;;  %s5135_s17 = sld [smem:[#allocation4 + $0x286]] }
  0xf8   :  { %v869_v34 = vsel %vm409_vm0, %v866_v43, %v868_v57  ;;  %v8853_v43 = vld [vmem:[#allocation12_spill] sm:$0xff]  ;;  %v6939_v28 = vmax.f32 %v858_v31, %v868_v57  ;;  %v588_v11 = vsel %vm409_vm0, %v585_v25, %v587_v15  ;;  %v6949_v16 = vmax.f32 %v577_v21, %v587_v15 }
  0xf9   :  { %v6928_v5 = vmax.f32 %v6863_v44, %v869_v34  ;;  %v8854_v7 = vrot.slane %v8853_v43, 2  ;;  %v6951_v63 = vmax.f32 %v576_v29, %v588_v11  ;;  %v1753_v29 = vmul.f32 %v7004_v35, %v1749_v20 }
  0xfa   :  { %8855 = vst [vmem:[#allocation10_spill] sm:$0xff] %v6939_v28  ;;  %8856 = vst [vmem:[#allocation12_spill] sm:$0xff] %v6949_v16  ;;  %v1495_v25 = vstv %s5122_s13  ;;  %v1825_v57 = vmul.f32 %v6991_v53, %v1823_v37  ;;  %v1546_v11 = vmul.f32 %v6991_v53, %v1544_v62  ;;  %v1827_v20 = vmul.f32 %v7004_v35, %v1823_v37  ;;  %s5141_s13 = sld [smem:[#allocation6 + $0x4]] }
  0xfb   :  { %v6919_v54 = vpop.permute.xlu0 %1204  ;;  %v6921_v27 = vpop.permute.xlu1 %921  ;;  %603 = vrot.lane.b32.xlu1 %v6914_v30, %s6247_s26  ;;  %601 = vrot.lane.b32.xlu0 %v6916_v6, %s6247_s26  ;;  %8852 = vst [vmem:[#allocation15_spill] sm:$0xff] %v6928_v5  ;;  %8857 = vst [vmem:[#allocation17_spill] sm:$0xff] %v6951_v63  ;;  %v1496_v41 = vmul.f32 %v6965_v12, %v1495_v25  ;;  %v1498_v47 = vmul.f32 %v6978_v33, %v1495_v25  ;;  %v1832_v51 = vrot.slane %v1824_v48, 1 }
  0xfc   :  { %v1497_v4 = vmul.f32 %v6991_v53, %v1495_v25  ;;  %v1499_v34 = vmul.f32 %v7004_v35, %v1495_v25  ;;  %v1855_v25 = vstv %s5134_s0  ;;  %s7533_s0 = sld [smem:[#allocation4 + $0x206]] }
  0xff   :  { %v6930_v26 = vpop.permute.xlu0 %923  ;;  %v6932_v36 = vpop.permute.xlu1 %925  ;;  %886 = vrot.lane.b32.xlu1 %v6928_v5, %s6247_s26  ;;  %1407 = vrot.lane.b32.xlu0 %v8854_v7, %s6248_s10  ;;  %v1545_v7 = vmul.f32 %v6965_v12, %v1544_v62 }
 0x103   :  { %v6942_v60 = vpop.permute.xlu0 %1206  ;;  %v6944_v44 = vpop.permute.xlu1 %1225  ;;  %1128 = vrot.lane.b32.xlu1 %v1120_v59, %s6248_s10  ;;  %888 = vrot.lane.b32.xlu0 %v6939_v28, %s6247_s26  ;;  %v1774_v59 = vstv %s5131_s28  ;;  %s7161_s28 = sld [smem:[#allocation4 + $0x288]] }
 0x104   :  { %v1775_v45 = vmul.f32 %v6965_v12, %v1774_v59  ;;  %v1777_v32 = vmul.f32 %v6978_v33, %v1774_v59  ;;  %v1776_v18 = vmul.f32 %v6991_v53, %v1774_v59  ;;  %v1778_v21 = vmul.f32 %v7004_v35, %v1774_v59 }
 0x105   :  { %v1837_v59 = vrot.slane %v1827_v20, 1 }
 0x107   :  { %v6953_v8 = vpop.permute.xlu0 %1227  ;;  %v6955_v9 = vpop.permute.xlu1 %1229  ;;  %607 = vrot.lane.b32.xlu1 %v6949_v16, %s6247_s26  ;;  %605 = vrot.lane.b32.xlu0 %v6951_v63, %s6247_s26 }
 0x10b   :  { %v6968_v61 = vpop.permute.xlu0 %927  ;;  %v6970_v23 = vpop.permute.xlu1 %946  ;;  %1760 = vrot.lane.b32.xlu1 %v1751_v10, %s6247_s26  ;;  %1758 = vrot.lane.b32.xlu0 %v1750_v56, %s6247_s26  ;;  %v1833_v10 = vrot.slane %v1825_v57, 1  ;;  %v1835_v56 = vrot.slane %v1826_v38, 1  ;;  %v1857_v57 = vmul.f32 %v6991_v53, %v1855_v25 }
 0x10c   :  { %8858 = vst [vmem:[#allocation18_spill] sm:$0xff] %v6968_v61 }
 0x10d   :  { %v1865_v20 = vrot.slane %v1857_v57, 1  ;;  %v1241_v57 = vstv %s5114_s21 }
 0x10e   :  { %v1243_v28 = vmul.f32 %v6991_v53, %v1241_v57 }
 0x10f   :  { %v6981_v55 = vpop.permute.xlu0 %948  ;;  %v6983_v50 = vpop.permute.xlu1 %950  ;;  %1479 = vrot.lane.b32.xlu1 %v1471_v39, %s6247_s26  ;;  %1762 = vrot.lane.b32.xlu0 %v1752_v40, %s6247_s26 }
 0x113   :  { %v6994_v49 = vpop.permute.xlu0 %1231  ;;  %v6996_v52 = vpop.permute.xlu1 %952  ;;  %1483 = vrot.lane.b32.xlu1 %v1473_v42, %s6247_s26  ;;  %1481 = vrot.lane.b32.xlu0 %v1472_v24, %s6247_s26  ;;  %v1553_v42 = vrot.slane %v1545_v7, 1  ;;  %v1554_v24 = vrot.slane %v1546_v11, 1 }
 0x114   :  { %8859 = vst [vmem:[#allocation19_spill] sm:$0xff] %v6994_v49  ;;  %8860 = vst [vmem:[#allocation20_spill] sm:$0xff] %v6996_v52 }
 0x117   :  { %v7007_v17 = vpop.permute.xlu0 %1281  ;;  %v7009_v22 = vpop.permute.xlu1 %1283  ;;  %1783 = vrot.lane.b32.xlu1 %v1775_v45, %s6248_s10  ;;  %1764 = vrot.lane.b32.xlu0 %v1753_v29, %s6247_s26  ;;  %v1836_v45 = vsel %vm409_vm0, %v1833_v10, %v1835_v56  ;;  %v1834_v29 = vsel %vm409_vm0, %v1832_v51, %v1833_v10  ;;  %v1576_v10 = vstv %s5125_s1 }
 0x118   :  { %v1579_v13 = vmul.f32 %v6978_v33, %v1576_v10 }
 0x11a   :  { %v1588_v6 = vrot.slane %v1579_v13, 1 }
 0x11b   :  { %v7015_v58 = vpop.permute.xlu0 %1285  ;;  %v7017_v19 = vpop.permute.xlu1 %1002  ;;  %1787 = vrot.lane.b32.xlu1 %v1777_v32, %s6248_s10  ;;  %1785 = vrot.lane.b32.xlu0 %v1776_v18, %s6248_s10  ;;  %v1547_v32 = vmul.f32 %v6978_v33, %v1544_v62  ;;  %v7055_v18 = vmul.f32 %v7004_v35, %v1544_v62  ;;  %v1858_v62 = vmul.f32 %v6978_v33, %v1855_v25 }
 0x11d   :  { %v1556_v37 = vrot.slane %v1547_v32, 1  ;;  %v1577_v32 = vmul.f32 %v6965_v12, %v1576_v10 }
 0x11f   :  { %v7023_v31 = vpop.permute.xlu0 %1004  ;;  %v7025_v2 = vpop.permute.xlu1 %1006  ;;  %1504 = vrot.lane.b32.xlu1 %v1496_v41, %s6248_s10  ;;  %1485 = vrot.lane.b32.xlu0 %v1474_v14, %s6247_s26  ;;  %v1555_v41 = vsel %vm409_vm0, %v1553_v42, %v1554_v24  ;;  %v1838_v14 = vsel %vm409_vm0, %v1835_v56, %v1837_v59  ;;  %v1557_v7 = vsel %vm409_vm0, %v1554_v24, %v1556_v37  ;;  %v1181_v56 = vstv %s5111_s18 }
 0x120   :  { %v1185_v63 = vmul.f32 %v7004_v35, %v1181_v56 }
 0x123   :  { %v7036_v15 = vpop.permute.xlu0 %1287  ;;  %v7038_v43 = vpop.permute.xlu1 %1313  ;;  %1508 = vrot.lane.b32.xlu1 %v1498_v47, %s6248_s10  ;;  %1506 = vrot.lane.b32.xlu0 %v1497_v4, %s6248_s10  ;;  %v8802_v47 = vrot.slane %v7055_v18, 1  ;;  %v1856_v4 = vmul.f32 %v6965_v12, %v1855_v25 }
 0x124   :  { %8861 = vst [vmem:[#allocation21_spill] sm:$0xff] %v7036_v15 }
 0x125   :  { %v1864_v11 = vrot.slane %v1856_v4, 1  ;;  %v1186_v4 = vstv %s5140_s20 }
 0x126   :  { %v7138_v15 = vadd.f32 %v1186_v4, %v1185_v63 }
 0x127   :  { %v7045_v39 = vpop.permute.xlu0 %1315  ;;  %v7047_v40 = vpop.permute.xlu1 %1317  ;;  %1510 = vrot.lane.b32.xlu1 %v1499_v34, %s6248_s10  ;;  %1789 = vrot.lane.b32.xlu0 %v1778_v21, %s6248_s10  ;;  %v7072_v34 = vmul.f32 %v7004_v35, %v1855_v25  ;;  %v1559_v21 = vsel %vm409_vm0, %v1556_v37, %v8802_v47  ;;  %v1866_v24 = vsel %vm409_vm0, %v1864_v11, %v1865_v20  ;;  %v902_v37 = vstv %s5102_s19 }
 0x128   :  { %v1578_v25 = vmul.f32 %v6991_v53, %v1576_v10  ;;  %v7104_v47 = vmul.f32 %v7004_v35, %v1576_v10  ;;  %v904_v10 = vmul.f32 %v6991_v53, %v902_v37 }
 0x12a   :  { %v1586_v11 = vrot.slane %v1578_v25, 1  ;;  %v1242_v25 = vmul.f32 %v6965_v12, %v1241_v57  ;;  %v1590_v30 = vrot.slane %v7104_v47, 1 }
 0x12b   :  { %1841 = vrot.lane.b32.xlu1 %v1836_v45, %s6247_s26  ;;  %1839 = vrot.lane.b32.xlu0 %v1834_v29, %s6247_s26  ;;  %v7064_v38 = vpop.permute.xlu0 %1008  ;;  %v7066_v48 = vpop.permute.xlu1 %1034  ;;  %v1867_v45 = vrot.slane %v1858_v62, 1  ;;  %v8805_v29 = vrot.slane %v7072_v34, 1 }
 0x12c   :  { %8862 = vst [vmem:[#allocation22_spill] sm:$0xff] %v7064_v38  ;;  %8863 = vst [vmem:[#allocation23_spill] sm:$0xff] %v7066_v48  ;;  %v1250_v47 = vrot.slane %v1242_v25, 1  ;;  %v1591_v1 = vsel %vm409_vm0, %v1588_v6, %v1590_v30  ;;  %v1632_v25 = vstv %s7106_s25 }
 0x12d   :  { %v1870_v62 = vsel %vm409_vm0, %v1867_v45, %v8805_v29 }
 0x12f   :  { %1560 = vrot.lane.b32.xlu1 %v1555_v41, %s6247_s26  ;;  %1843 = vrot.lane.b32.xlu0 %v1838_v14, %s6247_s26  ;;  %v7080_v51 = vpop.permute.xlu0 %1036  ;;  %v7082_v42 = vpop.permute.xlu1 %1038  ;;  %v1182_v41 = vmul.f32 %v6965_v12, %v1181_v56  ;;  %v1183_v14 = vmul.f32 %v6991_v53, %v1181_v56 }
 0x130   :  { %8864 = vst [vmem:[#allocation24_spill] sm:$0xff] %v7080_v51  ;;  %8865 = vst [vmem:[#allocation25_spill] sm:$0xff] %v7082_v42 }
 0x133   :  { %1564 = vrot.lane.b32.xlu1 %v1559_v21, %s6247_s26  ;;  %1562 = vrot.lane.b32.xlu0 %v1557_v7, %s6247_s26  ;;  %v1868_v21 = vsel %vm409_vm0, %v1865_v20, %v1867_v45  ;;  %v1585_v7 = vrot.slane %v1577_v32, 1  ;;  %v7111_v16 = vpop.permute.xlu0 %1319  ;;  %v7113_v29 = vpop.permute.xlu1 %1040  ;;  %v7115_v20 = vadd.f32 %v1186_v4, %v1182_v41  ;;  %v1188_v45 = vadd.f32 %v1186_v4, %v1183_v14 }
 0x134   :  { %8866 = vst [vmem:[#allocation26_spill] sm:$0xff] %v7111_v16  ;;  %8867 = vst [vmem:[#allocation27_spill] sm:$0xff] %v7113_v29  ;;  %v7118_v32 = vstv %s7078_s22  ;;  %v1911_v41 = vstv %s7087_s23  ;;  %v7130_v14 = vmul.f32 %v7004_v35, %v1241_v57  ;;  %v905_v16 = vmul.f32 %v6978_v33, %v902_v37 }
 0x135   :  { %v1587_v5 = vsel %vm409_vm0, %v1585_v7, %v1586_v11  ;;  %v1912_v7 = vmul.f32 %v6965_v12, %v1911_v41  ;;  %v7147_v13 = vadd.f32 %v7118_v32, %v904_v10  ;;  %v1589_v10 = vsel %vm409_vm0, %v1586_v11, %v1588_v6 }
 0x136   :  { %8868 = vst [vmem:[#allocation28_spill] sm:$0xff] %v7130_v14  ;;  %v1213_v11 = vadd.f32 %v6912_v0, %v1188_v45 }
 0x137   :  { %1871 = vrot.lane.b32.xlu1 %v1866_v24, %s6248_s10  ;;  %1845 = vrot.lane.b32.xlu0 %v1837_v59, %s6247_s26  ;;  %v1184_v24 = vmul.f32 %v6978_v33, %v1181_v56  ;;  %v903_v59 = vmul.f32 %v6965_v12, %v902_v37  ;;  %v1244_v56 = vmul.f32 %v6978_v33, %v1241_v57  ;;  %v7149_v52 = vpop.permute.xlu0 %1369  ;;  %v7151_v63 = vpop.permute.xlu1 %1371  ;;  %v1920_v51 = vrot.slane %v1912_v7, 2 }
 0x138   :  { %v7143_v57 = vmul.f32 %v6978_v33, %v1911_v41  ;;  %v7186_v7 = vmul.f32 %v7004_v35, %v1911_v41 }
 0x139   :  { %v1189_v29 = vadd.f32 %v1186_v4, %v1184_v24  ;;  %v7135_v38 = vadd.f32 %v7118_v32, %v903_v59  ;;  %v1251_v24 = vrot.slane %v1243_v28, 1  ;;  %v1253_v59 = vrot.slane %v1244_v56, 1 }
 0x13a   :  { %v8869_v4 = vrot.slane %v7055_v18, 1  ;;  %v7164_v28 = vadd.f32 %v7118_v32, %v905_v16  ;;  %v7167_v56 = vmul.f32 %v7004_v35, %v902_v37  ;;  %v1923_v46 = vrot.slane %v7143_v57, 2 }
 0x13b   :  { %1875 = vrot.lane.b32.xlu1 %v1870_v62, %s6248_s10  ;;  %1873 = vrot.lane.b32.xlu0 %v1868_v21, %s6248_s10  ;;  %v962_v62 = vstv %s7094_s24  ;;  %v1913_v21 = vmul.f32 %v6991_v53, %v1911_v41  ;;  %v7174_v6 = vsel %vm409_vm0, %v1250_v47, %v1251_v24  ;;  %v1633_v16 = vmul.f32 %v6965_v12, %v1632_v25  ;;  %v7194_v48 = vpop.permute.xlu0 %1373  ;;  %v7196_v0 = vpop.permute.xlu1 %1090 }
 0x13c   :  { %v964_v18 = vmul.f32 %v6991_v53, %v962_v62  ;;  %v1634_v37 = vmul.f32 %v6991_v53, %v1632_v25  ;;  %v1254_v49 = vsel %vm409_vm0, %v1251_v24, %v1253_v59  ;;  %8871 = vst [vmem:[#allocation29_spill] sm:$0xff] %v7196_v0  ;;  %v1214_v45 = vadd.f32 %v6919_v54, %v1189_v29 }
 0x13d   :  { %v1921_v42 = vrot.slane %v1913_v21, 2  ;;  %v8870_v21 = vrot.slane %v7130_v14, 1  ;;  %v1635_v14 = vmul.f32 %v6978_v33, %v1632_v25  ;;  %v7208_v0 = vmul.f32 %v7004_v35, %v1632_v25 }
 0x13e   :  { %v972_v61 = vrot.slane %v964_v18, 1  ;;  %v1641_v18 = vrot.slane %v1633_v16, 2  ;;  %v1212_v54 = vadd.f32 %v6908_v3, %v7115_v20  ;;  %v1238_v29 = vadd.f32 %v6953_v8, %v1213_v11 }
 0x13f   :  { %1592 = vrot.lane.b32.xlu1 %v1587_v5, %s6248_s10  ;;  %1566 = vrot.lane.b32.xlu0 %v8869_v4, %s6247_s26  ;;  %v963_v5 = vmul.f32 %v6965_v12, %v962_v62  ;;  %v1329_v4 = vstv %s7121_s27  ;;  %v1256_v57 = vsel %vm409_vm0, %v1253_v59, %v8870_v21  ;;  %v1924_v41 = vsel %vm498_vm1, %v1921_v42, %v1923_v46  ;;  %v7232_v11 = vpop.permute.xlu0 %1092 }
 0x140   :  { %v1332_v24 = vmul.f32 %v6978_v33, %v1329_v4  ;;  %v1922_v59 = vsel %vm498_vm1, %v1920_v51, %v1921_v42  ;;  %v1642_v21 = vrot.slane %v1634_v37, 2  ;;  %v8813_v51 = vrot.slane %v7186_v7, 2  ;;  %8873 = vst [vmem:[#allocation30_spill] sm:$0xff] %v7232_v11 }
 0x141   :  { %v971_v47 = vrot.slane %v963_v5, 1  ;;  %v8872_v5 = vrot.slane %v7072_v34, 1  ;;  %v1943_v42 = vstv %s7161_s28  ;;  %v7222_v16 = vmul.f32 %v7004_v35, %v962_v62 }
 0x142   :  { %v7225_v25 = vmul.f32 %v7004_v35, %v1329_v4  ;;  %v1239_v3 = vadd.f32 %v6955_v9, %v1214_v45  ;;  %v1330_v8 = vmul.f32 %v6965_v12, %v1329_v4  ;;  %v1341_v37 = vrot.slane %v1332_v24, 2 }
 0x143   :  { %1596 = vrot.lane.b32.xlu1 %v1591_v1, %s6248_s10  ;;  %1594 = vrot.lane.b32.xlu0 %v1589_v10, %s6248_s10  ;;  %v7189_v1 = vmul.f32 %v6978_v33, %v962_v62  ;;  %v7192_v10 = vmul.f32 %v6991_v53, %v1329_v4  ;;  %v1644_v62 = vrot.slane %v1635_v14, 2  ;;  %v1945_v9 = vmul.f32 %v6991_v53, %v1943_v42 }
 0x144   :  { %v1237_v4 = vadd.f32 %v6944_v44, %v1212_v54  ;;  %v1262_v45 = vadd.f32 %v1254_v49, %v1238_v29  ;;  %v1926_v24 = vsel %vm498_vm1, %v1923_v46, %v8813_v51  ;;  %v1263_v44 = vadd.f32 %v1256_v57, %v1239_v3 }
 0x145   :  { %v974_v34 = vrot.slane %v7189_v1, 1  ;;  %v1339_v20 = vrot.slane %v7192_v10, 2  ;;  %v1643_v10 = vsel %vm498_vm1, %v1641_v18, %v1642_v21  ;;  %v7252_v1 = vmul.f32 %v7004_v35, %v1943_v42 }
 0x146   :  { %v1338_v18 = vrot.slane %v1330_v8, 2  ;;  %v8875_v46 = vrot.slane %v7208_v0, 2  ;;  %v1645_v29 = vsel %vm498_vm1, %v1642_v21, %v1644_v62  ;;  %v1261_v14 = vadd.f32 %v7174_v6, %v1237_v4 }
 0x147   :  { %1598 = vrot.lane.b32.xlu1 %v1590_v30, %s6248_s10  ;;  %1877 = vrot.lane.b32.xlu0 %v8872_v5, %s6248_s10  ;;  %v7218_v30 = vsel %vm409_vm0, %v971_v47, %v972_v61  ;;  %v7234_v47 = vpop.permute.xlu1 %1094  ;;  %v1944_v5 = vmul.f32 %v6965_v12, %v1943_v42  ;;  %v1342_v54 = vsel %vm498_vm1, %v1339_v20, %v1341_v37  ;;  %v1664_v8 = vstv %s7215_s29 }
 0x148   :  { %8874 = vst [vmem:[#allocation31_spill] sm:$0xff] %v7234_v47  ;;  %v1294_v57 = vadd.f32 %v7009_v22, %v1262_v45  ;;  %v1295_v3 = vadd.f32 %v7015_v58, %v1263_v44  ;;  %v8876_v49 = vrot.slane %v7225_v25, 2  ;;  %v7270_v47 = vpop.permute.xlu0 %1375  ;;  %v1957_v21 = vrot.slane %v7252_v1, 2 }
 0x149   :  { %v1952_v51 = vrot.slane %v1944_v5, 2  ;;  %v1293_v6 = vadd.f32 %v7007_v17, %v1261_v14  ;;  %v935_v5 = vadd.f32 %v6932_v36, %v7164_v28  ;;  %v8877_v4 = vrot.slane %v7222_v16, 1 }
 0x14a   :  { %v1326_v22 = vadd.f32 %v7045_v39, %v1294_v57  ;;  %v1327_v58 = vadd.f32 %v7047_v40, %v1295_v3  ;;  %v1340_v39 = vsel %vm498_vm1, %v1338_v18, %v1339_v20  ;;  %v934_v36 = vadd.f32 %v6930_v26, %v7147_v13 }
 0x14b   :  { %1929 = vrot.lane.b32.xlu1 %v1924_v41, %s6247_s26  ;;  %1927 = vrot.lane.b32.xlu0 %v1922_v59, %s6247_s26  ;;  %v7247_v41 = vsel %vm409_vm0, %v972_v61, %v974_v34  ;;  %v1946_v59 = vmul.f32 %v6978_v33, %v1943_v42  ;;  %v1647_v61 = vsel %vm498_vm1, %v1644_v62, %v8875_v46  ;;  %v1953_v42 = vrot.slane %v1945_v9, 2  ;;  %v1402_v11 = vpop.permute.xlu1 %1401 }
 0x14c   :  { %v933_v62 = vadd.f32 %v6921_v27, %v7135_v38  ;;  %v1666_v9 = vmul.f32 %v6991_v53, %v1664_v8  ;;  %v977_v27 = vsel %vm409_vm0, %v974_v34, %v8877_v4  ;;  %v1325_v17 = vadd.f32 %v7038_v43, %v1293_v6 }
 0x14d   :  { %v1955_v46 = vrot.slane %v1946_v59, 2  ;;  %v1954_v40 = vsel %vm498_vm1, %v1952_v51, %v1953_v42  ;;  %v1350_v14 = vadd.f32 %v1342_v54, %v1326_v22  ;;  %v960_v51 = vadd.f32 %v6983_v50, %v935_v5  ;;  %v1404_v59 = vpop.permute.xlu0 %1403 }
 0x14e   :  { %v958_v34 = vadd.f32 %v6970_v23, %v933_v62  ;;  %v8878_v26 = vrot.slane %v7186_v7, 2  ;;  %v1667_v18 = vmul.f32 %v6978_v33, %v1664_v8  ;;  %v959_v50 = vadd.f32 %v6981_v55, %v934_v36  ;;  %v8883_v36 = vld [vmem:[#allocation24_spill] sm:$0xff] }
 0x14f   :  { %1648 = vrot.lane.b32.xlu1 %v1643_v10, %s6247_s26  ;;  %1931 = vrot.lane.b32.xlu0 %v1926_v24, %s6247_s26  ;;  %v1344_v10 = vsel %vm498_vm1, %v1341_v37, %v8876_v49  ;;  %v1050_v24 = vstv %s7227_s30  ;;  %v1665_v37 = vmul.f32 %v6965_v12, %v1664_v8  ;;  %v1958_v45 = vsel %vm498_vm1, %v1955_v46, %v1957_v21  ;;  %v1406_v44 = vpop.permute.xlu1 %1405 }
 0x150   :  { %v1051_v38 = vmul.f32 %v6965_v12, %v1050_v24  ;;  %v7294_v28 = vmul.f32 %v6991_v53, %v1050_v24  ;;  %v1351_v43 = vadd.f32 %v1344_v10, %v1327_v58  ;;  %v1956_v20 = vsel %vm498_vm1, %v1953_v42, %v1955_v46 }
 0x151   :  { %v1673_v13 = vrot.slane %v1665_v37, 2  ;;  %v1674_v49 = vrot.slane %v1666_v9, 2  ;;  %v1382_v23 = vadd.f32 %v7151_v63, %v1350_v14  ;;  %v1053_v7 = vmul.f32 %v6978_v33, %v1050_v24 }
 0x152   :  { %v1383_v54 = vadd.f32 %v7194_v48, %v1351_v43  ;;  %v1059_v42 = vrot.slane %v1051_v38, 2  ;;  %v1060_v57 = vrot.slane %v7294_v28, 2  ;;  %v982_v3 = vadd.f32 %v7218_v30, %v958_v34  ;;  %v8884_v28 = vld [vmem:[#allocation25_spill] sm:$0xff] }
 0x153   :  { %1652 = vrot.lane.b32.xlu1 %v1647_v61, %s6247_s26  ;;  %1650 = vrot.lane.b32.xlu0 %v1645_v29, %s6247_s26  ;;  %v1349_v61 = vadd.f32 %v1340_v39, %v1325_v17  ;;  %v7310_v29 = vmul.f32 %v7004_v35, %v1664_v8  ;;  %v1414_v46 = vadd.f32 %v1404_v59, %v1382_v23  ;;  %v1676_v6 = vrot.slane %v1667_v18, 2  ;;  %v8882_v39 = vld [vmem:[#allocation19_spill] sm:$0xff]  ;;  %v8886_v59 = vld [vmem:[#allocation14_spill] sm:$0xff]  ;;  %v8887_v18 = vld [vmem:[#allocation20_spill] sm:$0xff] }
 0x154   :  { %v7317_v62 = vadd.f32 %v1406_v44, %v1383_v54  ;;  %v984_v63 = vadd.f32 %v977_v27, %v960_v51  ;;  %v7320_v48 = vmul.f32 %v7004_v35, %v1050_v24  ;;  %v1675_v8 = vsel %vm498_vm1, %v1673_v13, %v1674_v49  ;;  %v8888_v23 = vld [vmem:[#allocation28_spill] sm:$0xff] }
 0x155   :  { %v1381_v10 = vadd.f32 %v7149_v52, %v1349_v61  ;;  %v1678_v22 = vrot.slane %v7310_v29, 2  ;;  %v1215_v52 = vadd.f32 %v6942_v60, %v7138_v15  ;;  %v911_v30 = vadd.f32 %v7118_v32, %v7167_v56  ;;  %v8880_v15 = vld [vmem:[#allocation23_spill] sm:$0xff] }
 0x156   :  { %v983_v58 = vadd.f32 %v7247_v41, %v959_v50  ;;  %v1061_v24 = vsel %vm498_vm1, %v1059_v42, %v1060_v57  ;;  %v1014_v5 = vadd.f32 %v7017_v19, %v982_v3  ;;  %v1062_v37 = vrot.slane %v1053_v7, 2  ;;  %v8881_v41 = vld [vmem:[#allocation18_spill] sm:$0xff] }
 0x157   :  { %1959 = vrot.lane.b32.xlu1 %v1954_v40, %s6248_s10  ;;  %1933 = vrot.lane.b32.xlu0 %v8878_v26, %s6247_s26  ;;  %v1413_v55 = vadd.f32 %v1402_v11, %v1381_v10  ;;  %v1422_v9 = vrot.slane %v1414_v46, 1  ;;  %v1424_v11 = vrot.slane %v7317_v62, 1  ;;  %v1016_v27 = vadd.f32 %v7025_v2, %v984_v63  ;;  %v8890_v10 = vld [vmem:[#allocation29_spill] sm:$0xff] }
 0x158   :  { %v1015_v4 = vadd.f32 %v7023_v31, %v983_v58  ;;  %v1064_v17 = vrot.slane %v7320_v48, 2  ;;  %v8879_v60 = vrot.slane %v7208_v0, 2  ;;  %v1046_v32 = vadd.f32 %v8880_v15, %v1014_v5  ;;  %v8892_v58 = vld [vmem:[#allocation30_spill] sm:$0xff]  ;;  %v8893_v5 = vld [vmem:[#allocation31_spill] sm:$0xff] }
 0x159   :  { %v1421_v19 = vrot.slane %v1413_v55, 1  ;;  %v1679_v56 = vsel %vm498_vm1, %v1676_v6, %v1678_v22  ;;  %v1677_v31 = vsel %vm498_vm1, %v1674_v49, %v1676_v6  ;;  %v936_v2 = vadd.f32 %v8881_v41, %v911_v30 }
 0x15a   :  { %v1240_v40 = vadd.f32 %v8882_v39, %v1215_v52  ;;  %v1047_v38 = vadd.f32 %v8883_v36, %v1015_v4  ;;  %v1425_v43 = vsel %vm409_vm0, %v1422_v9, %v1424_v11  ;;  %v1063_v26 = vsel %vm498_vm1, %v1060_v57, %v1062_v37  ;;  %v8891_v52 = vld [vmem:[#allocation21_spill] sm:$0xff]  ;;  %v8895_v4 = vld [vmem:[#allocation26_spill] sm:$0xff] }
 0x15b   :  { %1963 = vrot.lane.b32.xlu1 %v1958_v45, %s6248_s10  ;;  %1961 = vrot.lane.b32.xlu0 %v1956_v20, %s6248_s10  ;;  %v1048_v45 = vadd.f32 %v8884_v28, %v1016_v27  ;;  %v1423_v14 = vsel %vm409_vm0, %v1421_v19, %v1422_v9  ;;  %v8885_v20 = vld [vmem:[#allocation11_spill] sm:$0xff]  ;;  %v1065_v13 = vsel %vm498_vm1, %v1062_v37, %v1064_v17  ;;  %v8889_v54 = vrot.slane %v8888_v23, 1 }
 0x15c   :  { %v1070_v49 = vadd.f32 %v1061_v24, %v1046_v32  ;;  %v961_v61 = vadd.f32 %v8887_v18, %v936_v2  ;;  %v7367_v7 = vmax.f32 %v1414_v46, %v1425_v43  ;;  %v7369_v3 = vmax.f32 %v1413_v55, %v1423_v14  ;;  %v8903_v23 = vld [vmem:[#allocation15_spill] sm:$0xff] }
 0x15d   :  { %v1264_v50 = vadd.f32 %v8889_v54, %v1240_v40  ;;  %v1072_v6 = vadd.f32 %v1065_v13, %v1048_v45  ;;  %v8894_v55 = vrot.slane %v7222_v16, 1  ;;  %v8897_v16 = vld [vmem:[#allocation27_spill] sm:$0xff]  ;;  %v8898_v45 = vrot.slane %v7225_v25, 2 }
 0x15e   :  { %v1102_v63 = vadd.f32 %v8890_v10, %v1070_v49  ;;  %v8814_v25 = vmov 0  }
 0x15f   :  { %1680 = vrot.lane.b32.xlu1 %v1675_v8, %s6248_s10  ;;  %1654 = vrot.lane.b32.xlu0 %v8879_v60, %s6247_s26  ;;  %v1071_v8 = vadd.f32 %v1063_v26, %v1047_v38  ;;  %v1296_v30 = vadd.f32 %v8891_v52, %v1264_v50  ;;  %v1104_v37 = vadd.f32 %v8893_v5, %v1072_v6  ;;  %v8905_v6 = vld [vmem:[#allocation10_spill] sm:$0xff] }
 0x160   :  { %v985_v9 = vadd.f32 %v8894_v55, %v961_v61  ;;  %2115 = vmatprep.mubr.bf16.mxu0 %v8814_v25  ;;  %v8909_v55 = vld [vmem:[#allocation17_spill] sm:$0xff] }
 0x161   :  { %v883_v0 = vpop.permute.xlu0 %882  ;;  %v885_v34 = vpop.permute.xlu1 %884  ;;  %v1103_v24 = vadd.f32 %v8892_v58, %v1071_v8  ;;  %v1328_v27 = vadd.f32 %v8895_v4, %v1296_v30 }
 0x162   :  { %v894_v51 = vmax.f32 %v8885_v20, %v883_v0  ;;  %v895_v44 = vmax.f32 %v8886_v59, %v885_v34 }
 0x163   :  { %1684 = vrot.lane.b32.xlu1 %v1679_v56, %s6248_s10  ;;  %1682 = vrot.lane.b32.xlu0 %v1677_v31, %s6248_s10  ;;  %v8896_v56 = vld [vmem:[#allocation22_spill] sm:$0xff]  ;;  %v1352_v0 = vadd.f32 %v8898_v45, %v1328_v27  ;;  %v6251_v27 = vmov 65535  }
 0x164   :  { %898 = vst.msk [vmem:[#allocation2 + $0x8] sm:$0xff] %vm617_vm2, %v894_v51  ;;  %899 = vst.msk [vmem:[#allocation2 + $0x38] sm:$0xff] %vm617_vm2, %v895_v44  ;;  %v1017_v31 = vadd.f32 %v8896_v56, %v985_v9  ;;  %v8899_v51 = vld [vmem:[#allocation16_spill] sm:$0xff] }
 0x165   :  { %v1097_v42 = vpop.permute.xlu0 %1096  ;;  %v1123_v57 = vpop.permute.xlu1 %1122  ;;  %v1384_v13 = vadd.f32 %v7270_v47, %v1352_v0 }
 0x166   :  { %v1134_v46 = vadd.f32 %v1123_v57, %v1102_v63  ;;  %v1049_v28 = vadd.f32 %v8897_v16, %v1017_v31 }
 0x167   :  { %1442 = vrot.lane.b32.xlu1 %v7367_v7, %s6247_s26  ;;  %1440 = vrot.lane.b32.xlu0 %v7369_v3, %s6247_s26 }
 0x168   :  { %v1142_v39 = vrot.slane %v1134_v46, 1  ;;  %v1073_v61 = vadd.f32 %v1064_v17, %v1049_v28 }
 0x169   :  { %v1125_v60 = vpop.permute.xlu0 %1124  ;;  %v1127_v15 = vpop.permute.xlu1 %1126 }
 0x16a   :  { %v1135_v32 = vadd.f32 %v1125_v60, %v1103_v24  ;;  %v1136_v19 = vadd.f32 %v1127_v15, %v1104_v37  ;;  %v1105_v50 = vadd.f32 %v1097_v42, %v1073_v61  ;;  %v2063_v60 = vsel %vm498_vm1, 4294967295, %v6251_v27 }
 0x16b   :  { %1965 = vrot.lane.b32.xlu0 %v1957_v21, %s6248_s10  ;;  %v2019_v41 = vld [vmem:[#allocation2 + $0x8] sm:$0xff]  ;;  %v2025_v2 = vld [vmem:[#allocation2 + $0x38] sm:$0xff]  ;;  %v7445_v31 = vsel %vm409_vm0, %v2063_v60, 0 }
 0x16c   :  { %v1143_v40 = vrot.slane %v1135_v32, 1  ;;  %v1145_v36 = vrot.slane %v1136_v19, 1  ;;  %v2043_v38 = vpack.c.bf16 %v2025_v2, %v2019_v41  ;;  %v8900_v21 = vld [vmem:[#allocation13_spill] sm:$0xff]  ;;  %8911 = vst [vmem:[#allocation14_spill] sm:$0xff] %v7445_v31 }
 0x16d   :  { %v604_v34 = vpop.permute.xlu1 %603  ;;  %v602_v14 = vpop.permute.xlu0 %601 }
 0x16e   :  { %v1144_v43 = vsel %vm409_vm0, %v1142_v39, %v1143_v40  ;;  %v1146_v20 = vsel %vm409_vm0, %v1143_v40, %v1145_v36  ;;  %v614_v1 = vmax.f32 %v8899_v51, %v604_v34  ;;  %v613_v59 = vmax.f32 %v8900_v21, %v602_v14  ;;  %2083 = vmatprep.subr.bf16.mxu0 %v2043_v38  ;;  %v7460_v34 = vld [vmem:[%s8790_s3] sm:$0xff]   ;;  %s5129_s3 = sld [smem:[#allocation4 + $0x280]] }
 0x16f   :  { %v7393_v44 = vmax.f32 %v1134_v46, %v1144_v43  ;;  %v7395_v26 = vmax.f32 %v1135_v32, %v1146_v20  ;;  %8912 = vst [vmem:[#allocation20_spill] sm:$0xff] %v7460_v34 }
 0x170   :  { %619 = vst.msk [vmem:[#allocation2 + $0x30] sm:$0xff] %vm617_vm2, %v614_v1  ;;  %618 = vst.msk [vmem:[#allocation2] sm:$0xff] %vm617_vm2, %v613_v59  ;;  %v7474_v59 = vstv %s5141_s13 }
 0x171   :  { %8901 = vst [vmem:[#allocation23_spill] sm:$0xff] %v7393_v44  ;;  %8902 = vst [vmem:[#allocation18_spill] sm:$0xff] %v7395_v26  ;;  %1161 = vrot.lane.b32.xlu1 %v7393_v44, %s6247_s26  ;;  %v887_v49 = vpop.permute.xlu1 %886  ;;  %1163 = vrot.lane.b32.xlu0 %v7395_v26, %s6247_s26  ;;  %v1408_v18 = vpop.permute.xlu0 %1407 }
 0x172   :  { %v896_v47 = vmax.f32 %v8903_v23, %v887_v49  ;;  %v1416_v54 = vadd.f32 %v1408_v18, %v1384_v13 }
 0x174   :  { %900 = vst.msk [vmem:[#allocation2 + $0x68] sm:$0xff] %vm617_vm2, %v896_v47  ;;  %v1426_v57 = vrot.slane %v1416_v54, 1 }
 0x175   :  { %1686 = vrot.lane.b32.xlu1 %v1678_v22, %s6248_s10  ;;  %v1129_v10 = vpop.permute.xlu1 %1128  ;;  %v889_v63 = vpop.permute.xlu0 %888  ;;  %s5120_s10 = sld [smem:[#allocation4 + $0x200]] }
 0x176   :  { %v1427_v8 = vsel %vm409_vm0, %v1424_v11, %v1426_v57  ;;  %v7415_v48 = vmax.f32 %v1416_v54, %v1426_v57  ;;  %v1137_v17 = vadd.f32 %v1129_v10, %v1105_v50  ;;  %v897_v52 = vmax.f32 %v8905_v6, %v889_v63 }
 0x177   :  { %v7419_v42 = vmax.f32 %v7317_v62, %v1427_v8  ;;  %v2018_v30 = vld [vmem:[#allocation2] sm:$0xff]  ;;  %v2024_v58 = vld [vmem:[#allocation2 + $0x30] sm:$0xff] }
 0x178   :  { %8904 = vst [vmem:[#allocation19_spill] sm:$0xff] %v7415_v48  ;;  %v1147_v24 = vrot.slane %v1137_v17, 1  ;;  %901 = vst.msk [vmem:[#allocation2 + $0x98] sm:$0x1f] %vm621_vm3, %v897_v52  ;;  %v2042_v29 = vpack.c.bf16 %v2024_v58, %v2018_v30  ;;  %v8908_v62 = vld [vmem:[#allocation12_spill] sm:$0xff] }
 0x179   :  { %8906 = vst [vmem:[#allocation24_spill] sm:$0xff] %v7419_v42  ;;  %v608_v22 = vpop.permute.xlu1 %607  ;;  %1446 = vrot.lane.b32.xlu1 %v7415_v48, %s6247_s26  ;;  %1444 = vrot.lane.b32.xlu0 %v7419_v42, %s6247_s26  ;;  %v606_v11 = vpop.permute.xlu0 %605 }
 0x17a   :  { %v1148_v5 = vsel %vm409_vm0, %v1145_v36, %v1147_v24  ;;  %v7427_v37 = vmax.f32 %v1137_v17, %v1147_v24  ;;  %v616_v46 = vmax.f32 %v8908_v62, %v608_v22  ;;  %v615_v9 = vmax.f32 %v8909_v55, %v606_v11  ;;  %2084 = vmatpush1.bf16.msra.mxu0 %v2042_v29 }
 0x17b   :  { %v7431_v4 = vmax.f32 %v1136_v19, %v1148_v5  ;;  %v2031_v56 = vld [vmem:[#allocation2 + $0x68] sm:$0xff]  ;;  %v1460_v20 = vstv %s5120_s10  ;;  %v1739_v22 = vstv %s5129_s3  ;;  %v1799_v11 = vstv %s5132_s14 }
 0x17c   :  { %8907 = vst [vmem:[#allocation25_spill] sm:$0xff] %v7427_v37  ;;  %622 = vst.msk [vmem:[#allocation2 + $0x90] sm:$0x1f] %vm621_vm3, %v616_v46  ;;  %v1464_v21 = vmul.f32 %v7004_v35, %v1460_v20  ;;  %v1740_v5 = vmul.f32 %v6965_v12, %v1739_v22  ;;  %v7512_v55 = vstv %s5142_s15  ;;  %v1800_v27 = vmul.f32 %v6965_v12, %v1799_v11 }
 0x17d   :  { %8910 = vst [vmem:[#allocation11_spill] sm:$0xff] %v7431_v4  ;;  %620 = vst.msk [vmem:[#allocation2 + $0x60] sm:$0xff] %vm617_vm2, %v615_v9  ;;  %v7436_v15 = vpop.permute.xlu1 %1760  ;;  %1167 = vrot.lane.b32.xlu1 %v7427_v37, %s6247_s26  ;;  %1165 = vrot.lane.b32.xlu0 %v7431_v4, %s6247_s26  ;;  %v7442_v32 = vpop.permute.xlu0 %1758  ;;  %v1801_v9 = vmul.f32 %v6991_v53, %v1799_v11  ;;  %v1741_v60 = vmul.f32 %v6991_v53, %v1739_v22 }
 0x17e   :  { %v1469_v18 = vadd.f32 %v7474_v59, %v1464_v21  ;;  %v1887_v21 = vstv %s5135_s17 }
 0x17f   :  { %v2037_v19 = vld [vmem:[#allocation2 + $0x98] sm:$0x1f] }
 0x180   :  { %v2049_v41 = vpack.c.bf16 %v2037_v19, %v2031_v56  ;;  %v1742_v56 = vmul.f32 %v6978_v33, %v1739_v22  ;;  %v1520_v19 = vstv %s5123_s16 }
 0x181   :  { %v7447_v2 = vpop.permute.xlu1 %1479  ;;  %v7449_v39 = vpop.permute.xlu0 %1762  ;;  %v1523_v44 = vmul.f32 %v6978_v33, %v1520_v19 }
 0x182   :  { %v2069_v40 = vand.u32 %v7445_v31, %v2049_v41  ;;  %v1745_v41 = vadd.f32 %v7512_v55, %v1740_v5  ;;  %v1747_v5 = vadd.f32 %v7512_v55, %v1742_v56 }
 0x183   :  { %v2036_v38 = vld [vmem:[#allocation2 + $0x90] sm:$0x1f] }
 0x184   :  { %v2030_v36 = vld [vmem:[#allocation2 + $0x60] sm:$0xff]  ;;  %2085 = vmatprep.subr.bf16.mxu0 %v2069_v40  ;;  %v1770_v4 = vadd.f32 %v7442_v32, %v1745_v41  ;;  %v7555_v32 = vmul.f32 %v7004_v35, %v1520_v19 }
 0x185   :  { %v2048_v16 = vpack.c.bf16 %v2036_v38, %v2030_v36  ;;  %v7452_v28 = vpop.permute.xlu1 %1483  ;;  %v7454_v45 = vpop.permute.xlu0 %1481  ;;  %v1802_v38 = vmul.f32 %v6978_v33, %v1799_v11 }
 0x187   :  { %v2066_v0 = vand.u32 %v7445_v31, %v2048_v16  ;;  %v1809_v16 = vrot.slane %v1801_v9, 1  ;;  %v1463_v9 = vmul.f32 %v6978_v33, %v1460_v20  ;;  %v7542_v31 = vmul.f32 %v6991_v53, %v1887_v21 }
 0x188   :  { %v1811_v56 = vrot.slane %v1802_v38, 1 }
 0x189   :  { %2086 = vmatpush1.bf16.msra.mxu0 %v2066_v0  ;;  %v7462_v14 = vpop.permute.xlu1 %1783  ;;  %v7464_v43 = vpop.permute.xlu0 %1764  ;;  %v1808_v0 = vrot.slane %v1800_v27, 1 }
 0x18b   :  { %v1810_v37 = vsel %vm409_vm0, %v1808_v0, %v1809_v16 }
 0x18c   :  { %5144 = vmatmul.mubr.msk.bf16.vlgmr.msra.gmra.mrb[0].mxu0 %vm2059_vm4, %v7460_v34 }
 0x18d   :  { %2158 = vmatprep.mubr.bf16.mxu0 %v8814_v25  ;;  %v7469_v51 = vpop.permute.xlu1 %1787  ;;  %v7471_v1 = vpop.permute.xlu0 %1785  ;;  %v1461_v25 = vmul.f32 %v6965_v12, %v1460_v20 }
 0x191   :  { %v7476_v13 = vpop.permute.xlu1 %1504  ;;  %v1486_v49 = vpop.permute.xlu0 %1485 }
 0x192   :  { %v1494_v47 = vadd.f32 %v1486_v49, %v1469_v18  ;;  %v1521_v49 = vmul.f32 %v6965_v12, %v1520_v19  ;;  %v7526_v18 = vmul.f32 %v6991_v53, %v1520_v19  ;;  %v1812_v19 = vsel %vm409_vm0, %v1809_v16, %v1811_v56 }
 0x194   :  { %v1529_v42 = vrot.slane %v1521_v49, 1  ;;  %v1530_v48 = vrot.slane %v7526_v18, 1  ;;  %v7562_v49 = vmul.f32 %v7004_v35, %v1887_v21 }
 0x195   :  { %v7479_v61 = vpop.permute.xlu1 %1508  ;;  %v7481_v23 = vpop.permute.xlu0 %1506 }
 0x199   :  { %v1511_v54 = vpop.permute.xlu1 %1510  ;;  %v7483_v50 = vpop.permute.xlu0 %1789 }
 0x19a   :  { %v7485_v57 = vadd.f32 %v1511_v54, %v1494_v47  ;;  %v7529_v47 = vmul.f32 %v7004_v35, %v1799_v11  ;;  %v1746_v54 = vadd.f32 %v7512_v55, %v1741_v60  ;;  %v1888_v11 = vmul.f32 %v6965_v12, %v1887_v21 }
 0x19b   :  { %v1462_v60 = vmul.f32 %v6991_v53, %v1460_v20  ;;  %v1795_v12 = vadd.f32 %v7462_v14, %v1770_v4  ;;  %v1890_v53 = vmul.f32 %v6978_v33, %v1887_v21  ;;  %v1897_v20 = vrot.slane %v7542_v31, 2 }
 0x19c   :  { %v1813_v26 = vrot.slane %v7529_v47, 1  ;;  %v1896_v38 = vrot.slane %v1888_v11, 2  ;;  %v1743_v31 = vmul.f32 %v7004_v35, %v1739_v22  ;;  %v1901_v35 = vrot.slane %v7562_v49, 2  ;;  %v6213_v11 = vld [vmem:[%s8789_s2] sm:$0xff] }
 0x19d   :  { %v7487_v10 = vpop.permute.xlu1 %1841  ;;  %v7489_v63 = vpop.permute.xlu0 %1839  ;;  %v1467_v33 = vadd.f32 %v7474_v59, %v1462_v60  ;;  %v1819_v21 = vadd.f32 %v1810_v37, %v1795_v12 }
 0x19e   :  { %v1814_v18 = vsel %vm409_vm0, %v1811_v56, %v1813_v26  ;;  %v6214_v56 = vld [vmem:[%s8789_s2 + $0x8] sm:$0xff] }
 0x1a1   :  { %v7491_v8 = vpop.permute.xlu1 %1560  ;;  %v7493_v17 = vpop.permute.xlu0 %1843 }
 0x1a5   :  { %v7495_v6 = vpop.permute.xlu1 %1564  ;;  %v7497_v52 = vpop.permute.xlu0 %1562 }
 0x1a9   :  { %v7499_v30 = vpop.permute.xlu1 %1871  ;;  %v7501_v58 = vpop.permute.xlu0 %1845 }
 0x1ad   :  { %v7503_v24 = vpop.permute.xlu1 %1875  ;;  %v7505_v29 = vpop.permute.xlu0 %1873 }
 0x1b1   :  { %v7508_v62 = vpop.permute.xlu1 %1592  ;;  %v7510_v46 = vpop.permute.xlu0 %1566 }
 0x1b2   :  { %8913 = vst [vmem:[#allocation28_spill] sm:$0xff] %v7510_v46  ;;  %v1772_v46 = vadd.f32 %v7449_v39, %v1747_v5  ;;  %v1468_v39 = vadd.f32 %v7474_v59, %v1463_v9  ;;  %v1608_v5 = vstv %s7533_s0  ;;  %v1534_v9 = vrot.slane %v7555_v32, 1 }
 0x1b3   :  { %v1609_v60 = vmul.f32 %v6213_v11, %v1608_v5  ;;  %v1610_v12 = vmul.f32 %v6214_v56, %v1608_v5 }
 0x1b4   :  { %v1797_v4 = vadd.f32 %v7469_v51, %v1772_v46  ;;  %v1899_v51 = vrot.slane %v1890_v53, 2 }
 0x1b5   :  { %v7519_v40 = vpop.permute.xlu1 %1596  ;;  %v7521_v36 = vpop.permute.xlu0 %1594 }
 0x1b6   :  { %v1821_v37 = vadd.f32 %v1814_v18, %v1797_v4  ;;  %v6216_v4 = vld [vmem:[%s8789_s2 + $0x18] sm:$0xff]  ;;  %v1902_v18 = vsel %vm498_vm1, %v1899_v51, %v1901_v35 }
 0x1b9   :  { %v7537_v27 = vpop.permute.xlu1 %1598  ;;  %v7539_v34 = vpop.permute.xlu0 %1877 }
 0x1ba   :  { %8914 = vst [vmem:[#allocation29_spill] sm:$0xff] %v7537_v27  ;;  %v1771_v27 = vadd.f32 %v7436_v15, %v1746_v54  ;;  %v1466_v15 = vadd.f32 %v7474_v59, %v1461_v25  ;;  %v1531_v54 = vsel %vm409_vm0, %v1529_v42, %v1530_v48  ;;  %v1532_v25 = vrot.slane %v1523_v44, 1 }
 0x1bb   :  { %v1493_v42 = vadd.f32 %v7452_v28, %v1468_v39  ;;  %v1492_v44 = vadd.f32 %v7454_v45, %v1467_v33  ;;  %v1748_v33 = vadd.f32 %v7512_v55, %v1743_v31 }
 0x1bc   :  { %v1796_v14 = vadd.f32 %v7471_v1, %v1771_v27  ;;  %v1898_v1 = vsel %vm498_vm1, %v1896_v38, %v1897_v20  ;;  %v1491_v22 = vadd.f32 %v7447_v2, %v1466_v15  ;;  %v1851_v27 = vadd.f32 %v7489_v63, %v1819_v21  ;;  %v6215_v15 = vld [vmem:[%s8789_s2 + $0x10] sm:$0xff] }
 0x1bd   :  { %v7559_v41 = vpop.permute.xlu1 %1929  ;;  %v1928_v0 = vpop.permute.xlu0 %1927  ;;  %v1853_v63 = vadd.f32 %v7493_v17, %v1821_v37  ;;  %v1518_v45 = vadd.f32 %v7479_v61, %v1493_v42  ;;  %v1517_v38 = vadd.f32 %v7481_v23, %v1492_v44  ;;  %v1611_v39 = vmul.f32 %v6215_v15, %v1608_v5 }
 0x1be   :  { %v1820_v16 = vadd.f32 %v1812_v19, %v1796_v14  ;;  %v1516_v2 = vadd.f32 %v7476_v13, %v1491_v22  ;;  %v1883_v28 = vadd.f32 %v7499_v30, %v1851_v27  ;;  %v7603_v13 = vmul.f32 %v6216_v4, %v1608_v5 }
 0x1bf   :  { %v1535_v17 = vsel %vm409_vm0, %v1532_v25, %v1534_v9  ;;  %v1533_v61 = vsel %vm409_vm0, %v1530_v48, %v1532_v25  ;;  %v1885_v23 = vadd.f32 %v7503_v24, %v1853_v63  ;;  %v1900_v19 = vsel %vm498_vm1, %v1897_v20, %v1899_v51 }
 0x1c0   :  { %v1852_v53 = vadd.f32 %v7487_v10, %v1820_v16  ;;  %v1540_v21 = vadd.f32 %v1531_v54, %v1516_v2  ;;  %v1907_v5 = vadd.f32 %v1898_v1, %v1883_v28  ;;  %v1617_v22 = vrot.slane %v1609_v60, 2 }
 0x1c1   :  { %v7578_v46 = vpop.permute.xlu1 %1648  ;;  %v1932_v59 = vpop.permute.xlu0 %1931  ;;  %v1618_v16 = vrot.slane %v1610_v12, 2  ;;  %v1542_v27 = vadd.f32 %v1535_v17, %v1518_v45  ;;  %v1541_v37 = vadd.f32 %v1533_v61, %v1517_v38  ;;  %v1620_v42 = vrot.slane %v1611_v39, 2 }
 0x1c2   :  { %v1884_v30 = vadd.f32 %v7505_v29, %v1852_v53  ;;  %v1622_v48 = vrot.slane %v7603_v13, 2  ;;  %v1572_v29 = vadd.f32 %v7491_v8, %v1540_v21  ;;  %v1939_v31 = vadd.f32 %v1928_v0, %v1907_v5 }
 0x1c3   :  { %v1909_v20 = vadd.f32 %v1902_v18, %v1885_v23  ;;  %v1773_v44 = vadd.f32 %v7464_v43, %v1748_v33  ;;  %v1574_v51 = vadd.f32 %v7495_v6, %v1542_v27  ;;  %v1573_v54 = vadd.f32 %v7497_v52, %v1541_v37 }
 0x1c4   :  { %v1908_v55 = vadd.f32 %v1900_v19, %v1884_v30  ;;  %v1604_v1 = vadd.f32 %v7508_v62, %v1572_v29  ;;  %v1619_v8 = vsel %vm498_vm1, %v1617_v22, %v1618_v16  ;;  %v1623_v6 = vsel %vm498_vm1, %v1620_v42, %v1622_v48 }
 0x1c5   :  { %v1653_v10 = vpop.permute.xlu1 %1652  ;;  %v1651_v14 = vpop.permute.xlu0 %1650  ;;  %v1941_v60 = vadd.f32 %v1932_v59, %v1909_v20  ;;  %v1798_v12 = vadd.f32 %v7483_v50, %v1773_v44  ;;  %v1606_v2 = vadd.f32 %v7519_v40, %v1574_v51  ;;  %v1605_v43 = vadd.f32 %v7521_v36, %v1573_v54  ;;  %v8916_v44 = vld [vmem:[#allocation29_spill] sm:$0xff] }
 0x1c6   :  { %v1940_v11 = vadd.f32 %v7559_v41, %v1908_v55  ;;  %v1621_v41 = vsel %vm498_vm1, %v1618_v16, %v1620_v42  ;;  %v1628_v59 = vadd.f32 %v1619_v8, %v1604_v1  ;;  %v8918_v8 = vld [vmem:[#allocation18_spill] sm:$0xff] }
 0x1c7   :  { %v1822_v40 = vadd.f32 %v1813_v26, %v1798_v12  ;;  %v1630_v45 = vadd.f32 %v1623_v6, %v1606_v2  ;;  %v1629_v39 = vadd.f32 %v1621_v41, %v1605_v43  ;;  %v8917_v12 = vld [vmem:[#allocation23_spill] sm:$0xff] }
 0x1c8   :  { %v1660_v36 = vadd.f32 %v7578_v46, %v1628_v59 }
 0x1c9   :  { %v1960_v24 = vpop.permute.xlu1 %1959  ;;  %v1934_v25 = vpop.permute.xlu0 %1933  ;;  %v1854_v61 = vadd.f32 %v7501_v58, %v1822_v40  ;;  %v1662_v33 = vadd.f32 %v1653_v10, %v1630_v45  ;;  %v1661_v19 = vadd.f32 %v1651_v14, %v1629_v39 }
 0x1ca   :  { %v1971_v56 = vadd.f32 %v1960_v24, %v1939_v31  ;;  %v1543_v31 = vadd.f32 %v1534_v9, %v7485_v57 }
 0x1cb   :  { %v1886_v26 = vadd.f32 %v7539_v34, %v1854_v61 }
 0x1cc   :  { %v1979_v63 = vrot.slane %v1971_v56, 1 }
 0x1cd   :  { %v1964_v0 = vpop.permute.xlu1 %1963  ;;  %v1962_v53 = vpop.permute.xlu0 %1961  ;;  %v1910_v10 = vadd.f32 %v1901_v35, %v1886_v26  ;;  %v5795_v26 = vld [vmem:[%s8791_s4] ss:$16 sps:$4 sm:$0xff]  }
 0x1ce   :  { %v1973_v52 = vadd.f32 %v1964_v0, %v1941_v60  ;;  %v1972_v62 = vadd.f32 %v1962_v53, %v1940_v11 }
 0x1cf   :  { %v1942_v49 = vadd.f32 %v1934_v25, %v1910_v10  ;;  %v5802_v10 = vld [vmem:[%s8791_s4 + $0x44] ss:$16 sps:$4 sm:$0xff]  }
 0x1d0   :  { %v1982_v28 = vrot.slane %v1973_v52, 1  ;;  %v1980_v50 = vrot.slane %v1972_v62, 1 }
 0x1d1   :  { %v1681_v38 = vpop.permute.xlu1 %1680  ;;  %v1655_v15 = vpop.permute.xlu0 %1654 }
 0x1d2   :  { %v1981_v4 = vsel %vm409_vm0, %v1979_v63, %v1980_v50  ;;  %v1983_v17 = vsel %vm409_vm0, %v1980_v50, %v1982_v28  ;;  %v1692_v47 = vadd.f32 %v1681_v38, %v1660_v36  ;;  %v8919_v63 = vld [vmem:[#allocation19_spill] sm:$0xff]  ;;  %v8920_v50 = vld [vmem:[#allocation24_spill] sm:$0xff] }
 0x1d3   :  { %v7637_v23 = vmax.f32 %v1972_v62, %v1983_v17  ;;  %v7639_v30 = vmax.f32 %v1971_v56, %v1981_v4  ;;  %v8921_v17 = vld [vmem:[#allocation25_spill] sm:$0xff] }
 0x1d4   :  { %v1700_v58 = vrot.slane %v1692_v47, 1 }
 0x1d5   :  { %v1685_v18 = vpop.permute.xlu1 %1684  ;;  %2000 = vrot.lane.b32.xlu1 %v7637_v23, %s6247_s26  ;;  %1998 = vrot.lane.b32.xlu0 %v7639_v30, %s6247_s26  ;;  %v1683_v46 = vpop.permute.xlu0 %1682 }
 0x1d6   :  { %v1694_v21 = vadd.f32 %v1685_v18, %v1662_v33  ;;  %v1693_v5 = vadd.f32 %v1683_v46, %v1661_v19  ;;  %v8922_v33 = vld [vmem:[#allocation11_spill] sm:$0xff] }
 0x1d7   :  { %v5796_v18 = vld [vmem:[%s8791_s4 + $0x24] ss:$16 sps:$4 sm:$0xff]  }
 0x1d8   :  { %v1703_v22 = vrot.slane %v1694_v21, 1  ;;  %v1701_v16 = vrot.slane %v1693_v5, 1 }
 0x1d9   :  { %v1443_v14 = vpop.permute.xlu1 %1442  ;;  %v1441_v27 = vpop.permute.xlu0 %1440 }
 0x1da   :  { %v1702_v34 = vsel %vm409_vm0, %v1700_v58, %v1701_v16  ;;  %v1704_v37 = vsel %vm409_vm0, %v1701_v16, %v1703_v22  ;;  %v1453_v42 = vmax.f32 %v7367_v7, %v1443_v14  ;;  %v1452_v24 = vmax.f32 %v7369_v3, %v1441_v27  ;;  %v8915_v3 = vld [vmem:[#allocation28_spill] sm:$0xff] }
 0x1db   :  { %v7652_v29 = vmax.f32 %v1693_v5, %v1704_v37  ;;  %v7654_v55 = vmax.f32 %v1692_v47, %v1702_v34  ;;  %v1575_v35 = vadd.f32 %v8915_v3, %v1543_v31  ;;  %v5790_v47 = vld [vmem:[%s8791_s4 + $0x4] ss:$16 sps:$4 sm:$0xff]   ;;  %v5801_v58 = vld [vmem:[%s8791_s4 + $0x20] ss:$16 sps:$4 sm:$0xff]   ;;  %v8925_v3 = vmov 0  }
 0x1dc   :  { %1457 = vst.msk [vmem:[#allocation2 + $0x48] sm:$0xff] %vm617_vm2, %v1453_v42  ;;  %1456 = vst.msk [vmem:[#allocation2 + $0x18] sm:$0xff] %vm617_vm2, %v1452_v24  ;;  %3178 = vmatprep.subr.bf16.mxu1 %v5790_v47  ;;  %v5807_v37 = vld [vmem:[%s8791_s4 + $0x40] ss:$16 sps:$4 sm:$0xff]   ;;  %v5808_v24 = vld [vmem:[%s8791_s4 + $0x64] ss:$16 sps:$4 sm:$0xff]  }
 0x1dd   :  { %1721 = vrot.lane.b32.xlu1 %v7652_v29, %s6247_s26  ;;  %1719 = vrot.lane.b32.xlu0 %v7654_v55, %s6247_s26  ;;  %v1966_v7 = vpop.permute.xlu0 %1965  ;;  %v1607_v51 = vadd.f32 %v8916_v44, %v1575_v35  ;;  %v5813_v31 = vld [vmem:[%s8791_s4 + $0x60] ss:$16 sps:$4 sm:$0xff]  }
 0x1de   :  { %v1974_v20 = vadd.f32 %v1966_v7, %v1942_v49  ;;  %3179 = vmatpush1.bf16.msra.mxu1 %v5795_v26  ;;  %v5814_v49 = vld [vmem:[%s8791_s4 + $0x84] ss:$16 sps:$4 sm:$0xff]   ;;  %v8924_v7 = vld [vmem:[#allocation20_spill] sm:$0xff] }
 0x1df   :  { %v1631_v56 = vadd.f32 %v1622_v48, %v1607_v51  ;;  %3180 = vmatprep.subr.bf16.mxu1 %v5796_v18  ;;  %v5819_v35 = vld [vmem:[%s8791_s4 + $0x80] ss:$16 sps:$4 sm:$0xff]   ;;  %v5826_v51 = vld [vmem:[%s8791_s4 + $0xc4] ss:$16 sps:$4 sm:$0xff]  }
 0x1e0   :  { %v1984_v54 = vrot.slane %v1974_v20, 1  ;;  %v5825_v44 = vld [vmem:[%s8791_s4 + $0xa0] ss:$16 sps:$4 sm:$0xff]  }
 0x1e1   :  { %v1663_v43 = vadd.f32 %v1655_v15, %v1631_v56  ;;  %v5849_v56 = vld [vmem:[%s8791_s4 + $0x120] ss:$16 sps:$4 sm:$0xff]  }
 0x1e2   :  { %v1985_v57 = vsel %vm409_vm0, %v1982_v28, %v1984_v54  ;;  %v7668_v32 = vmax.f32 %v1974_v20, %v1984_v54  ;;  %3181 = vmatpush1.bf16.msra.mxu1 %v5801_v58  ;;  %v5820_v20 = vld [vmem:[%s8791_s4 + $0xa4] ss:$16 sps:$4 sm:$0xff]   ;;  %v5831_v54 = vld [vmem:[%s8791_s4 + $0xc0] ss:$16 sps:$4 sm:$0xff]  }
 0x1e3   :  { %v1162_v9 = vpop.permute.xlu1 %1161  ;;  %v1164_v25 = vpop.permute.xlu0 %1163  ;;  %v7670_v1 = vmax.f32 %v1973_v52, %v1985_v57  ;;  %v2021_v11 = vld [vmem:[#allocation2 + $0x18] sm:$0xff]  ;;  %v2027_v60 = vld [vmem:[#allocation2 + $0x48] sm:$0xff]  ;;  %3182 = vmatprep.subr.bf16.mxu1 %v5802_v10  ;;  %v5832_v57 = vld [vmem:[%s8791_s4 + $0xe4] ss:$16 sps:$4 sm:$0xff]  }
 0x1e4   :  { %v1173_v2 = vmax.f32 %v8917_v12, %v1162_v9  ;;  %v1174_v0 = vmax.f32 %v8918_v8, %v1164_v25  ;;  %2004 = vrot.lane.b32.xlu1 %v7668_v32, %s6247_s26  ;;  %v2045_v53 = vpack.c.bf16 %v2027_v60, %v2021_v11  ;;  %v5837_v9 = vld [vmem:[%s8791_s4 + $0xe0] ss:$16 sps:$4 sm:$0xff]   ;;  %v5838_v25 = vld [vmem:[%s8791_s4 + $0x104] ss:$16 sps:$4 sm:$0xff]  }
 0x1e5   :  { %2002 = vrot.lane.b32.xlu0 %v7670_v1, %s6247_s26  ;;  %v5843_v11 = vld [vmem:[%s8791_s4 + $0x100] ss:$16 sps:$4 sm:$0xff]   ;;  %v5844_v60 = vld [vmem:[%s8791_s4 + $0x124] ss:$16 sps:$4 sm:$0xff]  }
 0x1e6   :  { %1177 = vst.msk [vmem:[#allocation2 + $0x10] sm:$0xff] %vm617_vm2, %v1173_v2  ;;  %1178 = vst.msk [vmem:[#allocation2 + $0x40] sm:$0xff] %vm617_vm2, %v1174_v0  ;;  %2126 = vmatprep.subr.bf16.mxu0 %v2045_v53  ;;  %3183 = vmatpush1.bf16.msra.mxu1 %v5807_v37  ;;  %v5850_v12 = vld [vmem:[%s8791_s4 + $0x144] ss:$16 sps:$4 sm:$0xff]   ;;  %v5855_v2 = vld [vmem:[%s8791_s4 + $0x140] ss:$16 sps:$4 sm:$0xff]  }
 0x1e7   :  { %v1687_v6 = vpop.permute.xlu1 %1686  ;;  %3184 = vmatprep.subr.bf16.mxu1 %v5808_v24  ;;  %v5856_v8 = vld [vmem:[%s8791_s4 + $0x164] ss:$16 sps:$4 sm:$0xff]   ;;  %v5861_v0 = vld [vmem:[%s8791_s4 + $0x160] ss:$16 sps:$4 sm:$0xff]  }
 0x1e8   :  { %v1695_v13 = vadd.f32 %v1687_v6, %v1663_v43  ;;  %v5862_v53 = vld [vmem:[%s8791_s4 + $0x184] ss:$16 sps:$4 sm:$0xff]   ;;  %v5867_v43 = vld [vmem:[%s8791_s4 + $0x180] ss:$16 sps:$4 sm:$0xff]  }
 0x1e9   :  { %v5868_v6 = vld [vmem:[%s8791_s4 + $0x1a4] ss:$16 sps:$4 sm:$0xff]  }
 0x1ea   :  { %v1705_v48 = vrot.slane %v1695_v13, 1  ;;  %3185 = vmatpush1.bf16.msra.mxu1 %v5813_v31  ;;  %v5894_v24 = vld [vmem:[%s8791_s4 + $0x224] ss:$16 sps:$4 sm:$0xff]  }
 0x1eb   :  { %v1447_v52 = vpop.permute.xlu1 %1446  ;;  %v1445_v62 = vpop.permute.xlu0 %1444  ;;  %3186 = vmatprep.subr.bf16.mxu1 %v5814_v49  ;;  %v5900_v31 = vld [vmem:[%s8791_s4 + $0x244] ss:$16 sps:$4 sm:$0xff]  }
 0x1ec   :  { %v1706_v41 = vsel %vm409_vm0, %v1703_v22, %v1705_v48  ;;  %v7683_v59 = vmax.f32 %v1695_v13, %v1705_v48  ;;  %v1455_v28 = vmax.f32 %v8919_v63, %v1447_v52  ;;  %v1454_v40 = vmax.f32 %v8920_v50, %v1445_v62  ;;  %v8923_v22 = vld [vmem:[#allocation14_spill] sm:$0xff]  ;;  %v5874_v48 = vld [vmem:[%s8791_s4 + $0x1c4] ss:$16 sps:$4 sm:$0xff]  }
 0x1ed   :  { %v7687_v45 = vmax.f32 %v1694_v21, %v1706_v41  ;;  %v2020_v38 = vld [vmem:[#allocation2 + $0x10] sm:$0xff]  ;;  %v2026_v15 = vld [vmem:[#allocation2 + $0x40] sm:$0xff] }
 0x1ee   :  { %1459 = vst.msk [vmem:[#allocation2 + $0xa8] sm:$0x1f] %vm621_vm3, %v1455_v28  ;;  %1725 = vrot.lane.b32.xlu1 %v7683_v59, %s6247_s26  ;;  %v2044_v36 = vpack.c.bf16 %v2026_v15, %v2020_v38  ;;  %3187 = vmatpush1.bf16.msra.mxu1 %v5819_v35  ;;  %v5873_v13 = vld [vmem:[%s8791_s4 + $0x1a0] ss:$16 sps:$4 sm:$0xff]   ;;  %v5880_v62 = vld [vmem:[%s8791_s4 + $0x1e4] ss:$16 sps:$4 sm:$0xff]  }
 0x1ef   :  { %1458 = vst.msk [vmem:[#allocation2 + $0x78] sm:$0xff] %vm617_vm2, %v1454_v40  ;;  %v1168_v39 = vpop.permute.xlu1 %1167  ;;  %1723 = vrot.lane.b32.xlu0 %v7687_v45, %s6247_s26  ;;  %v1166_v4 = vpop.permute.xlu0 %1165  ;;  %3188 = vmatprep.subr.bf16.mxu1 %v5820_v20  ;;  %v5879_v52 = vld [vmem:[%s8791_s4 + $0x1c0] ss:$16 sps:$4 sm:$0xff]   ;;  %v5888_v63 = vld [vmem:[%s8791_s4 + $0x204] ss:$16 sps:$4 sm:$0xff]  }
 0x1f0   :  { %v1176_v61 = vmax.f32 %v8921_v17, %v1168_v39  ;;  %v1175_v19 = vmax.f32 %v8922_v33, %v1166_v4  ;;  %2127 = vmatpush1.bf16.msra.mxu0 %v2044_v36  ;;  %v5885_v41 = vld [vmem:[%s8791_s4 + $0x1e0] ss:$16 sps:$4 sm:$0xff]   ;;  %v5906_v20 = vld [vmem:[%s8791_s4 + $0x264] ss:$16 sps:$4 sm:$0xff]  }
 0x1f2   :  { %1180 = vst.msk [vmem:[#allocation2 + $0xa0] sm:$0x1f] %vm621_vm3, %v1176_v61  ;;  %3189 = vmatpush1.bf16.msra.mxu1 %v5825_v44 }
 0x1f3   :  { %1179 = vst.msk [vmem:[#allocation2 + $0x70] sm:$0xff] %vm617_vm2, %v1175_v19  ;;  %3190 = vmatprep.subr.bf16.mxu1 %v5826_v51  ;;  %v5794_v51 = vld [vmem:[%s8791_s4 + $0xc] ss:$16 sps:$4 sm:$0xff]  }
 0x1f5   :  { %v2039_v21 = vld [vmem:[#allocation2 + $0xa8] sm:$0x1f] }
 0x1f6   :  { %v2033_v46 = vld [vmem:[#allocation2 + $0x78] sm:$0xff]  ;;  %3191 = vmatpush1.bf16.msra.mxu1 %v5831_v54 }
 0x1f7   :  { %v2051_v5 = vpack.c.bf16 %v2039_v21, %v2033_v46  ;;  %3192 = vmatprep.subr.bf16.mxu1 %v5832_v57  ;;  %v5904_v57 = vld [vmem:[%s8791_s4 + $0x260] ss:$16 sps:$4 sm:$0xff]  }
 0x1f9   :  { %v2075_v16 = vand.u32 %v8923_v22, %v2051_v5  ;;  %v2038_v27 = vld [vmem:[#allocation2 + $0xa0] sm:$0x1f] }
 0x1fa   :  { %v2032_v14 = vld [vmem:[#allocation2 + $0x70] sm:$0xff]  ;;  %3193 = vmatpush1.bf16.msra.mxu1 %v5837_v9 }
 0x1fb   :  { %2128 = vmatprep.subr.bf16.mxu0 %v2075_v16  ;;  %v2050_v34 = vpack.c.bf16 %v2038_v27, %v2032_v14  ;;  %3194 = vmatprep.subr.bf16.mxu1 %v5838_v25  ;;  %v5912_v9 = vld [vmem:[%s8791_s4 + $0x284] ss:$16 sps:$4 sm:$0xff]   ;;  %v5792_v25 = vld [vmem:[%s8791_s4 + $0x8] ss:$16 sps:$4 sm:$0xff]  }
 0x1fd   :  { %v2072_v42 = vand.u32 %v8923_v22, %v2050_v34 }
 0x1fe   :  { %3195 = vmatpush1.bf16.msra.mxu1 %v5843_v11  ;;  %v5910_v11 = vld [vmem:[%s8791_s4 + $0x280] ss:$16 sps:$4 sm:$0xff]  }
 0x1ff   :  { %2129 = vmatpush1.bf16.msra.mxu0 %v2072_v42  ;;  %3196 = vmatprep.subr.bf16.mxu1 %v5844_v60  ;;  %v5886_v42 = vld [vmem:[%s8791_s4 + $0x200] ss:$16 sps:$4 sm:$0xff]   ;;  %v5918_v60 = vld [vmem:[%s8791_s4 + $0x2a4] ss:$16 sps:$4 sm:$0xff]  }
 0x202   :  { %5145 = vmatmul.mubr.msk.bf16.vlgmr.msra.gmra.mrb[4].mxu0 %vm2059_vm4, %v8924_v7  ;;  %3197 = vmatpush1.bf16.msra.mxu1 %v5849_v56  ;;  %v5798_v56 = vld [vmem:[%s8791_s4 + $0x28] ss:$16 sps:$4 sm:$0xff]  }
 0x203   :  { %2201 = vmatprep.mubr.bf16.mxu0 %v8925_v3  ;;  %3198 = vmatprep.subr.bf16.mxu1 %v5850_v12  ;;  %v5898_v3 = vld [vmem:[%s8791_s4 + $0x240] ss:$16 sps:$4 sm:$0xff]   ;;  %v5806_v12 = vld [vmem:[%s8791_s4 + $0x4c] ss:$16 sps:$4 sm:$0xff]  }
 0x206   :  { %3199 = vmatpush1.bf16.msra.mxu1 %v5855_v2  ;;  %v5924_v2 = vld [vmem:[%s8791_s4 + $0x2c4] ss:$16 sps:$4 sm:$0xff]  }
 0x207   :  { %3200 = vmatprep.subr.bf16.mxu1 %v5856_v8  ;;  %v5804_v8 = vld [vmem:[%s8791_s4 + $0x48] ss:$16 sps:$4 sm:$0xff]  }
 0x20a   :  { %3201 = vmatpush1.bf16.msra.mxu1 %v5861_v0  ;;  %v5812_v0 = vld [vmem:[%s8791_s4 + $0x6c] ss:$16 sps:$4 sm:$0xff]  }
 0x20b   :  { %3202 = vmatprep.subr.bf16.mxu1 %v5862_v53  ;;  %v5922_v53 = vld [vmem:[%s8791_s4 + $0x2c0] ss:$16 sps:$4 sm:$0xff]  }
 0x20e   :  { %3203 = vmatpush1.bf16.msra.mxu1 %v5867_v43  ;;  %v5930_v43 = vld [vmem:[%s8791_s4 + $0x2e4] ss:$16 sps:$4 sm:$0xff]  }
 0x20f   :  { %3204 = vmatprep.subr.bf16.mxu1 %v5868_v6  ;;  %v5810_v6 = vld [vmem:[%s8791_s4 + $0x68] ss:$16 sps:$4 sm:$0xff]  }
 0x212   :  { %3205 = vmatpush1.bf16.msra.mxu1 %v5873_v13  ;;  %v5818_v13 = vld [vmem:[%s8791_s4 + $0x8c] ss:$16 sps:$4 sm:$0xff]  }
 0x213   :  { %3206 = vmatprep.subr.bf16.mxu1 %v5874_v48  ;;  %v5928_v48 = vld [vmem:[%s8791_s4 + $0x2e0] ss:$16 sps:$4 sm:$0xff]  }
 0x216   :  { %3207 = vmatpush1.bf16.msra.mxu1 %v5879_v52  ;;  %v5936_v52 = vld [vmem:[%s8791_s4 + $0x304] ss:$16 sps:$4 sm:$0xff]  }
 0x217   :  { %3208 = vmatprep.subr.bf16.mxu1 %v5880_v62  ;;  %v5816_v62 = vld [vmem:[%s8791_s4 + $0x88] ss:$16 sps:$4 sm:$0xff]  }
 0x21a   :  { %3209 = vmatpush1.bf16.msra.mxu1 %v5885_v41  ;;  %v5824_v41 = vld [vmem:[%s8791_s4 + $0xac] ss:$16 sps:$4 sm:$0xff]  }
 0x21b   :  { %3221 = vmatprep.subr.bf16.mxu1 %v5888_v63  ;;  %v5934_v63 = vld [vmem:[%s8791_s4 + $0x300] ss:$16 sps:$4 sm:$0xff]  }
 0x247   :  { %v2001_v28 = vpop.permute.xlu1 %2000  ;;  %v1999_v50 = vpop.permute.xlu0 %1998 }
 0x248   :  { %v2011_v40 = vmax.f32 %v7637_v23, %v2001_v28  ;;  %v2010_v38 = vmax.f32 %v7639_v30, %v1999_v50  ;;  %v5942_v28 = vld [vmem:[%s8791_s4 + $0x324] ss:$16 sps:$4 sm:$0xff]   ;;  %v5822_v50 = vld [vmem:[%s8791_s4 + $0xa8] ss:$16 sps:$4 sm:$0xff]  }
 0x24a   :  { %2015 = vst.msk [vmem:[#allocation2 + $0x58] sm:$0xff] %vm617_vm2, %v2011_v40  ;;  %2014 = vst.msk [vmem:[#allocation2 + $0x28] sm:$0xff] %vm617_vm2, %v2010_v38  ;;  %v5830_v40 = vld [vmem:[%s8791_s4 + $0xcc] ss:$16 sps:$4 sm:$0xff]   ;;  %v5940_v38 = vld [vmem:[%s8791_s4 + $0x320] ss:$16 sps:$4 sm:$0xff]  }
 0x24f   :  { %v1722_v15 = vpop.permute.xlu1 %1721  ;;  %v1720_v36 = vpop.permute.xlu0 %1719 }
 0x250   :  { %v1732_v39 = vmax.f32 %v7652_v29, %v1722_v15  ;;  %v1731_v4 = vmax.f32 %v7654_v55, %v1720_v36  ;;  %v5948_v15 = vld [vmem:[%s8791_s4 + $0x344] ss:$16 sps:$4 sm:$0xff]   ;;  %v5828_v36 = vld [vmem:[%s8791_s4 + $0xc8] ss:$16 sps:$4 sm:$0xff]  }
 0x251   :  { %v2023_v17 = vld [vmem:[#allocation2 + $0x28] sm:$0xff]  ;;  %v2029_v61 = vld [vmem:[#allocation2 + $0x58] sm:$0xff] }
 0x252   :  { %1736 = vst.msk [vmem:[#allocation2 + $0x50] sm:$0xff] %vm617_vm2, %v1732_v39  ;;  %1735 = vst.msk [vmem:[#allocation2 + $0x20] sm:$0xff] %vm617_vm2, %v1731_v4  ;;  %v2047_v33 = vpack.c.bf16 %v2029_v61, %v2023_v17  ;;  %v5836_v39 = vld [vmem:[%s8791_s4 + $0xec] ss:$16 sps:$4 sm:$0xff]   ;;  %v5946_v4 = vld [vmem:[%s8791_s4 + $0x340] ss:$16 sps:$4 sm:$0xff]  }
 0x253   :  { %v5954_v17 = vld [vmem:[%s8791_s4 + $0x364] ss:$16 sps:$4 sm:$0xff]   ;;  %v5834_v61 = vld [vmem:[%s8791_s4 + $0xe8] ss:$16 sps:$4 sm:$0xff]  }
 0x254   :  { %2169 = vmatprep.subr.bf16.mxu0 %v2047_v33  ;;  %v5842_v33 = vld [vmem:[%s8791_s4 + $0x10c] ss:$16 sps:$4 sm:$0xff]  }
 0x256   :  { %v2005_v23 = vpop.permute.xlu1 %2004 }
 0x257   :  { %v2013_v30 = vmax.f32 %v7668_v32, %v2005_v23  ;;  %v2003_v19 = vpop.permute.xlu0 %2002  ;;  %v5952_v23 = vld [vmem:[%s8791_s4 + $0x360] ss:$16 sps:$4 sm:$0xff]  }
 0x258   :  { %v2012_v47 = vmax.f32 %v7670_v1, %v2003_v19  ;;  %v5840_v19 = vld [vmem:[%s8791_s4 + $0x108] ss:$16 sps:$4 sm:$0xff]  }
 0x259   :  { %2017 = vst.msk [vmem:[#allocation2 + $0xb8] sm:$0x1f] %vm621_vm3, %v2013_v30  ;;  %v2022_v26 = vld [vmem:[#allocation2 + $0x20] sm:$0xff]  ;;  %v2028_v29 = vld [vmem:[#allocation2 + $0x50] sm:$0xff] }
 0x25a   :  { %2016 = vst.msk [vmem:[#allocation2 + $0x88] sm:$0xff] %vm617_vm2, %v2012_v47  ;;  %v2046_v55 = vpack.c.bf16 %v2028_v29, %v2022_v26  ;;  %v5960_v30 = vld [vmem:[%s8791_s4 + $0x384] ss:$16 sps:$4 sm:$0xff]   ;;  %v5848_v47 = vld [vmem:[%s8791_s4 + $0x12c] ss:$16 sps:$4 sm:$0xff]  }
 0x25b   :  { %v5958_v26 = vld [vmem:[%s8791_s4 + $0x380] ss:$16 sps:$4 sm:$0xff]   ;;  %v5966_v29 = vld [vmem:[%s8791_s4 + $0x3a4] ss:$16 sps:$4 sm:$0xff]  }
 0x25c   :  { %2170 = vmatpush1.bf16.msra.mxu0 %v2046_v55  ;;  %v5846_v55 = vld [vmem:[%s8791_s4 + $0x128] ss:$16 sps:$4 sm:$0xff]  }
 0x25f   :  { %v2117_v18 = vpop.f32.mrb[0].mxu0 }
 0x260   :  { %v2119_v46 = vpop.f32.mrb[1].mxu0  ;;  %v1726_v21 = vpop.permute.xlu1 %1725  ;;  %v2041_v5 = vld [vmem:[#allocation2 + $0xb8] sm:$0x1f] }
 0x261   :  { %v2121_v58 = vpop.f32.mrb[2].mxu0  ;;  %v1734_v16 = vmax.f32 %v7683_v59, %v1726_v21  ;;  %v1724_v10 = vpop.permute.xlu0 %1723  ;;  %v2035_v32 = vld [vmem:[#allocation2 + $0x88] sm:$0xff]  ;;  %v5972_v21 = vld [vmem:[%s8791_s4 + $0x3c4] ss:$16 sps:$4 sm:$0xff]  }
 0x262   :  { %v7816_v14 = vpack.c.bf16 %v2121_v58, %v2117_v18  ;;  %v2123_v1 = vpop.f32.mrb[3].mxu0  ;;  %v1733_v27 = vmax.f32 %v7687_v45, %v1724_v10  ;;  %v2053_v34 = vpack.c.bf16 %v2041_v5, %v2035_v32  ;;  %v5892_v45 = vld [vmem:[%s8791_s4 + $0x220] ss:$16 sps:$4 sm:$0xff]   ;;  %v5854_v18 = vld [vmem:[%s8791_s4 + $0x14c] ss:$16 sps:$4 sm:$0xff]  }
 0x263   :  { %v2213_v37 = vpack.c.bf16 %v2123_v1, %v2119_v46  ;;  %1738 = vst.msk [vmem:[#allocation2 + $0xb0] sm:$0x1f] %vm621_vm3, %v1734_v16  ;;  %v5964_v46 = vld [vmem:[%s8791_s4 + $0x3a0] ss:$16 sps:$4 sm:$0xff]   ;;  %v5852_v5 = vld [vmem:[%s8791_s4 + $0x148] ss:$16 sps:$4 sm:$0xff]  }
 0x264   :  { %1737 = vst.msk [vmem:[#allocation2 + $0x80] sm:$0xff] %vm617_vm2, %v1733_v27  ;;  %v2081_v59 = vand.u32 %v8923_v22, %v2053_v34  ;;  %v5860_v58 = vld [vmem:[%s8791_s4 + $0x16c] ss:$16 sps:$4 sm:$0xff]   ;;  %v5970_v16 = vld [vmem:[%s8791_s4 + $0x3c0] ss:$16 sps:$4 sm:$0xff]  }
 0x265   :  { %3210 = vmatprep.mubr.bf16.mxu1 %v2213_v37  ;;  %v5978_v10 = vld [vmem:[%s8791_s4 + $0x3e4] ss:$16 sps:$4 sm:$0xff]   ;;  %v5858_v32 = vld [vmem:[%s8791_s4 + $0x168] ss:$16 sps:$4 sm:$0xff]   ;;  %v5866_v1 = vld [vmem:[%s8791_s4 + $0x18c] ss:$16 sps:$4 sm:$0xff]  }
 0x266   :  { %3211 = vmatmul.mubr.bf16.vlgmr.msra.gmra.mrb[0].mxu1 %v7816_v14  ;;  %2171 = vmatprep.subr.bf16.mxu0 %v2081_v59  ;;  %v5976_v27 = vld [vmem:[%s8791_s4 + $0x3e0] ss:$16 sps:$4 sm:$0xff]   ;;  %v5984_v34 = vld [vmem:[%s8791_s4 + $0x404] ss:$16 sps:$4 sm:$0xff]   ;;  %v5878_v59 = vld [vmem:[%s8791_s4 + $0x1cc] ss:$16 sps:$4 sm:$0xff]  }
 0x267   :  { %3222 = vmatpush1.bf16.msra.mxu1 %v5886_v42  ;;  %v5872_v42 = vld [vmem:[%s8791_s4 + $0x1ac] ss:$16 sps:$4 sm:$0xff]  }
 0x268   :  { %3223 = vmatprep.subr.bf16.mxu1 %v5894_v24  ;;  %v5870_v24 = vld [vmem:[%s8791_s4 + $0x1a8] ss:$16 sps:$4 sm:$0xff]  }
 0x26a   :  { %v2040_v49 = vld [vmem:[#allocation2 + $0xb0] sm:$0x1f] }
 0x26b   :  { %3224 = vmatpush1.bf16.msra.mxu1 %v5892_v45  ;;  %v2034_v35 = vld [vmem:[#allocation2 + $0x80] sm:$0xff]  ;;  %v5876_v45 = vld [vmem:[%s8791_s4 + $0x1c8] ss:$16 sps:$4 sm:$0xff]  }
 0x26c   :  { %3225 = vmatprep.subr.bf16.mxu1 %v5900_v31  ;;  %v2052_v44 = vpack.c.bf16 %v2040_v49, %v2034_v35  ;;  %v5884_v31 = vld [vmem:[%s8791_s4 + $0x1ec] ss:$16 sps:$4 sm:$0xff]   ;;  %v5882_v49 = vld [vmem:[%s8791_s4 + $0x1e8] ss:$16 sps:$4 sm:$0xff]  }
 0x26d   :  { %v5889_v35 = vld [vmem:[%s8791_s4 + $0x208] ss:$16 sps:$4 sm:$0xff]  }
 0x26e   :  { %v2078_v54 = vand.u32 %v8923_v22, %v2052_v44  ;;  %v5800_v22 = vld [vmem:[%s8791_s4 + $0x2c] ss:$16 sps:$4 sm:$0xff]   ;;  %v5895_v44 = vld [vmem:[%s8791_s4 + $0x228] ss:$16 sps:$4 sm:$0xff]  }
 0x26f   :  { %3226 = vmatpush1.bf16.msra.mxu1 %v5898_v3  ;;  %v5891_v3 = vld [vmem:[%s8791_s4 + $0x20c] ss:$16 sps:$4 sm:$0xff]  }
 0x270   :  { %3227 = vmatprep.subr.bf16.mxu1 %v5906_v20  ;;  %2172 = vmatpush1.bf16.msra.mxu0 %v2078_v54  ;;  %v5897_v20 = vld [vmem:[%s8791_s4 + $0x22c] ss:$16 sps:$4 sm:$0xff]   ;;  %v5901_v54 = vld [vmem:[%s8791_s4 + $0x248] ss:$16 sps:$4 sm:$0xff]  }
 0x271   :  { %3307 = vmatprep.subr.bf16.mxu0 %v5794_v51  ;;  %v5903_v51 = vld [vmem:[%s8791_s4 + $0x24c] ss:$16 sps:$4 sm:$0xff]  }
 0x273   :  { %3228 = vmatpush1.bf16.msra.mxu1 %v5904_v57  ;;  %5146 = vmatmul.mubr.msk.bf16.vlgmr.msra.gmra.mrb[8].mxu0 %vm2059_vm4, %v8924_v7  ;;  %v5916_v7 = vld [vmem:[%s8791_s4 + $0x2a0] ss:$16 sps:$4 sm:$0xff]   ;;  %v5907_v57 = vld [vmem:[%s8791_s4 + $0x268] ss:$16 sps:$4 sm:$0xff]  }
 0x274   :  { %3229 = vmatprep.subr.bf16.mxu1 %v5912_v9  ;;  %3308 = vmatpush1.bf16.msra.mxu0 %v5792_v25  ;;  %v5915_v9 = vld [vmem:[%s8791_s4 + $0x28c] ss:$16 sps:$4 sm:$0xff]   ;;  %v5913_v25 = vld [vmem:[%s8791_s4 + $0x288] ss:$16 sps:$4 sm:$0xff]  }
 0x275   :  { %3339 = vmatprep.mubr.bf16.mxu0 %v2213_v37  ;;  %3309 = vmatprep.subr.bf16.mxu0 %v5800_v22  ;;  %v5864_v37 = vld [vmem:[%s8791_s4 + $0x188] ss:$16 sps:$4 sm:$0xff]   ;;  %v5921_v22 = vld [vmem:[%s8791_s4 + $0x2ac] ss:$16 sps:$4 sm:$0xff]  }
 0x277   :  { %3230 = vmatpush1.bf16.msra.mxu1 %v5910_v11  ;;  %v5919_v11 = vld [vmem:[%s8791_s4 + $0x2a8] ss:$16 sps:$4 sm:$0xff]  }
 0x278   :  { %3231 = vmatprep.subr.bf16.mxu1 %v5918_v60  ;;  %3310 = vmatpush1.bf16.msra.mxu0 %v5798_v56  ;;  %v5927_v60 = vld [vmem:[%s8791_s4 + $0x2cc] ss:$16 sps:$4 sm:$0xff]   ;;  %v5925_v56 = vld [vmem:[%s8791_s4 + $0x2c8] ss:$16 sps:$4 sm:$0xff]  }
 0x279   :  { %3311 = vmatprep.subr.bf16.mxu0 %v5806_v12  ;;  %v5933_v12 = vld [vmem:[%s8791_s4 + $0x2ec] ss:$16 sps:$4 sm:$0xff]  }
 0x27b   :  { %3232 = vmatpush1.bf16.msra.mxu1 %v5916_v7  ;;  %v5931_v7 = vld [vmem:[%s8791_s4 + $0x2e8] ss:$16 sps:$4 sm:$0xff]  }
 0x27c   :  { %3233 = vmatprep.subr.bf16.mxu1 %v5924_v2  ;;  %3312 = vmatpush1.bf16.msra.mxu0 %v5804_v8  ;;  %v5939_v2 = vld [vmem:[%s8791_s4 + $0x30c] ss:$16 sps:$4 sm:$0xff]   ;;  %v5937_v8 = vld [vmem:[%s8791_s4 + $0x308] ss:$16 sps:$4 sm:$0xff]  }
 0x27d   :  { %3313 = vmatprep.subr.bf16.mxu0 %v5812_v0  ;;  %v5945_v0 = vld [vmem:[%s8791_s4 + $0x32c] ss:$16 sps:$4 sm:$0xff]  }
 0x27f   :  { %3234 = vmatpush1.bf16.msra.mxu1 %v5922_v53  ;;  %v5943_v53 = vld [vmem:[%s8791_s4 + $0x328] ss:$16 sps:$4 sm:$0xff]  }
 0x280   :  { %3235 = vmatprep.subr.bf16.mxu1 %v5930_v43  ;;  %3314 = vmatpush1.bf16.msra.mxu0 %v5810_v6  ;;  %v5951_v6 = vld [vmem:[%s8791_s4 + $0x34c] ss:$16 sps:$4 sm:$0xff]  }
 0x281   :  { %3315 = vmatprep.subr.bf16.mxu0 %v5818_v13 }
 0x283   :  { %3236 = vmatpush1.bf16.msra.mxu1 %v5928_v48 }
 0x284   :  { %3237 = vmatprep.subr.bf16.mxu1 %v5936_v52  ;;  %3316 = vmatpush1.bf16.msra.mxu0 %v5816_v62 }
 0x285   :  { %3317 = vmatprep.subr.bf16.mxu0 %v5824_v41  ;;  %v5949_v41 = vld [vmem:[%s8791_s4 + $0x348] ss:$16 sps:$4 sm:$0xff]  }
 0x287   :  { %3238 = vmatpush1.bf16.msra.mxu1 %v5934_v63 }
 0x288   :  { %3239 = vmatprep.subr.bf16.mxu1 %v5942_v28  ;;  %3318 = vmatpush1.bf16.msra.mxu0 %v5822_v50  ;;  %v5982_v28 = vld [vmem:[%s8791_s4 + $0x400] ss:$16 sps:$4 sm:$0xff]   ;;  %v5957_v50 = vld [vmem:[%s8791_s4 + $0x36c] ss:$16 sps:$4 sm:$0xff]  }
 0x289   :  { %3319 = vmatprep.subr.bf16.mxu0 %v5830_v40  ;;  %v5990_v40 = vld [vmem:[%s8791_s4 + $0x424] ss:$16 sps:$4 sm:$0xff]  }
 0x28b   :  { %3240 = vmatpush1.bf16.msra.mxu1 %v5940_v38  ;;  %v5955_v38 = vld [vmem:[%s8791_s4 + $0x368] ss:$16 sps:$4 sm:$0xff]  }
 0x28c   :  { %3241 = vmatprep.subr.bf16.mxu1 %v5948_v15  ;;  %3320 = vmatpush1.bf16.msra.mxu0 %v5828_v36  ;;  %v5988_v15 = vld [vmem:[%s8791_s4 + $0x420] ss:$16 sps:$4 sm:$0xff]   ;;  %v5963_v36 = vld [vmem:[%s8791_s4 + $0x38c] ss:$16 sps:$4 sm:$0xff]  }
 0x28d   :  { %3321 = vmatprep.subr.bf16.mxu0 %v5836_v39  ;;  %v5996_v39 = vld [vmem:[%s8791_s4 + $0x444] ss:$16 sps:$4 sm:$0xff]  }
 0x28f   :  { %3242 = vmatpush1.bf16.msra.mxu1 %v5946_v4  ;;  %v5961_v4 = vld [vmem:[%s8791_s4 + $0x388] ss:$16 sps:$4 sm:$0xff]  }
 0x290   :  { %3243 = vmatprep.subr.bf16.mxu1 %v5954_v17  ;;  %3322 = vmatpush1.bf16.msra.mxu0 %v5834_v61  ;;  %v5994_v17 = vld [vmem:[%s8791_s4 + $0x440] ss:$16 sps:$4 sm:$0xff]   ;;  %v5969_v61 = vld [vmem:[%s8791_s4 + $0x3ac] ss:$16 sps:$4 sm:$0xff]  }
 0x291   :  { %3323 = vmatprep.subr.bf16.mxu0 %v5842_v33  ;;  %v6002_v33 = vld [vmem:[%s8791_s4 + $0x464] ss:$16 sps:$4 sm:$0xff]  }
 0x293   :  { %3244 = vmatpush1.bf16.msra.mxu1 %v5952_v23  ;;  %v5967_v23 = vld [vmem:[%s8791_s4 + $0x3a8] ss:$16 sps:$4 sm:$0xff]  }
 0x294   :  { %3245 = vmatprep.subr.bf16.mxu1 %v5960_v30  ;;  %3324 = vmatpush1.bf16.msra.mxu0 %v5840_v19  ;;  %v6000_v30 = vld [vmem:[%s8791_s4 + $0x460] ss:$16 sps:$4 sm:$0xff]   ;;  %v5975_v19 = vld [vmem:[%s8791_s4 + $0x3cc] ss:$16 sps:$4 sm:$0xff]  }
 0x295   :  { %3325 = vmatprep.subr.bf16.mxu0 %v5848_v47  ;;  %v6008_v47 = vld [vmem:[%s8791_s4 + $0x484] ss:$16 sps:$4 sm:$0xff]  }
 0x297   :  { %3246 = vmatpush1.bf16.msra.mxu1 %v5958_v26  ;;  %v5973_v26 = vld [vmem:[%s8791_s4 + $0x3c8] ss:$16 sps:$4 sm:$0xff]  }
 0x298   :  { %3247 = vmatprep.subr.bf16.mxu1 %v5966_v29  ;;  %3326 = vmatpush1.bf16.msra.mxu0 %v5846_v55  ;;  %v6006_v29 = vld [vmem:[%s8791_s4 + $0x480] ss:$16 sps:$4 sm:$0xff]   ;;  %v5981_v55 = vld [vmem:[%s8791_s4 + $0x3ec] ss:$16 sps:$4 sm:$0xff]  }
 0x299   :  { %3327 = vmatprep.subr.bf16.mxu0 %v5854_v18  ;;  %v6014_v18 = vld [vmem:[%s8791_s4 + $0x4a4] ss:$16 sps:$4 sm:$0xff]  }
 0x29b   :  { %3248 = vmatpush1.bf16.msra.mxu1 %v5964_v46  ;;  %v5979_v46 = vld [vmem:[%s8791_s4 + $0x3e8] ss:$16 sps:$4 sm:$0xff]  }
 0x29c   :  { %3249 = vmatprep.subr.bf16.mxu1 %v5972_v21  ;;  %3328 = vmatpush1.bf16.msra.mxu0 %v5852_v5  ;;  %v6012_v21 = vld [vmem:[%s8791_s4 + $0x4a0] ss:$16 sps:$4 sm:$0xff]   ;;  %v5987_v5 = vld [vmem:[%s8791_s4 + $0x40c] ss:$16 sps:$4 sm:$0xff]  }
 0x29d   :  { %3329 = vmatprep.subr.bf16.mxu0 %v5860_v58  ;;  %v6020_v58 = vld [vmem:[%s8791_s4 + $0x4c4] ss:$16 sps:$4 sm:$0xff]  }
 0x29f   :  { %3250 = vmatpush1.bf16.msra.mxu1 %v5970_v16  ;;  %v5985_v16 = vld [vmem:[%s8791_s4 + $0x408] ss:$16 sps:$4 sm:$0xff]  }
 0x2a0   :  { %3251 = vmatprep.subr.bf16.mxu1 %v5978_v10  ;;  %3330 = vmatpush1.bf16.msra.mxu0 %v5858_v32  ;;  %v6018_v10 = vld [vmem:[%s8791_s4 + $0x4c0] ss:$16 sps:$4 sm:$0xff]   ;;  %v5993_v32 = vld [vmem:[%s8791_s4 + $0x42c] ss:$16 sps:$4 sm:$0xff]  }
 0x2a1   :  { %3331 = vmatprep.subr.bf16.mxu0 %v5866_v1  ;;  %v6026_v1 = vld [vmem:[%s8791_s4 + $0x4e4] ss:$16 sps:$4 sm:$0xff]  }
 0x2a3   :  { %3252 = vmatpush1.bf16.msra.mxu1 %v5976_v27  ;;  %v5991_v27 = vld [vmem:[%s8791_s4 + $0x428] ss:$16 sps:$4 sm:$0xff]  }
 0x2a4   :  { %3264 = vmatprep.subr.bf16.mxu1 %v5984_v34  ;;  %3332 = vmatpush1.bf16.msra.mxu0 %v5864_v37  ;;  %v6024_v34 = vld [vmem:[%s8791_s4 + $0x4e0] ss:$16 sps:$4 sm:$0xff]   ;;  %v5999_v37 = vld [vmem:[%s8791_s4 + $0x44c] ss:$16 sps:$4 sm:$0xff]  }
 0x2a5   :  { %3333 = vmatprep.subr.bf16.mxu0 %v5872_v42  ;;  %v6032_v42 = vld [vmem:[%s8791_s4 + $0x504] ss:$16 sps:$4 sm:$0xff]  }
 0x2a8   :  { %3334 = vmatpush1.bf16.msra.mxu0 %v5870_v24  ;;  %v5997_v24 = vld [vmem:[%s8791_s4 + $0x448] ss:$16 sps:$4 sm:$0xff]  }
 0x2a9   :  { %3335 = vmatprep.subr.bf16.mxu0 %v5878_v59  ;;  %v6030_v59 = vld [vmem:[%s8791_s4 + $0x500] ss:$16 sps:$4 sm:$0xff]  }
 0x2ac   :  { %3336 = vmatpush1.bf16.msra.mxu0 %v5876_v45  ;;  %v6005_v45 = vld [vmem:[%s8791_s4 + $0x46c] ss:$16 sps:$4 sm:$0xff]  }
 0x2ad   :  { %3337 = vmatprep.subr.bf16.mxu0 %v5884_v31  ;;  %v6038_v31 = vld [vmem:[%s8791_s4 + $0x524] ss:$16 sps:$4 sm:$0xff]  }
 0x2b0   :  { %3338 = vmatpush1.bf16.msra.mxu0 %v5882_v49  ;;  %v6003_v49 = vld [vmem:[%s8791_s4 + $0x468] ss:$16 sps:$4 sm:$0xff]  }
 0x2b1   :  { %3350 = vmatprep.subr.bf16.mxu0 %v5891_v3  ;;  %v6036_v3 = vld [vmem:[%s8791_s4 + $0x520] ss:$16 sps:$4 sm:$0xff]  }
 0x2b3   :  { %3340 = vmatmul.mubr.bf16.vlgmr.msra.gmra.mrb[12].mxu0 %v7816_v14  ;;  %v5909_v14 = vld [vmem:[%s8791_s4 + $0x26c] ss:$16 sps:$4 sm:$0xff]  }
 0x2b4   :  { %3351 = vmatpush1.bf16.msra.mxu0 %v5889_v35  ;;  %v6011_v35 = vld [vmem:[%s8791_s4 + $0x48c] ss:$16 sps:$4 sm:$0xff]  }
 0x2b5   :  { %3352 = vmatprep.subr.bf16.mxu0 %v5897_v20  ;;  %v6044_v20 = vld [vmem:[%s8791_s4 + $0x544] ss:$16 sps:$4 sm:$0xff]  }
 0x2b8   :  { %3353 = vmatpush1.bf16.msra.mxu0 %v5895_v44  ;;  %v6009_v44 = vld [vmem:[%s8791_s4 + $0x488] ss:$16 sps:$4 sm:$0xff]  }
 0x2b9   :  { %3354 = vmatprep.subr.bf16.mxu0 %v5903_v51  ;;  %v6042_v51 = vld [vmem:[%s8791_s4 + $0x540] ss:$16 sps:$4 sm:$0xff]  }
 0x2bc   :  { %3355 = vmatpush1.bf16.msra.mxu0 %v5901_v54  ;;  %v6017_v54 = vld [vmem:[%s8791_s4 + $0x4ac] ss:$16 sps:$4 sm:$0xff]  }
 0x2bd   :  { %3356 = vmatprep.subr.bf16.mxu0 %v5909_v14  ;;  %v6050_v14 = vld [vmem:[%s8791_s4 + $0x564] ss:$16 sps:$4 sm:$0xff]  }
 0x2c0   :  { %3357 = vmatpush1.bf16.msra.mxu0 %v5907_v57  ;;  %v6015_v57 = vld [vmem:[%s8791_s4 + $0x4a8] ss:$16 sps:$4 sm:$0xff]  }
 0x2c1   :  { %3358 = vmatprep.subr.bf16.mxu0 %v5915_v9  ;;  %v6048_v9 = vld [vmem:[%s8791_s4 + $0x560] ss:$16 sps:$4 sm:$0xff]  }
 0x2c4   :  { %3359 = vmatpush1.bf16.msra.mxu0 %v5913_v25  ;;  %v6023_v25 = vld [vmem:[%s8791_s4 + $0x4cc] ss:$16 sps:$4 sm:$0xff]  }
 0x2c5   :  { %3360 = vmatprep.subr.bf16.mxu0 %v5921_v22  ;;  %v6056_v22 = vld [vmem:[%s8791_s4 + $0x584] ss:$16 sps:$4 sm:$0xff]  }
 0x2c8   :  { %3361 = vmatpush1.bf16.msra.mxu0 %v5919_v11  ;;  %v6021_v11 = vld [vmem:[%s8791_s4 + $0x4c8] ss:$16 sps:$4 sm:$0xff]  }
 0x2c9   :  { %3362 = vmatprep.subr.bf16.mxu0 %v5927_v60  ;;  %v6054_v60 = vld [vmem:[%s8791_s4 + $0x580] ss:$16 sps:$4 sm:$0xff]  }
 0x2cc   :  { %3363 = vmatpush1.bf16.msra.mxu0 %v5925_v56  ;;  %v6029_v56 = vld [vmem:[%s8791_s4 + $0x4ec] ss:$16 sps:$4 sm:$0xff]  }
 0x2cd   :  { %3364 = vmatprep.subr.bf16.mxu0 %v5933_v12  ;;  %v6062_v12 = vld [vmem:[%s8791_s4 + $0x5a4] ss:$16 sps:$4 sm:$0xff]  }
 0x2d0   :  { %3365 = vmatpush1.bf16.msra.mxu0 %v5931_v7  ;;  %v6027_v7 = vld [vmem:[%s8791_s4 + $0x4e8] ss:$16 sps:$4 sm:$0xff]  }
 0x2d1   :  { %3366 = vmatprep.subr.bf16.mxu0 %v5939_v2  ;;  %v6060_v2 = vld [vmem:[%s8791_s4 + $0x5a0] ss:$16 sps:$4 sm:$0xff]  }
 0x2d4   :  { %3367 = vmatpush1.bf16.msra.mxu0 %v5937_v8  ;;  %v6035_v8 = vld [vmem:[%s8791_s4 + $0x50c] ss:$16 sps:$4 sm:$0xff]  }
 0x2d5   :  { %v2160_v43 = vpop.f32.mrb[4].mxu0  ;;  %3368 = vmatprep.subr.bf16.mxu0 %v5945_v0  ;;  %v6068_v0 = vld [vmem:[%s8791_s4 + $0x5c4] ss:$16 sps:$4 sm:$0xff]  }
 0x2d6   :  { %v2162_v13 = vpop.f32.mrb[5].mxu0 }
 0x2d7   :  { %v2164_v48 = vpop.f32.mrb[6].mxu0 }
 0x2d8   :  { %v2214_v52 = vpack.c.bf16 %v2164_v48, %v2160_v43  ;;  %v2166_v62 = vpop.f32.mrb[7].mxu0  ;;  %3369 = vmatpush1.bf16.msra.mxu0 %v5943_v53  ;;  %v6033_v53 = vld [vmem:[%s8791_s4 + $0x508] ss:$16 sps:$4 sm:$0xff]   ;;  %v6066_v43 = vld [vmem:[%s8791_s4 + $0x5c0] ss:$16 sps:$4 sm:$0xff]  }
 0x2d9   :  { %v2215_v63 = vpack.c.bf16 %v2166_v62, %v2162_v13  ;;  %3370 = vmatprep.subr.bf16.mxu0 %v5951_v6  ;;  %v6041_v6 = vld [vmem:[%s8791_s4 + $0x52c] ss:$16 sps:$4 sm:$0xff]   ;;  %v6074_v13 = vld [vmem:[%s8791_s4 + $0x5e4] ss:$16 sps:$4 sm:$0xff]   ;;  %v6039_v48 = vld [vmem:[%s8791_s4 + $0x528] ss:$16 sps:$4 sm:$0xff]  }
 0x2da   :  { %v6047_v62 = vld [vmem:[%s8791_s4 + $0x54c] ss:$16 sps:$4 sm:$0xff]  }
 0x2db   :  { %3253 = vmatprep.mubr.bf16.mxu1 %v2215_v63  ;;  %3382 = vmatprep.mubr.bf16.mxu0 %v2215_v63  ;;  %v6045_v63 = vld [vmem:[%s8791_s4 + $0x548] ss:$16 sps:$4 sm:$0xff]  }
 0x2dc   :  { %3254 = vmatmul.mubr.bf16.vlgmr.msra.gmra.mrb[0].mxu1 %v2214_v52  ;;  %3371 = vmatpush1.bf16.msra.mxu0 %v5949_v41  ;;  %v6078_v41 = vld [vmem:[%s8792_s5 + $0x40] sm:$0xff]  }
 0x2dd   :  { %3265 = vmatpush1.bf16.msra.mxu1 %v5982_v28  ;;  %3372 = vmatprep.subr.bf16.mxu0 %v5957_v50  ;;  %v6053_v28 = vld [vmem:[%s8791_s4 + $0x56c] ss:$16 sps:$4 sm:$0xff]   ;;  %v6051_v50 = vld [vmem:[%s8791_s4 + $0x568] ss:$16 sps:$4 sm:$0xff]  }
 0x2de   :  { %3266 = vmatprep.subr.bf16.mxu1 %v5990_v40  ;;  %v6059_v40 = vld [vmem:[%s8791_s4 + $0x58c] ss:$16 sps:$4 sm:$0xff]  }
 0x2e0   :  { %3373 = vmatpush1.bf16.msra.mxu0 %v5955_v38  ;;  %v6057_v38 = vld [vmem:[%s8791_s4 + $0x588] ss:$16 sps:$4 sm:$0xff]  }
 0x2e1   :  { %3267 = vmatpush1.bf16.msra.mxu1 %v5988_v15  ;;  %3374 = vmatprep.subr.bf16.mxu0 %v5963_v36  ;;  %v6065_v15 = vld [vmem:[%s8791_s4 + $0x5ac] ss:$16 sps:$4 sm:$0xff]   ;;  %v6063_v36 = vld [vmem:[%s8791_s4 + $0x5a8] ss:$16 sps:$4 sm:$0xff]  }
 0x2e2   :  { %3268 = vmatprep.subr.bf16.mxu1 %v5996_v39  ;;  %v6071_v39 = vld [vmem:[%s8791_s4 + $0x5cc] ss:$16 sps:$4 sm:$0xff]  }
 0x2e4   :  { %3375 = vmatpush1.bf16.msra.mxu0 %v5961_v4  ;;  %v6069_v4 = vld [vmem:[%s8791_s4 + $0x5c8] ss:$16 sps:$4 sm:$0xff]  }
 0x2e5   :  { %3269 = vmatpush1.bf16.msra.mxu1 %v5994_v17  ;;  %3376 = vmatprep.subr.bf16.mxu0 %v5969_v61  ;;  %v6077_v17 = vld [vmem:[%s8791_s4 + $0x5ec] ss:$16 sps:$4 sm:$0xff]   ;;  %v6075_v61 = vld [vmem:[%s8791_s4 + $0x5e8] ss:$16 sps:$4 sm:$0xff]  }
 0x2e6   :  { %3270 = vmatprep.subr.bf16.mxu1 %v6002_v33  ;;  %v6079_v33 = vld [vmem:[%s8792_s5 + $0xc0] sm:$0xff]  }
 0x2e8   :  { %3377 = vmatpush1.bf16.msra.mxu0 %v5967_v23 }
 0x2e9   :  { %3271 = vmatpush1.bf16.msra.mxu1 %v6000_v30  ;;  %3378 = vmatprep.subr.bf16.mxu0 %v5975_v19 }
 0x2ea   :  { %3272 = vmatprep.subr.bf16.mxu1 %v6008_v47 }
 0x2ec   :  { %3379 = vmatpush1.bf16.msra.mxu0 %v5973_v26 }
 0x2ed   :  { %3273 = vmatpush1.bf16.msra.mxu1 %v6006_v29  ;;  %3380 = vmatprep.subr.bf16.mxu0 %v5981_v55  ;;  %v6080_v55 = vld [vmem:[%s8792_s5] sm:$0xff]  }
 0x2ee   :  { %3274 = vmatprep.subr.bf16.mxu1 %v6014_v18  ;;  %v6081_v18 = vld [vmem:[%s8792_s5 + $0x80] sm:$0xff]  }
 0x2f0   :  { %3381 = vmatpush1.bf16.msra.mxu0 %v5979_v46  ;;  %v6082_v46 = vld [vmem:[%s8792_s5 + $0x48] sm:$0xff]  }
 0x2f1   :  { %3275 = vmatpush1.bf16.msra.mxu1 %v6012_v21  ;;  %3393 = vmatprep.subr.bf16.mxu0 %v5987_v5  ;;  %v6083_v21 = vld [vmem:[%s8792_s5 + $0xc8] sm:$0xff]  }
 0x2f2   :  { %3276 = vmatprep.subr.bf16.mxu1 %v6020_v58  ;;  %v6084_v5 = vld [vmem:[%s8792_s5 + $0x8] sm:$0xff]  }
 0x2f3   :  { %3383 = vmatmul.mubr.bf16.vlgmr.msra.gmra.mrb[12].mxu0 %v2214_v52  ;;  %v6072_v52 = vld [vmem:[%s8791_s4 + $0x5e0] ss:$16 sps:$4 sm:$0xff]   ;;  %v6085_v58 = vld [vmem:[%s8792_s5 + $0x88] sm:$0xff]  }
 0x2f4   :  { %3394 = vmatpush1.bf16.msra.mxu0 %v5985_v16  ;;  %v6086_v16 = vld [vmem:[%s8792_s5 + $0x50] sm:$0xff]  }
 0x2f5   :  { %3277 = vmatpush1.bf16.msra.mxu1 %v6018_v10  ;;  %3395 = vmatprep.subr.bf16.mxu0 %v5993_v32  ;;  %v6087_v10 = vld [vmem:[%s8792_s5 + $0xd0] sm:$0xff]  }
 0x2f6   :  { %3278 = vmatprep.subr.bf16.mxu1 %v6026_v1  ;;  %v6088_v32 = vld [vmem:[%s8792_s5 + $0x10] sm:$0xff]  }
 0x2f7   :  { %v6089_v1 = vld [vmem:[%s8792_s5 + $0x90] sm:$0xff]  }
 0x2f8   :  { %3396 = vmatpush1.bf16.msra.mxu0 %v5991_v27  ;;  %v6090_v27 = vld [vmem:[%s8792_s5 + $0x58] sm:$0xff]  }
 0x2f9   :  { %3279 = vmatpush1.bf16.msra.mxu1 %v6024_v34  ;;  %3397 = vmatprep.subr.bf16.mxu0 %v5999_v37  ;;  %v6091_v34 = vld [vmem:[%s8792_s5 + $0xd8] sm:$0xff]  }
 0x2fa   :  { %3280 = vmatprep.subr.bf16.mxu1 %v6032_v42  ;;  %v6092_v37 = vld [vmem:[%s8792_s5 + $0x18] sm:$0xff]  }
 0x2fb   :  { %v6093_v42 = vld [vmem:[%s8792_s5 + $0x98] sm:$0xff]  }
 0x2fc   :  { %3398 = vmatpush1.bf16.msra.mxu0 %v5997_v24  ;;  %v6094_v24 = vld [vmem:[%s8792_s5 + $0x60] sm:$0xff]  }
 0x2fd   :  { %3281 = vmatpush1.bf16.msra.mxu1 %v6030_v59  ;;  %3399 = vmatprep.subr.bf16.mxu0 %v6005_v45  ;;  %v6095_v59 = vld [vmem:[%s8792_s5 + $0xe0] sm:$0xff]  }
 0x2fe   :  { %3282 = vmatprep.subr.bf16.mxu1 %v6038_v31  ;;  %v6096_v45 = vld [vmem:[%s8792_s5 + $0x20] sm:$0xff]  }
 0x2ff   :  { %v6097_v31 = vld [vmem:[%s8792_s5 + $0xa0] sm:$0xff]  }
 0x300   :  { %3400 = vmatpush1.bf16.msra.mxu0 %v6003_v49  ;;  %v6098_v49 = vld [vmem:[%s8792_s5 + $0x68] sm:$0xff]  }
 0x301   :  { %3283 = vmatpush1.bf16.msra.mxu1 %v6036_v3  ;;  %3401 = vmatprep.subr.bf16.mxu0 %v6011_v35  ;;  %v6099_v3 = vld [vmem:[%s8792_s5 + $0xe8] sm:$0xff]  }
 0x302   :  { %3284 = vmatprep.subr.bf16.mxu1 %v6044_v20  ;;  %v6100_v35 = vld [vmem:[%s8792_s5 + $0x28] sm:$0xff]  }
 0x303   :  { %v6101_v20 = vld [vmem:[%s8792_s5 + $0xa8] sm:$0xff]  }
 0x304   :  { %3402 = vmatpush1.bf16.msra.mxu0 %v6009_v44  ;;  %v6102_v44 = vld [vmem:[%s8792_s5 + $0x70] sm:$0xff]  }
 0x305   :  { %3285 = vmatpush1.bf16.msra.mxu1 %v6042_v51  ;;  %3403 = vmatprep.subr.bf16.mxu0 %v6017_v54  ;;  %v6103_v51 = vld [vmem:[%s8792_s5 + $0xf0] sm:$0xff]  }
 0x306   :  { %3286 = vmatprep.subr.bf16.mxu1 %v6050_v14  ;;  %v6104_v54 = vld [vmem:[%s8792_s5 + $0x30] sm:$0xff]  }
 0x307   :  { %v6105_v14 = vld [vmem:[%s8792_s5 + $0xb0] sm:$0xff]  }
 0x308   :  { %3404 = vmatpush1.bf16.msra.mxu0 %v6015_v57  ;;  %v6106_v57 = vld [vmem:[%s8792_s5 + $0x78] sm:$0xff]  }
 0x309   :  { %3287 = vmatpush1.bf16.msra.mxu1 %v6048_v9  ;;  %3405 = vmatprep.subr.bf16.mxu0 %v6023_v25  ;;  %v6107_v9 = vld [vmem:[%s8792_s5 + $0xf8] sm:$0xff]  }
 0x30a   :  { %3288 = vmatprep.subr.bf16.mxu1 %v6056_v22  ;;  %v6108_v25 = vld [vmem:[%s8792_s5 + $0x38] sm:$0xff]  }
 0x30b   :  { %v6109_v22 = vld [vmem:[%s8792_s5 + $0xb8] sm:$0xff]  }
 0x30c   :  { %3406 = vmatpush1.bf16.msra.mxu0 %v6021_v11  ;;  %v6112_v11 = vld [vmem:[%s8792_s5 + $0x140] sm:$0xff]  }
 0x30d   :  { %3289 = vmatpush1.bf16.msra.mxu1 %v6054_v60  ;;  %3407 = vmatprep.subr.bf16.mxu0 %v6029_v56  ;;  %v6113_v60 = vld [vmem:[%s8792_s5 + $0x1c0] sm:$0xff]  }
 0x30e   :  { %3290 = vmatprep.subr.bf16.mxu1 %v6062_v12 }
 0x310   :  { %3408 = vmatpush1.bf16.msra.mxu0 %v6027_v7 }
 0x311   :  { %3291 = vmatpush1.bf16.msra.mxu1 %v6060_v2  ;;  %3409 = vmatprep.subr.bf16.mxu0 %v6035_v8 }
 0x312   :  { %3292 = vmatprep.subr.bf16.mxu1 %v6068_v0 }
 0x314   :  { %3410 = vmatpush1.bf16.msra.mxu0 %v6033_v53 }
 0x315   :  { %3293 = vmatpush1.bf16.msra.mxu1 %v6066_v43  ;;  %3411 = vmatprep.subr.bf16.mxu0 %v6041_v6 }
 0x316   :  { %3294 = vmatprep.subr.bf16.mxu1 %v6074_v13 }
 0x318   :  { %3412 = vmatpush1.bf16.msra.mxu0 %v6039_v48 }
 0x319   :  { %3295 = vmatpush1.bf16.msra.mxu1 %v6072_v52  ;;  %3413 = vmatprep.subr.bf16.mxu0 %v6047_v62 }
 0x31a   :  { %5505 = vmatprep.subr.bf16.mxu1 %v6078_v41 }
 0x31c   :  { %3414 = vmatpush1.bf16.msra.mxu0 %v6045_v63 }
 0x31d   :  { %3415 = vmatprep.subr.bf16.mxu0 %v6053_v28 }
 0x320   :  { %3416 = vmatpush1.bf16.msra.mxu0 %v6051_v50 }
 0x321   :  { %3417 = vmatprep.subr.bf16.mxu0 %v6059_v40 }
 0x324   :  { %3418 = vmatpush1.bf16.msra.mxu0 %v6057_v38 }
 0x325   :  { %3419 = vmatprep.subr.bf16.mxu0 %v6065_v15 }
 0x328   :  { %3420 = vmatpush1.bf16.msra.mxu0 %v6063_v36 }
 0x329   :  { %3421 = vmatprep.subr.bf16.mxu0 %v6071_v39 }
 0x32c   :  { %3422 = vmatpush1.bf16.msra.mxu0 %v6069_v4 }
 0x32d   :  { %3423 = vmatprep.subr.bf16.mxu0 %v6077_v17 }
 0x330   :  { %3424 = vmatpush1.bf16.msra.mxu0 %v6075_v61 }
 0x331   :  { %5527 = vmatprep.subr.bf16.mxu0 %v6079_v33 }
 0x346   :  { %v2203_v23 = vpop.f32.mrb[8].mxu0 }
 0x347   :  { %v2205_v30 = vpop.f32.mrb[9].mxu0 }
 0x348   :  { %v2207_v19 = vpop.f32.mrb[10].mxu0 }
 0x349   :  { %v2216_v47 = vpack.c.bf16 %v2207_v19, %v2203_v23  ;;  %v2209_v26 = vpop.f32.mrb[11].mxu0 }
 0x34a   :  { %v2217_v29 = vpack.c.bf16 %v2209_v26, %v2205_v30 }
 0x34c   :  { %3296 = vmatprep.mubr.bf16.mxu1 %v2217_v29  ;;  %3425 = vmatprep.mubr.bf16.mxu0 %v2217_v29 }
 0x34d   :  { %3297 = vmatmul.mubr.bf16.vlgmr.msra.gmra.mrb[0].mxu1 %v2216_v47  ;;  %3426 = vmatmul.mubr.bf16.vlgmr.msra.gmra.mrb[12].mxu0 %v2216_v47 }
 0x34e   :  { %5506 = vmatpush3.bf16.msra.mxu1 %v6080_v55  ;;  %5528 = vmatpush3.bf16.msra.mxu0 %v6081_v18 }
 0x34f   :  { %5507 = vmatprep.subr.bf16.mxu1 %v6082_v46  ;;  %5529 = vmatprep.subr.bf16.mxu0 %v6083_v21 }
 0x352   :  { %5508 = vmatpush3.bf16.msra.mxu1 %v6084_v5  ;;  %5530 = vmatpush3.bf16.msra.mxu0 %v6085_v58 }
 0x353   :  { %5509 = vmatprep.subr.bf16.mxu1 %v6086_v16  ;;  %5531 = vmatprep.subr.bf16.mxu0 %v6087_v10 }
 0x356   :  { %5510 = vmatpush3.bf16.msra.mxu1 %v6088_v32  ;;  %5532 = vmatpush3.bf16.msra.mxu0 %v6089_v1 }
 0x357   :  { %5511 = vmatprep.subr.bf16.mxu1 %v6090_v27  ;;  %5533 = vmatprep.subr.bf16.mxu0 %v6091_v34 }
 0x35a   :  { %5512 = vmatpush3.bf16.msra.mxu1 %v6092_v37  ;;  %5534 = vmatpush3.bf16.msra.mxu0 %v6093_v42 }
 0x35b   :  { %5513 = vmatprep.subr.bf16.mxu1 %v6094_v24  ;;  %5535 = vmatprep.subr.bf16.mxu0 %v6095_v59 }
 0x35e   :  { %5514 = vmatpush3.bf16.msra.mxu1 %v6096_v45  ;;  %5536 = vmatpush3.bf16.msra.mxu0 %v6097_v31 }
 0x35f   :  { %5515 = vmatprep.subr.bf16.mxu1 %v6098_v49  ;;  %5537 = vmatprep.subr.bf16.mxu0 %v6099_v3 }
 0x362   :  { %5516 = vmatpush3.bf16.msra.mxu1 %v6100_v35  ;;  %5538 = vmatpush3.bf16.msra.mxu0 %v6101_v20 }
 0x363   :  { %5517 = vmatprep.subr.bf16.mxu1 %v6102_v44  ;;  %5539 = vmatprep.subr.bf16.mxu0 %v6103_v51 }
 0x366   :  { %5518 = vmatpush3.bf16.msra.mxu1 %v6104_v54  ;;  %5540 = vmatpush3.bf16.msra.mxu0 %v6105_v14 }
 0x367   :  { %5519 = vmatprep.subr.bf16.mxu1 %v6106_v57  ;;  %5541 = vmatprep.subr.bf16.mxu0 %v6107_v9 }
 0x36a   :  { %5520 = vmatpush3.bf16.msra.mxu1 %v6108_v25  ;;  %5542 = vmatpush3.bf16.msra.mxu0 %v6109_v22 }
 0x36b   :  { %5549 = vmatprep.subr.bf16.mxu1 %v6112_v11  ;;  %5571 = vmatprep.subr.bf16.mxu0 %v6113_v60 }
 0x420   :  { %v3298_v56 = vpop.f32.mrb[0].mxu1  ;;  %v3427_v12 = vpop.f32.mrb[12].mxu0 }
 0x421   :  { %3436 = vst [vmem:[#allocation3] sm:$0x1] %v3298_v56  ;;  %v5339_v7 = vrot.slane %v3298_v56, 9  ;;  %v5340_v2 = vrot.slane %v3298_v56, 10  ;;  %v5341_v8 = vrot.slane %v3298_v56, 11  ;;  %v3450_v0 = vcombine.high %v3298_v56, %v3298_v56  ;;  %v3300_v53 = vpop.f32.mrb[1].mxu1 }
 0x422   :  { %3544 = vst [vmem:[#allocation3 + $0x2] sm:$0x1] %v3427_v12  ;;  %v3429_v43 = vpop.f32.mrb[13].mxu0  ;;  %v5361_v6 = vrot.slane %v3427_v12, 9  ;;  %v5362_v13 = vrot.slane %v3427_v12, 10  ;;  %v5363_v48 = vrot.slane %v3427_v12, 11  ;;  %v3558_v52 = vcombine.high %v3427_v12, %v3427_v12 }
 0x423   :  { %3490 = vst [vmem:[#allocation3 + $0x1] sm:$0x1] %v3300_v53  ;;  %3598 = vst [vmem:[#allocation3 + $0x3] sm:$0x1] %v3429_v43  ;;  %v3302_v62 = vpop.f32.mrb[2].mxu1  ;;  %v8406_v41 = vpop.f32.mrb[14].mxu0  ;;  %v3504_v33 = vcombine.high %v3300_v53, %v3300_v53  ;;  %v3612_v47 = vcombine.high %v3429_v43, %v3429_v43 }
 0x424   :  { %3441 = vst [vmem:[#allocation3 + $0x4] sm:$0x1] %v5339_v7  ;;  %3445 = vst [vmem:[#allocation3 + $0x8] sm:$0x1] %v5340_v2  ;;  %v5342_v63 = vrot.slane %v3450_v0, 9  ;;  %v5343_v28 = vrot.slane %v3450_v0, 10  ;;  %v3479_v10 = vcombine.high %v3302_v62, %v3302_v62  ;;  %v3587_v34 = vcombine.high %v8406_v41, %v8406_v41 }
 0x425   :  { %3449 = vst [vmem:[#allocation3 + $0xc] sm:$0x1] %v5341_v8  ;;  %3452 = vst [vmem:[#allocation3 + $0x10] sm:$0x1] %v3450_v0  ;;  %v5344_v50 = vrot.slane %v3450_v0, 11  ;;  %v5350_v40 = vrot.slane %v3300_v53, 9 }
 0x426   :  { %3465 = vst [vmem:[#allocation3 + $0x20] sm:$0x1] %v3302_v62  ;;  %3573 = vst [vmem:[#allocation3 + $0x22] sm:$0x1] %v8406_v41  ;;  %v8409_v38 = vpop.f32.mrb[3].mxu1  ;;  %v8411_v15 = vpop.f32.mrb[15].mxu0 }
 0x427   :  { %3549 = vst [vmem:[#allocation3 + $0x6] sm:$0x1] %v5361_v6  ;;  %3553 = vst [vmem:[#allocation3 + $0xa] sm:$0x1] %v5362_v13  ;;  %v5364_v36 = vrot.slane %v3558_v52, 9  ;;  %v5365_v39 = vrot.slane %v3558_v52, 10  ;;  %v3533_v3 = vcombine.high %v8409_v38, %v8409_v38  ;;  %v3641_v51 = vcombine.high %v8411_v15, %v8411_v15 }
 0x428   :  { %3557 = vst [vmem:[#allocation3 + $0xe] sm:$0x1] %v5363_v48  ;;  %3560 = vst [vmem:[#allocation3 + $0x12] sm:$0x1] %v3558_v52  ;;  %v5366_v4 = vrot.slane %v3558_v52, 11  ;;  %v5351_v17 = vrot.slane %v3300_v53, 10 }
 0x429   :  { %3519 = vst [vmem:[#allocation3 + $0x21] sm:$0x1] %v8409_v38  ;;  %3627 = vst [vmem:[#allocation3 + $0x23] sm:$0x1] %v8411_v15  ;;  %v5352_v61 = vrot.slane %v3300_v53, 11  ;;  %v5372_v23 = vrot.slane %v3429_v43, 9 }
 0x42a   :  { %3456 = vst [vmem:[#allocation3 + $0x14] sm:$0x1] %v5342_v63  ;;  %3460 = vst [vmem:[#allocation3 + $0x18] sm:$0x1] %v5343_v28  ;;  %v5373_v30 = vrot.slane %v3429_v43, 10  ;;  %v5374_v19 = vrot.slane %v3429_v43, 11 }
 0x42b   :  { %3464 = vst [vmem:[#allocation3 + $0x1c] sm:$0x1] %v5344_v50  ;;  %3495 = vst [vmem:[#allocation3 + $0x5] sm:$0x1] %v5350_v40  ;;  %v5345_v26 = vrot.slane %v3302_v62, 9  ;;  %v5346_v29 = vrot.slane %v3302_v62, 10 }
 0x42c   :  { %3564 = vst [vmem:[#allocation3 + $0x16] sm:$0x1] %v5364_v36  ;;  %3568 = vst [vmem:[#allocation3 + $0x1a] sm:$0x1] %v5365_v39  ;;  %v5353_v55 = vrot.slane %v3504_v33, 9  ;;  %v5354_v18 = vrot.slane %v3504_v33, 10 }
 0x42d   :  { %3572 = vst [vmem:[#allocation3 + $0x1e] sm:$0x1] %v5366_v4  ;;  %3499 = vst [vmem:[#allocation3 + $0x9] sm:$0x1] %v5351_v17  ;;  %v5355_v46 = vrot.slane %v3504_v33, 11  ;;  %v5347_v21 = vrot.slane %v3302_v62, 11 }
 0x42e   :  { %3503 = vst [vmem:[#allocation3 + $0xd] sm:$0x1] %v5352_v61  ;;  %3506 = vst [vmem:[#allocation3 + $0x11] sm:$0x1] %v3504_v33  ;;  %v5375_v5 = vrot.slane %v3612_v47, 9  ;;  %v5376_v58 = vrot.slane %v3612_v47, 10 }
 0x42f   :  { %3603 = vst [vmem:[#allocation3 + $0x7] sm:$0x1] %v5372_v23  ;;  %3607 = vst [vmem:[#allocation3 + $0xb] sm:$0x1] %v5373_v30  ;;  %v5377_v16 = vrot.slane %v3612_v47, 11  ;;  %v5367_v32 = vrot.slane %v8406_v41, 9 }
 0x430   :  { %3611 = vst [vmem:[#allocation3 + $0xf] sm:$0x1] %v5374_v19  ;;  %3614 = vst [vmem:[#allocation3 + $0x13] sm:$0x1] %v3612_v47  ;;  %v5368_v1 = vrot.slane %v8406_v41, 10  ;;  %v5369_v27 = vrot.slane %v8406_v41, 11 }
 0x431   :  { %3470 = vst [vmem:[#allocation3 + $0x24] sm:$0x1] %v5345_v26  ;;  %3474 = vst [vmem:[#allocation3 + $0x28] sm:$0x1] %v5346_v29  ;;  %v5348_v37 = vrot.slane %v3479_v10, 9  ;;  %v5349_v42 = vrot.slane %v3479_v10, 10 }
 0x432   :  { %3510 = vst [vmem:[#allocation3 + $0x15] sm:$0x1] %v5353_v55  ;;  %3514 = vst [vmem:[#allocation3 + $0x19] sm:$0x1] %v5354_v18  ;;  %v5356_v24 = vrot.slane %v8409_v38, 9  ;;  %v5357_v59 = vrot.slane %v8409_v38, 10 }
 0x433   :  { %3518 = vst [vmem:[#allocation3 + $0x1d] sm:$0x1] %v5355_v46  ;;  %3478 = vst [vmem:[#allocation3 + $0x2c] sm:$0x1] %v5347_v21  ;;  %v5370_v45 = vrot.slane %v3587_v34, 9  ;;  %v5371_v31 = vrot.slane %v3587_v34, 10 }
 0x434   :  { %3618 = vst [vmem:[#allocation3 + $0x17] sm:$0x1] %v5375_v5  ;;  %3622 = vst [vmem:[#allocation3 + $0x1b] sm:$0x1] %v5376_v58  ;;  %v5358_v49 = vrot.slane %v8409_v38, 11  ;;  %v5378_v35 = vrot.slane %v8411_v15, 9 }
 0x435   :  { %3626 = vst [vmem:[#allocation3 + $0x1f] sm:$0x1] %v5377_v16  ;;  %3481 = vst [vmem:[#allocation3 + $0x30] sm:$0x1] %v3479_v10  ;;  %v5379_v20 = vrot.slane %v8411_v15, 10  ;;  %v5380_v44 = vrot.slane %v8411_v15, 11 }
 0x436   :  { %3578 = vst [vmem:[#allocation3 + $0x26] sm:$0x1] %v5367_v32  ;;  %3582 = vst [vmem:[#allocation3 + $0x2a] sm:$0x1] %v5368_v1  ;;  %v5359_v54 = vrot.slane %v3533_v3, 9  ;;  %v5360_v14 = vrot.slane %v3533_v3, 10 }
 0x437   :  { %3586 = vst [vmem:[#allocation3 + $0x2e] sm:$0x1] %v5369_v27  ;;  %3589 = vst [vmem:[#allocation3 + $0x32] sm:$0x1] %v3587_v34  ;;  %v5381_v57 = vrot.slane %v3641_v51, 9  ;;  %v5382_v9 = vrot.slane %v3641_v51, 10 }
 0x438   :  { %3485 = vst [vmem:[#allocation3 + $0x34] sm:$0x1] %v5348_v37  ;;  %3489 = vst [vmem:[#allocation3 + $0x38] sm:$0x1] %v5349_v42  ;;  %v3652_v25 = vld [vmem:[#allocation3] sm:$0xff]  ;;  %v3653_v11 = vld [vmem:[#allocation3 + $0x8] sm:$0xff] }
 0x439   :  { %3524 = vst [vmem:[#allocation3 + $0x25] sm:$0x1] %v5356_v24  ;;  %3528 = vst [vmem:[#allocation3 + $0x29] sm:$0x1] %v5357_v59  ;;  %v3667_v22 = vcombine.high %v3652_v25, %v3652_v25  ;;  %v3668_v60 = vcombine.high %v3653_v11, %v3653_v11  ;;  %v6114_v12 = vld [vmem:[%s8792_s5 + $0x100] sm:$0xff]   ;;  %v3681_v8 = vpack.c.bf16 %v3652_v25, %v3652_v25  ;;  %v6118_v48 = vld [vmem:[%s8792_s5 + $0x148] sm:$0xff]  }
 0x43a   :  { %3593 = vst [vmem:[#allocation3 + $0x36] sm:$0x1] %v5370_v45  ;;  %3597 = vst [vmem:[#allocation3 + $0x3a] sm:$0x1] %v5371_v31  ;;  %v6115_v53 = vld [vmem:[%s8792_s5 + $0x180] sm:$0xff]   ;;  %v3683_v13 = vpack.c.bf16 %v3653_v11, %v3653_v11  ;;  %v6119_v41 = vld [vmem:[%s8792_s5 + $0x1c8] sm:$0xff]  }
 0x43b   :  { %3532 = vst [vmem:[#allocation3 + $0x2d] sm:$0x1] %v5358_v49  ;;  %3535 = vst [vmem:[#allocation3 + $0x31] sm:$0x1] %v3533_v3  ;;  %v3682_v56 = vpack.c.bf16 %v3667_v22, %v3667_v22  ;;  %v8433_v7 = vld [vmem:[#allocation3 + $0x10] sm:$0xff]  ;;  %v3684_v0 = vpack.c.bf16 %v3668_v60, %v3668_v60  ;;  %v6120_v63 = vld [vmem:[%s8792_s5 + $0x108] sm:$0xff]  }
 0x43c   :  { %3632 = vst [vmem:[#allocation3 + $0x27] sm:$0x1] %v5378_v35  ;;  %3636 = vst [vmem:[#allocation3 + $0x2b] sm:$0x1] %v5379_v20  ;;  %v8435_v2 = vld [vmem:[#allocation3 + $0x18] sm:$0xff]  ;;  %v3669_v43 = vcombine.high %v8433_v7, %v8433_v7  ;;  %v6121_v28 = vld [vmem:[%s8792_s5 + $0x188] sm:$0xff]   ;;  %v3685_v59 = vpack.c.bf16 %v8433_v7, %v8433_v7 }
 0x43d   :  { %3640 = vst [vmem:[#allocation3 + $0x2f] sm:$0x1] %v5380_v44  ;;  %3643 = vst [vmem:[#allocation3 + $0x33] sm:$0x1] %v3641_v51  ;;  %v3670_v6 = vcombine.high %v8435_v2, %v8435_v2  ;;  %4695 = vmatprep.mubr.bf16.mxu1 %v3682_v56  ;;  %4735 = vmatprep.mubr.bf16.mxu0 %v3684_v0  ;;  %v6122_v50 = vld [vmem:[%s8792_s5 + $0x150] sm:$0xff]   ;;  %v6126_v36 = vld [vmem:[%s8792_s5 + $0x158] sm:$0xff]   ;;  %v3687_v31 = vpack.c.bf16 %v8435_v2, %v8435_v2 }
 0x43e   :  { %3539 = vst [vmem:[#allocation3 + $0x35] sm:$0x1] %v5359_v54  ;;  %3543 = vst [vmem:[#allocation3 + $0x39] sm:$0x1] %v5360_v14  ;;  %4696 = vmatmul.mubr.bf16.vlgmr.msra.gmra.mrb[4].mxu1 %v3681_v8  ;;  %v3686_v52 = vpack.c.bf16 %v3669_v43, %v3669_v43  ;;  %4736 = vmatmul.mubr.bf16.vlgmr.msra.gmra.mrb[16].mxu0 %v3683_v13  ;;  %v6123_v40 = vld [vmem:[%s8792_s5 + $0x1d0] sm:$0xff]   ;;  %v6127_v39 = vld [vmem:[%s8792_s5 + $0x1d8] sm:$0xff]  }
 0x43f   :  { %3647 = vst [vmem:[#allocation3 + $0x37] sm:$0x1] %v5381_v57  ;;  %3651 = vst [vmem:[#allocation3 + $0x3b] sm:$0x1] %v5382_v9  ;;  %v3688_v62 = vpack.c.bf16 %v3670_v6, %v3670_v6  ;;  %5550 = vmatpush3.bf16.msra.mxu1 %v6114_v12  ;;  %5572 = vmatpush3.bf16.msra.mxu0 %v6115_v53  ;;  %v6124_v38 = vld [vmem:[%s8792_s5 + $0x110] sm:$0xff]   ;;  %v6128_v4 = vld [vmem:[%s8792_s5 + $0x118] sm:$0xff]  }
 0x440   :  { %4775 = vmatprep.mubr.bf16.mxu1 %v3686_v52  ;;  %5551 = vmatprep.subr.bf16.mxu1 %v6118_v48  ;;  %v6125_v15 = vld [vmem:[%s8792_s5 + $0x190] sm:$0xff]   ;;  %v6129_v17 = vld [vmem:[%s8792_s5 + $0x198] sm:$0xff]   ;;  %v6130_v61 = vld [vmem:[%s8792_s5 + $0x160] sm:$0xff]  }
 0x441   :  { %4815 = vmatprep.mubr.bf16.mxu0 %v3688_v62  ;;  %5573 = vmatprep.subr.bf16.mxu0 %v6119_v41  ;;  %v6131_v33 = vld [vmem:[%s8792_s5 + $0x1e0] sm:$0xff]   ;;  %v6134_v19 = vld [vmem:[%s8792_s5 + $0x168] sm:$0xff]   ;;  %v6138_v55 = vld [vmem:[%s8792_s5 + $0x170] sm:$0xff]  }
 0x442   :  { %v6132_v23 = vld [vmem:[%s8792_s5 + $0x120] sm:$0xff]   ;;  %v6135_v47 = vld [vmem:[%s8792_s5 + $0x1e8] sm:$0xff]   ;;  %v6139_v18 = vld [vmem:[%s8792_s5 + $0x1f0] sm:$0xff]  }
 0x443   :  { %5552 = vmatpush3.bf16.msra.mxu1 %v6120_v63  ;;  %5574 = vmatpush3.bf16.msra.mxu0 %v6121_v28  ;;  %v6133_v30 = vld [vmem:[%s8792_s5 + $0x1a0] sm:$0xff]   ;;  %v6136_v26 = vld [vmem:[%s8792_s5 + $0x128] sm:$0xff]   ;;  %v6140_v46 = vld [vmem:[%s8792_s5 + $0x130] sm:$0xff]  }
 0x444   :  { %5553 = vmatprep.subr.bf16.mxu1 %v6122_v50  ;;  %5575 = vmatprep.subr.bf16.mxu0 %v6123_v40  ;;  %v6137_v29 = vld [vmem:[%s8792_s5 + $0x1a8] sm:$0xff]   ;;  %v6141_v21 = vld [vmem:[%s8792_s5 + $0x1b0] sm:$0xff]   ;;  %v6142_v5 = vld [vmem:[%s8792_s5 + $0x178] sm:$0xff]  }
 0x445   :  { %v6143_v58 = vld [vmem:[%s8792_s5 + $0x1f8] sm:$0xff]   ;;  %v8525_v10 = vld [vmem:[#allocation3 + $0x20] sm:$0xff]  ;;  %v8533_v27 = vld [vmem:[#allocation3 + $0x28] sm:$0xff] }
 0x446   :  { %v6144_v16 = vld [vmem:[%s8792_s5 + $0x138] sm:$0xff]   ;;  %v6146_v1 = vld [vmem:[%s8792_s5 + $0x240] sm:$0xff]   ;;  %v3671_v37 = vcombine.high %v8525_v10, %v8525_v10  ;;  %v3672_v24 = vcombine.high %v8533_v27, %v8533_v27  ;;  %v6152_v49 = vld [vmem:[%s8792_s5 + $0x248] sm:$0xff]  }
 0x447   :  { %5554 = vmatpush3.bf16.msra.mxu1 %v6124_v38  ;;  %5576 = vmatpush3.bf16.msra.mxu0 %v6125_v15  ;;  %v6145_v32 = vld [vmem:[%s8792_s5 + $0x1b8] sm:$0xff]   ;;  %v6147_v34 = vld [vmem:[%s8792_s5 + $0x2c0] sm:$0xff]   ;;  %v6153_v35 = vld [vmem:[%s8792_s5 + $0x2c8] sm:$0xff]  }
 0x448   :  { %5555 = vmatprep.subr.bf16.mxu1 %v6126_v36  ;;  %5577 = vmatprep.subr.bf16.mxu0 %v6127_v39  ;;  %v6148_v42 = vld [vmem:[%s8792_s5 + $0x200] sm:$0xff]   ;;  %v3690_v3 = vpack.c.bf16 %v3671_v37, %v3671_v37  ;;  %v3692_v20 = vpack.c.bf16 %v3672_v24, %v3672_v24  ;;  %v6154_v44 = vld [vmem:[%s8792_s5 + $0x208] sm:$0xff]   ;;  %v6156_v54 = vld [vmem:[%s8792_s5 + $0x250] sm:$0xff]   ;;  %v3689_v36 = vpack.c.bf16 %v8525_v10, %v8525_v10 }
 0x449   :  { %v6150_v45 = vld [vmem:[%s8792_s5 + $0x280] sm:$0xff]   ;;  %v6155_v51 = vld [vmem:[%s8792_s5 + $0x288] sm:$0xff]   ;;  %v6157_v14 = vld [vmem:[%s8792_s5 + $0x2d0] sm:$0xff]  }
 0x44a   :  { %v6158_v57 = vld [vmem:[%s8792_s5 + $0x210] sm:$0xff]   ;;  %v6160_v25 = vld [vmem:[%s8792_s5 + $0x258] sm:$0xff]   ;;  %v6164_v56 = vld [vmem:[%s8792_s5 + $0x260] sm:$0xff]  }
 0x44b   :  { %5556 = vmatpush3.bf16.msra.mxu1 %v6128_v4  ;;  %5578 = vmatpush3.bf16.msra.mxu0 %v6129_v17  ;;  %v6159_v9 = vld [vmem:[%s8792_s5 + $0x290] sm:$0xff]   ;;  %v6161_v22 = vld [vmem:[%s8792_s5 + $0x2d8] sm:$0xff]   ;;  %v6165_v12 = vld [vmem:[%s8792_s5 + $0x2e0] sm:$0xff]   ;;  %v3691_v4 = vpack.c.bf16 %v8533_v27, %v8533_v27  ;;  %v8926_v17 = vmov 0.0  }
 0x44c   :  { %5557 = vmatprep.subr.bf16.mxu1 %v6130_v61  ;;  %5579 = vmatprep.subr.bf16.mxu0 %v6131_v33  ;;  %v6162_v11 = vld [vmem:[%s8792_s5 + $0x218] sm:$0xff]   ;;  %v6166_v7 = vld [vmem:[%s8792_s5 + $0x220] sm:$0xff]   ;;  %v6168_v8 = vld [vmem:[%s8792_s5 + $0x268] sm:$0xff]  }
 0x44d   :  { %v6163_v60 = vld [vmem:[%s8792_s5 + $0x298] sm:$0xff]   ;;  %v6167_v2 = vld [vmem:[%s8792_s5 + $0x2a0] sm:$0xff]   ;;  %v6169_v0 = vld [vmem:[%s8792_s5 + $0x2e8] sm:$0xff]  }
 0x44e   :  { %v6170_v53 = vld [vmem:[%s8792_s5 + $0x228] sm:$0xff]   ;;  %v6172_v6 = vld [vmem:[%s8792_s5 + $0x270] sm:$0xff]   ;;  %v6176_v62 = vld [vmem:[%s8792_s5 + $0x278] sm:$0xff]  }
 0x44f   :  { %5558 = vmatpush3.bf16.msra.mxu1 %v6132_v23  ;;  %5580 = vmatpush3.bf16.msra.mxu0 %v6133_v30  ;;  %v6171_v43 = vld [vmem:[%s8792_s5 + $0x2a8] sm:$0xff]   ;;  %v6173_v13 = vld [vmem:[%s8792_s5 + $0x2f0] sm:$0xff]   ;;  %v6177_v41 = vld [vmem:[%s8792_s5 + $0x2f8] sm:$0xff]  }
 0x450   :  { %5559 = vmatprep.subr.bf16.mxu1 %v6134_v19  ;;  %5581 = vmatprep.subr.bf16.mxu0 %v6135_v47  ;;  %v6174_v48 = vld [vmem:[%s8792_s5 + $0x230] sm:$0xff]   ;;  %v6178_v63 = vld [vmem:[%s8792_s5 + $0x238] sm:$0xff]   ;;  %v6180_v40 = vld [vmem:[%s8792_s5 + $0x340] sm:$0xff]  }
 0x451   :  { %v6175_v52 = vld [vmem:[%s8792_s5 + $0x2b0] sm:$0xff]   ;;  %v6179_v50 = vld [vmem:[%s8792_s5 + $0x2b8] sm:$0xff]   ;;  %v6181_v15 = vld [vmem:[%s8792_s5 + $0x300] sm:$0xff]  }
 0x452   :  { %v8633_v28 = vld [vmem:[#allocation3 + $0x30] sm:$0xff]  ;;  %v6183_v39 = vld [vmem:[%s8792_s5 + $0x380] sm:$0xff]   ;;  %v6184_v61 = vld [vmem:[%s8792_s5 + $0x348] sm:$0xff]  }
 0x453   :  { %5560 = vmatpush3.bf16.msra.mxu1 %v6136_v26  ;;  %5582 = vmatpush3.bf16.msra.mxu0 %v6137_v29  ;;  %v3673_v38 = vcombine.high %v8633_v28, %v8633_v28  ;;  %v6185_v23 = vld [vmem:[%s8792_s5 + $0x308] sm:$0xff]   ;;  %v6187_v19 = vld [vmem:[%s8792_s5 + $0x350] sm:$0xff]   ;;  %v6190_v29 = vld [vmem:[%s8792_s5 + $0x358] sm:$0xff]  }
 0x454   :  { %5561 = vmatprep.subr.bf16.mxu1 %v6138_v55  ;;  %5583 = vmatprep.subr.bf16.mxu0 %v6139_v18  ;;  %v6186_v30 = vld [vmem:[%s8792_s5 + $0x388] sm:$0xff]   ;;  %v6188_v47 = vld [vmem:[%s8792_s5 + $0x310] sm:$0xff]   ;;  %v6191_v55 = vld [vmem:[%s8792_s5 + $0x318] sm:$0xff]  }
 0x455   :  { %v3694_v33 = vpack.c.bf16 %v3673_v38, %v3673_v38  ;;  %v6189_v26 = vld [vmem:[%s8792_s5 + $0x390] sm:$0xff]   ;;  %v6192_v18 = vld [vmem:[%s8792_s5 + $0x398] sm:$0xff]   ;;  %v6198_v10 = vld [vmem:[%s8792_s5 + $0x3a8] sm:$0xff]  }
 0x456   :  { %v6201_v27 = vld [vmem:[%s8792_s5 + $0x3b0] sm:$0xff]   ;;  %v6203_v37 = vld [vmem:[%s8792_s5 + $0x338] sm:$0xff]  }
 0x457   :  { %5562 = vmatpush3.bf16.msra.mxu1 %v6140_v46  ;;  %5584 = vmatpush3.bf16.msra.mxu0 %v6141_v21  ;;  %v6193_v46 = vld [vmem:[%s8792_s5 + $0x360] sm:$0xff]   ;;  %v3659_v24 = vld [vmem:[#allocation3 + $0x38] sm:$0xf] }
 0x458   :  { %5563 = vmatprep.subr.bf16.mxu1 %v6142_v5  ;;  %5585 = vmatprep.subr.bf16.mxu0 %v6143_v58  ;;  %v6194_v21 = vld [vmem:[%s8792_s5 + $0x320] sm:$0xff]   ;;  %v6196_v58 = vld [vmem:[%s8792_s5 + $0x368] sm:$0xff]  }
 0x459   :  { %v6195_v5 = vld [vmem:[%s8792_s5 + $0x3a0] sm:$0xff]  }
 0x45b   :  { %5564 = vmatpush3.bf16.msra.mxu1 %v6144_v16  ;;  %5586 = vmatpush3.bf16.msra.mxu0 %v6145_v32  ;;  %v6197_v16 = vld [vmem:[%s8792_s5 + $0x328] sm:$0xff]   ;;  %v6199_v32 = vld [vmem:[%s8792_s5 + $0x370] sm:$0xff]  }
 0x45c   :  { %5593 = vmatprep.subr.bf16.mxu1 %v6146_v1  ;;  %5615 = vmatprep.subr.bf16.mxu0 %v6147_v34  ;;  %v6200_v1 = vld [vmem:[%s8792_s5 + $0x330] sm:$0xff]   ;;  %v6202_v34 = vld [vmem:[%s8792_s5 + $0x378] sm:$0xff]  }
 0x45e   :  { %4776 = vmatmul.mubr.bf16.vlgmr.msra.gmra.mrb[8].mxu1 %v3685_v59  ;;  %4816 = vmatmul.mubr.bf16.vlgmr.msra.gmra.mrb[20].mxu0 %v3687_v31  ;;  %v3693_v59 = vpack.c.bf16 %v8633_v28, %v8633_v28  ;;  %v4984_v31 = vld [vmem:[%s8794_s7] sm:$0xff] }
 0x45f   :  { %5594 = vmatpush3.bf16.msra.mxu1 %v6148_v42  ;;  %4855 = vmatprep.mubr.bf16.mxu1 %v3690_v3  ;;  %v6204_v42 = vld [vmem:[%s8792_s5 + $0x3b8] sm:$0xff]   ;;  %v4986_v3 = vld [vmem:[%s8794_s7 + $0x10] sm:$0xff] }
 0x460   :  { %5616 = vmatpush3.bf16.msra.mxu0 %v6150_v45  ;;  %4895 = vmatprep.mubr.bf16.mxu0 %v3692_v20  ;;  %v3695_v45 = vpack.c.bf16 %v3659_v24, %v3659_v24 }
 0x461   :  { %5595 = vmatprep.subr.bf16.mxu1 %v6152_v49  ;;  %5617 = vmatprep.subr.bf16.mxu0 %v6153_v35  ;;  %v4985_v49 = vld [vmem:[%s8794_s7 + $0x8] sm:$0xff]  ;;  %v6253_v35 = vmov 0.0|0.0  }
 0x462   :  { %v5741_v20 = vpack.c.bf16 %v4985_v49, %v4984_v31 }
 0x463   :  { %5596 = vmatpush3.bf16.msra.mxu1 %v6154_v44  ;;  %v4987_v44 = vld [vmem:[%s8794_s7 + $0x18] sm:$0xff] }
 0x464   :  { %5618 = vmatpush3.bf16.msra.mxu0 %v6155_v51  ;;  %5597 = vmatprep.subr.bf16.mxu1 %v6156_v54  ;;  %v5744_v51 = vpack.c.bf16 %v4987_v44, %v4986_v3  ;;  %v4988_v54 = vld [vmem:[%s8794_s7 + $0x20] sm:$0xff] }
 0x465   :  { %5619 = vmatprep.subr.bf16.mxu0 %v6157_v14  ;;  %v4989_v14 = vld [vmem:[%s8794_s7 + $0x28] sm:$0xff] }
 0x467   :  { %5598 = vmatpush3.bf16.msra.mxu1 %v6158_v57  ;;  %v5747_v57 = vpack.c.bf16 %v4989_v14, %v4988_v54 }
 0x468   :  { %5620 = vmatpush3.bf16.msra.mxu0 %v6159_v9  ;;  %5599 = vmatprep.subr.bf16.mxu1 %v6160_v25  ;;  %v4990_v9 = vld [vmem:[%s8794_s7 + $0x30] sm:$0xff]  ;;  %v4991_v25 = vld [vmem:[%s8794_s7 + $0x38] sm:$0xff] }
 0x469   :  { %5621 = vmatprep.subr.bf16.mxu0 %v6161_v22  ;;  %v5750_v22 = vpack.c.bf16 %v4991_v25, %v4990_v9  ;;  %v5504_v9 = vld [vmem:[%s8795_s8] ss:$0 sm:$0xff] }
 0x46b   :  { %5600 = vmatpush3.bf16.msra.mxu1 %v6162_v11  ;;  %v4992_v11 = vld [vmem:[%s8794_s7 + $0x40] sm:$0xff] }
 0x46c   :  { %5622 = vmatpush3.bf16.msra.mxu0 %v6163_v60  ;;  %5601 = vmatprep.subr.bf16.mxu1 %v6164_v56  ;;  %v4993_v60 = vld [vmem:[%s8794_s7 + $0x48] sm:$0xff] }
 0x46d   :  { %5623 = vmatprep.subr.bf16.mxu0 %v6165_v12  ;;  %v5753_v56 = vpack.c.bf16 %v4993_v60, %v4992_v11  ;;  %v4994_v12 = vld [vmem:[%s8794_s7 + $0x50] sm:$0xff] }
 0x46f   :  { %5602 = vmatpush3.bf16.msra.mxu1 %v6166_v7  ;;  %v4995_v7 = vld [vmem:[%s8794_s7 + $0x58] sm:$0xff] }
 0x470   :  { %5624 = vmatpush3.bf16.msra.mxu0 %v6167_v2  ;;  %5603 = vmatprep.subr.bf16.mxu1 %v6168_v8  ;;  %v5756_v2 = vpack.c.bf16 %v4995_v7, %v4994_v12  ;;  %v4996_v8 = vld [vmem:[%s8794_s7 + $0x60] sm:$0xff] }
 0x471   :  { %5625 = vmatprep.subr.bf16.mxu0 %v6169_v0  ;;  %v4997_v0 = vld [vmem:[%s8794_s7 + $0x68] sm:$0xff] }
 0x473   :  { %5604 = vmatpush3.bf16.msra.mxu1 %v6170_v53  ;;  %v5759_v53 = vpack.c.bf16 %v4997_v0, %v4996_v8 }
 0x474   :  { %5626 = vmatpush3.bf16.msra.mxu0 %v6171_v43  ;;  %5605 = vmatprep.subr.bf16.mxu1 %v6172_v6  ;;  %v4998_v43 = vld [vmem:[%s8794_s7 + $0x70] sm:$0xff]  ;;  %v4999_v6 = vld [vmem:[%s8794_s7 + $0x78] sm:$0xff] }
 0x475   :  { %5627 = vmatprep.subr.bf16.mxu0 %v6173_v13  ;;  %v5762_v13 = vpack.c.bf16 %v4999_v6, %v4998_v43 }
 0x477   :  { %5606 = vmatpush3.bf16.msra.mxu1 %v6174_v48 }
 0x478   :  { %5628 = vmatpush3.bf16.msra.mxu0 %v6175_v52  ;;  %5607 = vmatprep.subr.bf16.mxu1 %v6176_v62  ;;  %v5383_v62 = vld [vmem:[%s8793_s6] ss:$0 sm:$0xff] }
 0x479   :  { %5629 = vmatprep.subr.bf16.mxu0 %v6177_v41 }
 0x47b   :  { %5608 = vmatpush3.bf16.msra.mxu1 %v6178_v63 }
 0x47c   :  { %5630 = vmatpush3.bf16.msra.mxu0 %v6179_v50  ;;  %5637 = vmatprep.subr.bf16.mxu1 %v6180_v40 }
 0x47d   :  { %5685 = vmatprep.subr.bf16.mxu0 %v8926_v17 }
 0x47e   :  { %4856 = vmatmul.mubr.bf16.vlgmr.msra.gmra.mrb[12].mxu1 %v3689_v36 }
 0x47f   :  { %4896 = vmatmul.mubr.bf16.vlgmr.msra.gmra.mrb[24].mxu0 %v3691_v4  ;;  %5638 = vmatpush3.bf16.msra.mxu1 %v6181_v15 }
 0x480   :  { %4935 = vmatprep.mubr.bf16.mxu1 %v3694_v33  ;;  %5686 = vmatpush3.bf16.msra.mxu0 %v6183_v39 }
 0x481   :  { %5639 = vmatprep.subr.bf16.mxu1 %v6184_v61  ;;  %5687 = vmatprep.subr.bf16.mxu0 %v8926_v17 }
 0x482   :  { %5701 = vmatprep.mubr.msk.bf16.mxu0 %vm6252_vm5, %v8926_v17 }
 0x483   :  { %5640 = vmatpush3.bf16.msra.mxu1 %v6185_v23 }
 0x484   :  { %5688 = vmatpush3.bf16.msra.mxu0 %v6186_v30  ;;  %5641 = vmatprep.subr.bf16.mxu1 %v6187_v19 }
 0x485   :  { %5689 = vmatprep.subr.bf16.mxu0 %v8926_v17 }
 0x487   :  { %5642 = vmatpush3.bf16.msra.mxu1 %v6188_v47 }
 0x488   :  { %5690 = vmatpush3.bf16.msra.mxu0 %v6189_v26  ;;  %5643 = vmatprep.subr.bf16.mxu1 %v6190_v29 }
 0x489   :  { %5691 = vmatprep.subr.bf16.mxu0 %v8926_v17 }
 0x48b   :  { %5644 = vmatpush3.bf16.msra.mxu1 %v6191_v55 }
 0x48c   :  { %5692 = vmatpush3.bf16.msra.mxu0 %v6192_v18  ;;  %5645 = vmatprep.subr.bf16.mxu1 %v6193_v46 }
 0x48d   :  { %5693 = vmatprep.subr.bf16.mxu0 %v8926_v17 }
 0x48f   :  { %5646 = vmatpush3.bf16.msra.mxu1 %v6194_v21 }
 0x490   :  { %5694 = vmatpush3.bf16.msra.mxu0 %v6195_v5  ;;  %5647 = vmatprep.subr.bf16.mxu1 %v6196_v58 }
 0x491   :  { %5695 = vmatprep.subr.bf16.mxu0 %v8926_v17 }
 0x493   :  { %5648 = vmatpush3.bf16.msra.mxu1 %v6197_v16 }
 0x494   :  { %5696 = vmatpush3.bf16.msra.mxu0 %v6198_v10  ;;  %5649 = vmatprep.subr.bf16.mxu1 %v6199_v32 }
 0x495   :  { %5697 = vmatprep.subr.bf16.mxu0 %v8926_v17 }
 0x497   :  { %5650 = vmatpush3.bf16.msra.mxu1 %v6200_v1 }
 0x498   :  { %5698 = vmatpush3.bf16.msra.mxu0 %v6201_v27  ;;  %5651 = vmatprep.subr.bf16.mxu1 %v6202_v34 }
 0x499   :  { %5699 = vmatprep.subr.bf16.mxu0 %v8926_v17 }
 0x49b   :  { %5652 = vmatpush3.bf16.msra.mxu1 %v6203_v37 }
 0x49c   :  { %5700 = vmatpush3.bf16.msra.mxu0 %v6204_v42  ;;  %5740 = vmatprep.subr.bf16.mxu1 %v6253_v35 }
 0x49e   :  { %4936 = vmatmul.mubr.bf16.vlgmr.msra.gmra.mrb[16].mxu1 %v3693_v59 }
 0x49f   :  { %5702 = vmatmul.mubr.bf16.vlgmr.msra.gmra.mrb[28].mxu0 %v3695_v45  ;;  %5737 = vmatprep.mubr.msk.f32.mxu1 %vm6252_vm5, %v8926_v17 }
 0x4a0   :  { %5742 = vmatpush3.bf16.msra.mxu1 %v5741_v20 }
 0x4a1   :  { %5743 = vmatprep.subr.bf16.mxu1 %v6253_v35 }
 0x4a4   :  { %5745 = vmatpush3.bf16.msra.mxu1 %v5744_v51 }
 0x4a5   :  { %5746 = vmatprep.subr.bf16.mxu1 %v6253_v35 }
 0x4a8   :  { %5748 = vmatpush3.bf16.msra.mxu1 %v5747_v57 }
 0x4a9   :  { %5749 = vmatprep.subr.bf16.mxu1 %v6253_v35 }
 0x4ac   :  { %5751 = vmatpush3.bf16.msra.mxu1 %v5750_v22 }
 0x4ad   :  { %5752 = vmatprep.subr.bf16.mxu1 %v6253_v35 }
 0x4b0   :  { %5754 = vmatpush3.bf16.msra.mxu1 %v5753_v56 }
 0x4b1   :  { %5755 = vmatprep.subr.bf16.mxu1 %v6253_v35 }
 0x4b4   :  { %5757 = vmatpush3.bf16.msra.mxu1 %v5756_v2 }
 0x4b5   :  { %5758 = vmatprep.subr.bf16.mxu1 %v6253_v35 }
 0x4b8   :  { %5760 = vmatpush3.bf16.msra.mxu1 %v5759_v53 }
 0x4b9   :  { %5761 = vmatprep.subr.bf16.mxu1 %v6253_v35 }
 0x4bc   :  { %5763 = vmatpush3.bf16.msra.mxu1 %v5762_v13 }
 0x511   :  { %v5521_v48 = vpop.f32.mrb[4].mxu1  ;;  %v5543_v52 = vpop.f32.mrb[16].mxu0 }
 0x512   :  { %v5522_v41 = vpop.f32.mrb[5].mxu1  ;;  %v5544_v28 = vpop.f32.mrb[17].mxu0 }
 0x513   :  { %v5523_v63 = vadd.f32 %v5522_v41, %v5521_v48  ;;  %v5524_v50 = vpop.f32.mrb[6].mxu1  ;;  %v5545_v40 = vadd.f32 %v5544_v28, %v5543_v52  ;;  %v5546_v38 = vpop.f32.mrb[18].mxu0 }
 0x514   :  { %v5525_v15 = vpop.f32.mrb[7].mxu1  ;;  %v5547_v39 = vpop.f32.mrb[19].mxu0 }
 0x515   :  { %v4698_v36 = vadd.f32 %v5523_v63, %v5383_v62 }
 0x517   :  { %v4738_v4 = vadd.f32 %v5545_v40, %v4698_v36 }
 0x531   :  { %v5565_v17 = vpop.f32.mrb[8].mxu1  ;;  %v5587_v61 = vpop.f32.mrb[20].mxu0 }
 0x532   :  { %v5566_v33 = vpop.f32.mrb[9].mxu1  ;;  %v5588_v30 = vpop.f32.mrb[21].mxu0 }
 0x533   :  { %v5567_v23 = vadd.f32 %v5566_v33, %v5565_v17  ;;  %v5568_v19 = vpop.f32.mrb[10].mxu1  ;;  %v5589_v47 = vadd.f32 %v5588_v30, %v5587_v61  ;;  %v5590_v26 = vpop.f32.mrb[22].mxu0 }
 0x534   :  { %v5569_v29 = vpop.f32.mrb[11].mxu1  ;;  %v5591_v18 = vpop.f32.mrb[23].mxu0 }
 0x535   :  { %v4778_v55 = vadd.f32 %v5567_v23, %v4738_v4 }
 0x537   :  { %v4818_v46 = vadd.f32 %v5589_v47, %v4778_v55 }
 0x551   :  { %v5609_v21 = vpop.f32.mrb[12].mxu1 }
 0x552   :  { %v5631_v5 = vpop.f32.mrb[24].mxu0  ;;  %v5610_v58 = vpop.f32.mrb[13].mxu1 }
 0x553   :  { %v5611_v16 = vadd.f32 %v5610_v58, %v5609_v21  ;;  %v5632_v10 = vpop.f32.mrb[25].mxu0  ;;  %v5612_v32 = vpop.f32.mrb[14].mxu1 }
 0x554   :  { %v5633_v1 = vadd.f32 %v5632_v10, %v5631_v5  ;;  %v5634_v27 = vpop.f32.mrb[26].mxu0  ;;  %v5613_v34 = vpop.f32.mrb[15].mxu1 }
 0x555   :  { %v4858_v37 = vadd.f32 %v5611_v16, %v4818_v46  ;;  %v5635_v42 = vpop.f32.mrb[27].mxu0 }
 0x557   :  { %v4898_v24 = vadd.f32 %v5633_v1, %v4858_v37 }
 0x571   :  { %v5653_v59 = vpop.f32.mrb[16].mxu1 }
 0x572   :  { %v4977_v45 = vpop.f32.mrb[28].mxu0  ;;  %v5654_v31 = vpop.f32.mrb[17].mxu1 }
 0x573   :  { %v5655_v49 = vadd.f32 %v5654_v31, %v5653_v59  ;;  %v5703_v3 = vpop.f32.mrb[29].mxu0  ;;  %v5656_v35 = vpop.f32.mrb[18].mxu1 }
 0x574   :  { %v4980_v20 = vpop.f32.mrb[30].mxu0  ;;  %v5657_v44 = vpop.f32.mrb[19].mxu1 }
 0x575   :  { %v4938_v51 = vadd.f32 %v5655_v49, %v4898_v24  ;;  %v5704_v54 = vpop.f32.mrb[31].mxu0 }
 0x577   :  { %v4978_v14 = vadd.f32 %v4977_v45, %v4938_v51 }
 0x579   :  { %v4983_v57 = vmax.f32 %v4978_v14, 0.0 }
 0x57b   :  { %5738 = vmatmul.mubr.f32.vlgmr.msra.gmra.mrb[20].mxu1 %v4983_v57 }
 0x64e   :  { %v5073_v25 = vpop.f32.mrb[20].mxu1 }
 0x64f   :  { %v5074_v22 = vadd.f32 %v5504_v9, %v5073_v25  ;;  %v5739_v11 = vpop.f32.mrb[21].mxu1 }
 0x651   :  { %5078 = vst.msk [vmem:[%s8796_s9] sm:$0xf] %vm5077_vm6, %v5074_v22 }
 0x652   :  { %5083 = vsyncpa [#allocation5], 1 }
 0x653   :  { %5084 = vsyncpa [#allocation7], 1 }

</bundles_post_ra>
